<compile_context>
chip_gen: v6e
topology: v6e:2x2x1
jax: 0.10.0
libtpu: 0.0.40
codegen_flags: <defaults>
</compile_context>

<pallas_src>
import functools

import jax
import jax.numpy as jnp
from jax.experimental import pallas as pl
from jax.experimental.pallas import tpu as pltpu

_COMPUTE_DTYPE = jnp.bfloat16          # MXU input dtype for the convs
_VMEM_LIMIT_BYTES = 48 * 1024 * 1024   # headroom below v7x's 64 MiB VMEM


def _pick_batch_tile(B, HW):
    """Largest batch tile with M = BT*HW <= 512 that still leaves >= 2 grid
    steps (pipelining + megacore) when the batch allows it."""
    for bt in range(B, 0, -1):
        if B % bt != 0:
            continue
        if bt * HW <= 512 and (B // bt >= 2 or B == 1):
            return bt
    return 1


# ----------------------------------------------------------------------------
# Fully fused CDM kernel: conv chain + per-pixel attention, one batch tile per
# grid step.  All activations stay in VMEM.
# ----------------------------------------------------------------------------
def _cdm_kernel(x_ref, y_ref, ltw_ref, ltb_ref, p1w_ref, p1b_ref,
                p2w_ref, p2b_ref, aw_ref, o_ref, pad0, pad1,
                *, BT, H, W, C, L, heads):
    Cin = 2 * C
    CL = L * C
    M = BT * H * W
    Dh = C // heads
    scale = 1.0 / float(Dh) ** 0.5
    f32 = jnp.float32

    # --- zero ONLY the border strips of the padded scratches.  The interior is
    # fully overwritten every step; re-zeroing the borders each step stays
    # correct when the batch grid is split across TensorCores.
    def zero_borders(pad, Ch):
        pad[:, 0:1, :, :] = jnp.zeros((BT, 1, W + 2, Ch), f32)
        pad[:, H + 1:H + 2, :, :] = jnp.zeros((BT, 1, W + 2, Ch), f32)
        pad[:, 1:H + 1, 0:1, :] = jnp.zeros((BT, H, 1, Ch), f32)
        pad[:, 1:H + 1, W + 1:W + 2, :] = jnp.zeros((BT, H, 1, Ch), f32)

    zero_borders(pad0, Cin)
    zero_borders(pad1, CL)

    # --- torch.cat([x, y], dim=1) done by the scratch fill (no HBM concat).
    pad0[:, 1:H + 1, 1:W + 1, 0:C] = x_ref[...]
    pad0[:, 1:H + 1, 1:W + 1, C:Cin] = y_ref[...]

    def conv3x3(pad, w_ref, b_ref, ch_in):
        """3x3 'SAME' conv as 9 accumulated (M, ch_in) x (ch_in, ch_out) dots
        (no tap concatenate / relayout)."""
        pv = pad[...]                                      # (BT, H+2, W+2, ch_in)
        acc = None
        for k in range(9):
            dy, dx = divmod(k, 3)
            taps = pv[:, dy:dy + H, dx:dx + W, :].reshape(M, ch_in)
            d = jnp.dot(taps.astype(_COMPUTE_DTYPE), w_ref[k],
                        preferred_element_type=f32)
            acc = d if acc is None else acc + d
        return acc + b_ref[...]                            # (M, ch_out) f32

    # linear_trans: Conv2d(2C -> C*L, kernel=3, padding=1)
    states = conv3x3(pad0, ltw_ref, ltb_ref, Cin)          # (M, CL)

    # BasicBlock: conv -> ReLU -> conv -> +skip -> ReLU
    # TODO(synk): BasicBlock body is not in the provided snippet; implemented
    # as the standard residual block.
    pad1[:, 1:H + 1, 1:W + 1, :] = states.reshape(BT, H, W, CL)
    h1 = jnp.maximum(conv3x3(pad1, p1w_ref, p1b_ref, CL), 0.0)
    pad1[:, 1:H + 1, 1:W + 1, :] = h1.reshape(BT, H, W, CL)     # reuse pad1
    s2 = jnp.maximum(conv3x3(pad1, p2w_ref, p2b_ref, CL) + states, 0.0)

    # --- StateTransformer: per-pixel multi-head attention over the L tokens.
    # TODO(synk): StateTransformer body is not in the provided snippet;
    # implemented as per-pixel MHA over L tokens (feature dim C) + residual.
    # Token-lane-major: pixels on the lane axis; all math below is full-width
    # VPU FMAs with scalar weights from SMEM (C is too small for the MXU).
    tokT = jnp.transpose(s2)                               # (CL, M)
    xv = [tokT[i:i + 1, :] for i in range(CL)]             # CL x (1, M)

    ow = C * C                                             # packed SMEM offsets
    wq = [[aw_ref[0 * ow + i * C + j] for j in range(C)] for i in range(C)]
    wk = [[aw_ref[1 * ow + i * C + j] for j in range(C)] for i in range(C)]
    wv = [[aw_ref[2 * ow + i * C + j] for j in range(C)] for i in range(C)]
    wo = [[aw_ref[3 * ow + i * C + j] for j in range(C)] for i in range(C)]
    bq = [aw_ref[4 * ow + j] for j in range(C)]
    bk = [aw_ref[4 * ow + C + j] for j in range(C)]
    bv = [aw_ref[4 * ow + 2 * C + j] for j in range(C)]
    bo = [aw_ref[4 * ow + 3 * C + j] for j in range(C)]

    def proj(w, b):
        out = []
        for l in range(L):
            for co in range(C):
                acc = xv[l * C + 0] * w[0][co]
                for ci in range(1, C):
                    acc = acc + xv[l * C + ci] * w[ci][co]
                out.append(acc + b[co])
        return out

    q = proj(wq, bq)
    k = proj(wk, bk)
    v = proj(wv, bv)

    o_tok = [[None] * C for _ in range(L)]                 # attended values
    for h in range(heads):
        off = h * Dh
        for li in range(L):
            srow = []
            for lj in range(L):
                s = q[li * C + off] * k[lj * C + off]
                for d in range(1, Dh):
                    s = s + q[li * C + off + d] * k[lj * C + off + d]
                srow.append(s * scale)
            mx = srow[0]
            for lj in range(1, L):
                mx = jnp.maximum(mx, srow[lj])
            p = [jnp.exp(s_ - mx) for s_ in srow]
            den = p[0]
            for lj in range(1, L):
                den = den + p[lj]
            inv = pl.reciprocal(den, approx=True)          # EUP slot
            for d in range(Dh):
                acc = p[0] * v[0 * C + off + d]
                for lj in range(1, L):
                    acc = acc + p[lj] * v[lj * C + off + d]
                o_tok[li][off + d] = acc * inv

    # output projection + residual
    final = []
    for l in range(L):
        for co in range(C):
            acc = o_tok[l][0] * wo[0][co]
            for ci in range(1, C):
                acc = acc + o_tok[l][ci] * wo[ci][co]
            final.append(xv[l * C + co] + acc + bo[co])

    res = jnp.concatenate(final, axis=0)                   # (CL, M) lane-major
    if BT == 1:
        o_ref[...] = res.reshape(1, CL, H * W)
    else:
        o_ref[...] = jnp.transpose(res.reshape(CL, BT, H * W), (1, 0, 2))


def cdm_forward(params, x, y, maxx, minn, decon_loss_fun, layer,
                *, num_L, in_channel, head):
    B, C, H, W = x.shape
    assert C == in_channel and C % head == 0
    L = num_L
    CL = L * C

    x_nhwc = jnp.transpose(x, (0, 2, 3, 1))                # NCHW -> NHWC
    y_nhwc = jnp.transpose(y, (0, 2, 3, 1))

    BT = _pick_batch_tile(B, H * W)
    G = B // BT

    # conv weights packed as (tap, Cin, Cout), pre-cast to bf16 once.
    ltw = params["lt_w"].reshape(9, 2 * C, CL).astype(_COMPUTE_DTYPE)
    p1w = params["p1_w"].reshape(9, CL, CL).astype(_COMPUTE_DTYPE)
    p2w = params["p2_w"].reshape(9, CL, CL).astype(_COMPUTE_DTYPE)
    ltb = params["lt_b"].reshape(1, CL)
    p1b = params["p1_b"].reshape(1, CL)
    p2b = params["p2_b"].reshape(1, CL)

    # attention parameters flattened into one small SMEM scalar table.
    attn_flat = jnp.concatenate([
        params["wq"].reshape(-1), params["wk"].reshape(-1),
        params["wv"].reshape(-1), params["wo"].reshape(-1),
        params["bq"], params["bk"], params["bv"], params["bo"]])

    kernel = functools.partial(_cdm_kernel, BT=BT, H=H, W=W, C=C, L=L,
                               heads=head)
    bcast = lambda shape: pl.BlockSpec(shape, lambda g, n=len(shape): (0,) * n)

    out = pl.pallas_call(
        kernel,
        out_shape=jax.ShapeDtypeStruct((B, CL, H * W), jnp.float32),
        grid=(G,),
        in_specs=[
            pl.BlockSpec((BT, H, W, C), lambda g: (g, 0, 0, 0)),
            pl.BlockSpec((BT, H, W, C), lambda g: (g, 0, 0, 0)),
            bcast((9, 2 * C, CL)), bcast((1, CL)),
            bcast((9, CL, CL)), bcast((1, CL)),
            bcast((9, CL, CL)), bcast((1, CL)),
            pl.BlockSpec(memory_space=pltpu.MemorySpace.SMEM),
        ],
        out_specs=pl.BlockSpec((BT, CL, H * W), lambda g: (g, 0, 0)),
        scratch_shapes=[
            pltpu.VMEM((BT, H + 2, W + 2, 2 * C), jnp.float32),
            pltpu.VMEM((BT, H + 2, W + 2, CL), jnp.float32),
        ],
        compiler_params=pltpu.CompilerParams(
            dimension_semantics=("parallel",),
            vmem_limit_bytes=_VMEM_LIMIT_BYTES),
    )(x_nhwc, y_nhwc, ltw, ltb, p1w, p1b, p2w, p2b, attn_flat)

    # (B, L*C, H*W) -> (B, L, C, H, W): pure metadata reshape, no data movement.
    states = out.reshape(B, L, C, H, W)
    decon_loss = 0.0        # matches the reference forward (decon_loss = 0)
    return states, decon_loss


# ----------------------------------------------------------------------------
# Parameter init (deterministic, synthetic).
# ----------------------------------------------------------------------------
def init_params(key, num_L, in_channel):
    C = in_channel
    CL = C * num_L
    ks = jax.random.split(key, 14)
    s = 0.1
    n = jax.random.normal
    return {
        # linear_trans: Conv2d(2C -> C*L, k=3, pad=1), weights stored HWIO
        "lt_w": n(ks[0], (3, 3, 2 * C, CL), jnp.float32) * s,
        "lt_b": n(ks[1], (CL,), jnp.float32) * s,
        # BasicBlock convs (CL -> CL)
        "p1_w": n(ks[2], (3, 3, CL, CL), jnp.float32) * s,
        "p1_b": n(ks[3], (CL,), jnp.float32) * s,
        "p2_w": n(ks[4], (3, 3, CL, CL), jnp.float32) * s,
        "p2_b": n(ks[5], (CL,), jnp.float32) * s,
        # StateTransformer projections (C -> C)
        "wq": n(ks[6], (C, C), jnp.float32) * s, "bq": n(ks[7], (C,), jnp.float32) * s,
        "wk": n(ks[8], (C, C), jnp.float32) * s, "bk": n(ks[9], (C,), jnp.float32) * s,
        "wv": n(ks[10], (C, C), jnp.float32) * s, "bv": n(ks[11], (C,), jnp.float32) * s,
        "wo": n(ks[12], (C, C), jnp.float32) * s, "bo": n(ks[13], (C,), jnp.float32) * s,
    }


# ----------------------------------------------------------------------------
# Pure-JAX reference (f32) for a numerical sanity check.
# ----------------------------------------------------------------------------
def _reference_forward(params, x, y, *, num_L, in_channel, head):
    B, C, H, W = x.shape
    L = num_L

    def conv3x3_ref(inp_nhwc, w_hwio, b):
        return jax.lax.conv_general_dilated(
            inp_nhwc, w_hwio, window_strides=(1, 1), padding="SAME",
            dimension_numbers=("NHWC", "HWIO", "NHWC")) + b

    x_nhwc = jnp.transpose(x, (0, 2, 3, 1))
    y_nhwc = jnp.transpose(y, (0, 2, 3, 1))
    cat = jnp.concatenate([x_nhwc, y_nhwc], axis=-1)
    states = conv3x3_ref(cat, params["lt_w"], params["lt_b"])
    h1 = jax.nn.relu(conv3x3_ref(states, params["p1_w"], params["p1_b"]))
    states = jax.nn.relu(conv3x3_ref(h1, params["p2_w"], params["p2_b"]) + states)

    tok = states.reshape(B * H * W, L, C)
    q = tok @ params["wq"] + params["bq"]
    k = tok @ params["wk"] + params["bk"]
    v = tok @ params["wv"] + params["bv"]
    Dh = C // head
    outs = []
    for h in range(head):
        sl = slice(h * Dh, (h + 1) * Dh)
        s = jnp.einsum('nld,nmd->nlm', q[..., sl], k[..., sl]) / float(Dh) ** 0.5
        p = jax.nn.softmax(s, axis=-1)
        outs.append(jnp.einsum('nlm,nmd->nld', p, v[..., sl]))
    o = jnp.concatenate(outs, axis=-1)
    proj = o @ params["wo"] + params["bo"]
    out = (tok + proj).reshape(B, H, W, L, C)
    return jnp.transpose(out, (0, 3, 4, 1, 2))


if __name__ == "__main__":
    num_L, in_channel, head = 4, 4, 2
    B, H, W = 2, 8, 8

    key = jax.random.PRNGKey(0)
    kx, ky, kp = jax.random.split(key, 3)
    x = jax.random.normal(kx, (B, in_channel, H, W), jnp.float32)
    y = jax.random.normal(ky, (B, in_channel, H, W), jnp.float32)
    params = init_params(kp, num_L, in_channel)

    fwd = jax.jit(functools.partial(
        cdm_forward, num_L=num_L, in_channel=in_channel, head=head))
    states, decon_loss = fwd(params, x, y, None, None, None, None)
    states = jax.block_until_ready(states)

    assert states.shape == (B, num_L, in_channel, H, W), states.shape
    assert jnp.all(jnp.isfinite(states))

    # Numerical check against a pure-JAX f32 reference; loose tolerance covers
    # the bf16 MXU conv inputs + approximate softmax reciprocal in the kernel.
    ref = _reference_forward(params, x, y, num_L=num_L, in_channel=in_channel,
                             head=head)
    err = float(jnp.max(jnp.abs(states - ref)))
    tol = 5e-2 * float(jnp.max(jnp.abs(ref))) + 5e-2
    assert err < tol, (err, tol)

    print("KERNEL_OK")
</pallas_src>

<mosaic_0001>
module attributes {stable_mosaic.version = 11 : i64} {
  func.func @_cdm_kernel(%arg0: i32, %arg1: memref<1x8x8x4xf32, #tpu.memory_space<vmem>>, %arg2: memref<1x8x8x4xf32, #tpu.memory_space<vmem>>, %arg3: memref<9x8x16xbf16, #tpu.memory_space<vmem>>, %arg4: memref<1x16xf32, #tpu.memory_space<vmem>>, %arg5: memref<9x16x16xbf16, #tpu.memory_space<vmem>>, %arg6: memref<1x16xf32, #tpu.memory_space<vmem>>, %arg7: memref<9x16x16xbf16, #tpu.memory_space<vmem>>, %arg8: memref<1x16xf32, #tpu.memory_space<vmem>>, %arg9: memref<80xf32, #tpu.memory_space<smem>>, %arg10: memref<1x16x64xf32, #tpu.memory_space<vmem>>, %arg11: memref<1x10x10x8xf32, #tpu.memory_space<vmem>>, %arg12: memref<1x10x10x16xf32, #tpu.memory_space<vmem>>) attributes {dimension_semantics = [#tpu.dimension_semantics<parallel>], iteration_bounds = array<i64: 2>, scalar_prefetch = 0 : i64, scratch_operands = 2 : i64, tpu.core_type = #tpu.core_type<tc>, window_params = [{transform_indices = @transform_0, window_bounds = array<i64: 1, 8, 8, 4>}, {transform_indices = @transform_1, window_bounds = array<i64: 1, 8, 8, 4>}, {pipeline_mode = #tpu.pipeline_mode<synchronous>, transform_indices = @transform_2, window_bounds = array<i64: 9, 8, 16>}, {pipeline_mode = #tpu.pipeline_mode<synchronous>, transform_indices = @transform_3, window_bounds = array<i64: 1, 16>}, {pipeline_mode = #tpu.pipeline_mode<synchronous>, transform_indices = @transform_4, window_bounds = array<i64: 9, 16, 16>}, {pipeline_mode = #tpu.pipeline_mode<synchronous>, transform_indices = @transform_5, window_bounds = array<i64: 1, 16>}, {pipeline_mode = #tpu.pipeline_mode<synchronous>, transform_indices = @transform_6, window_bounds = array<i64: 9, 16, 16>}, {pipeline_mode = #tpu.pipeline_mode<synchronous>, transform_indices = @transform_7, window_bounds = array<i64: 1, 16>}, {transform_indices = @transform_8, window_bounds = array<i64: 80>}, {transform_indices = @transform_9, window_bounds = array<i64: 1, 16, 64>}]} {
    %cst = arith.constant 0.000000e+00 : f32
    %0 = vector.broadcast %cst : f32 to vector<1x1x10x8xf32>
    %c0 = arith.constant 0 : index
    %c0_0 = arith.constant 0 : index
    %c0_1 = arith.constant 0 : index
    %c0_2 = arith.constant 0 : index
    %1 = vector.load %arg11[%c0, %c0_0, %c0_1, %c0_2] : memref<1x10x10x8xf32, #tpu.memory_space<vmem>>, vector<1x1x10x8xf32>
    tpu.vector_store %arg11[%c0, %c0_0, %c0_1, %c0_2], %0 {strides = array<i32>} : memref<1x10x10x8xf32, #tpu.memory_space<vmem>>, vector<1x1x10x8xf32>,
    %cst_3 = arith.constant 0.000000e+00 : f32
    %2 = vector.broadcast %cst_3 : f32 to vector<1x1x10x8xf32>
    %c0_4 = arith.constant 0 : index
    %c9 = arith.constant 9 : index
    %c0_5 = arith.constant 0 : index
    %c0_6 = arith.constant 0 : index
    %3 = vector.load %arg11[%c0_4, %c9, %c0_5, %c0_6] : memref<1x10x10x8xf32, #tpu.memory_space<vmem>>, vector<1x1x10x8xf32>
    tpu.vector_store %arg11[%c0_4, %c9, %c0_5, %c0_6], %2 {strides = array<i32>} : memref<1x10x10x8xf32, #tpu.memory_space<vmem>>, vector<1x1x10x8xf32>,
    %cst_7 = arith.constant 0.000000e+00 : f32
    %4 = vector.broadcast %cst_7 : f32 to vector<1x8x1x8xf32>
    %c0_8 = arith.constant 0 : index
    %c1 = arith.constant 1 : index
    %c0_9 = arith.constant 0 : index
    %c0_10 = arith.constant 0 : index
    %5 = vector.load %arg11[%c0_8, %c1, %c0_9, %c0_10] : memref<1x10x10x8xf32, #tpu.memory_space<vmem>>, vector<1x8x1x8xf32>
    tpu.vector_store %arg11[%c0_8, %c1, %c0_9, %c0_10], %4 {strides = array<i32>} : memref<1x10x10x8xf32, #tpu.memory_space<vmem>>, vector<1x8x1x8xf32>,
    %cst_11 = arith.constant 0.000000e+00 : f32
    %6 = vector.broadcast %cst_11 : f32 to vector<1x8x1x8xf32>
    %c0_12 = arith.constant 0 : index
    %c1_13 = arith.constant 1 : index
    %c9_14 = arith.constant 9 : index
    %c0_15 = arith.constant 0 : index
    %7 = vector.load %arg11[%c0_12, %c1_13, %c9_14, %c0_15] : memref<1x10x10x8xf32, #tpu.memory_space<vmem>>, vector<1x8x1x8xf32>
    tpu.vector_store %arg11[%c0_12, %c1_13, %c9_14, %c0_15], %6 {strides = array<i32>} : memref<1x10x10x8xf32, #tpu.memory_space<vmem>>, vector<1x8x1x8xf32>,
    %cst_16 = arith.constant 0.000000e+00 : f32
    %8 = vector.broadcast %cst_16 : f32 to vector<1x1x10x16xf32>
    %c0_17 = arith.constant 0 : index
    %c0_18 = arith.constant 0 : index
    %c0_19 = arith.constant 0 : index
    %c0_20 = arith.constant 0 : index
    %9 = vector.load %arg12[%c0_17, %c0_18, %c0_19, %c0_20] : memref<1x10x10x16xf32, #tpu.memory_space<vmem>>, vector<1x1x10x16xf32>
    tpu.vector_store %arg12[%c0_17, %c0_18, %c0_19, %c0_20], %8 {strides = array<i32>} : memref<1x10x10x16xf32, #tpu.memory_space<vmem>>, vector<1x1x10x16xf32>,
    %cst_21 = arith.constant 0.000000e+00 : f32
    %10 = vector.broadcast %cst_21 : f32 to vector<1x1x10x16xf32>
    %c0_22 = arith.constant 0 : index
    %c9_23 = arith.constant 9 : index
    %c0_24 = arith.constant 0 : index
    %c0_25 = arith.constant 0 : index
    %11 = vector.load %arg12[%c0_22, %c9_23, %c0_24, %c0_25] : memref<1x10x10x16xf32, #tpu.memory_space<vmem>>, vector<1x1x10x16xf32>
    tpu.vector_store %arg12[%c0_22, %c9_23, %c0_24, %c0_25], %10 {strides = array<i32>} : memref<1x10x10x16xf32, #tpu.memory_space<vmem>>, vector<1x1x10x16xf32>,
    %cst_26 = arith.constant 0.000000e+00 : f32
    %12 = vector.broadcast %cst_26 : f32 to vector<1x8x1x16xf32>
    %c0_27 = arith.constant 0 : index
    %c1_28 = arith.constant 1 : index
    %c0_29 = arith.constant 0 : index
    %c0_30 = arith.constant 0 : index
    %13 = vector.load %arg12[%c0_27, %c1_28, %c0_29, %c0_30] : memref<1x10x10x16xf32, #tpu.memory_space<vmem>>, vector<1x8x1x16xf32>
    tpu.vector_store %arg12[%c0_27, %c1_28, %c0_29, %c0_30], %12 {strides = array<i32>} : memref<1x10x10x16xf32, #tpu.memory_space<vmem>>, vector<1x8x1x16xf32>,
    %cst_31 = arith.constant 0.000000e+00 : f32
    %14 = vector.broadcast %cst_31 : f32 to vector<1x8x1x16xf32>
    %c0_32 = arith.constant 0 : index
    %c1_33 = arith.constant 1 : index
    %c9_34 = arith.constant 9 : index
    %c0_35 = arith.constant 0 : index
    %15 = vector.load %arg12[%c0_32, %c1_33, %c9_34, %c0_35] : memref<1x10x10x16xf32, #tpu.memory_space<vmem>>, vector<1x8x1x16xf32>
    tpu.vector_store %arg12[%c0_32, %c1_33, %c9_34, %c0_35], %14 {strides = array<i32>} : memref<1x10x10x16xf32, #tpu.memory_space<vmem>>, vector<1x8x1x16xf32>,
    %c0_36 = arith.constant 0 : index
    %c0_37 = arith.constant 0 : index
    %c0_38 = arith.constant 0 : index
    %c0_39 = arith.constant 0 : index
    %16 = vector.load %arg1[%c0_36, %c0_37, %c0_38, %c0_39] : memref<1x8x8x4xf32, #tpu.memory_space<vmem>>, vector<1x8x8x4xf32>
    %c0_40 = arith.constant 0 : index
    %c1_41 = arith.constant 1 : index
    %c1_42 = arith.constant 1 : index
    %c0_43 = arith.constant 0 : index
    %17 = vector.load %arg11[%c0_40, %c1_41, %c1_42, %c0_43] : memref<1x10x10x8xf32, #tpu.memory_space<vmem>>, vector<1x8x8x4xf32>
    tpu.vector_store %arg11[%c0_40, %c1_41, %c1_42, %c0_43], %16 {strides = array<i32>} : memref<1x10x10x8xf32, #tpu.memory_space<vmem>>, vector<1x8x8x4xf32>,
    %c0_44 = arith.constant 0 : index
    %c0_45 = arith.constant 0 : index
    %c0_46 = arith.constant 0 : index
    %c0_47 = arith.constant 0 : index
    %18 = vector.load %arg2[%c0_44, %c0_45, %c0_46, %c0_47] : memref<1x8x8x4xf32, #tpu.memory_space<vmem>>, vector<1x8x8x4xf32>
    %c0_48 = arith.constant 0 : index
    %c1_49 = arith.constant 1 : index
    %c1_50 = arith.constant 1 : index
    %c4 = arith.constant 4 : index
    %19 = vector.load %arg11[%c0_48, %c1_49, %c1_50, %c4] : memref<1x10x10x8xf32, #tpu.memory_space<vmem>>, vector<1x8x8x4xf32>
    tpu.vector_store %arg11[%c0_48, %c1_49, %c1_50, %c4], %18 {strides = array<i32>} : memref<1x10x10x8xf32, #tpu.memory_space<vmem>>, vector<1x8x8x4xf32>,
    %c0_51 = arith.constant 0 : index
    %c0_52 = arith.constant 0 : index
    %c0_53 = arith.constant 0 : index
    %c0_54 = arith.constant 0 : index
    %20 = vector.load %arg11[%c0_51, %c0_52, %c0_53, %c0_54] : memref<1x10x10x8xf32, #tpu.memory_space<vmem>>, vector<1x10x10x8xf32>
    %21 = vector.extract_strided_slice %20 {offsets = [0, 0, 0, 0], sizes = [1, 8, 8, 8], strides = [1, 1, 1, 1]} : vector<1x10x10x8xf32> to vector<1x8x8x8xf32>
    %22 = vector.shape_cast %21 : vector<1x8x8x8xf32> to vector<64x8xf32>
    %23 = arith.truncf %22 : vector<64x8xf32> to vector<64x8xbf16>
    %c0_55 = arith.constant 0 : index
    %c0_56 = arith.constant 0 : index
    %c0_57 = arith.constant 0 : index
    %24 = vector.load %arg3[%c0_55, %c0_56, %c0_57] : memref<9x8x16xbf16, #tpu.memory_space<vmem>>, vector<1x8x16xbf16>
    %25 = vector.shape_cast %24 : vector<1x8x16xbf16> to vector<8x16xbf16>
    %cst_58 = arith.constant dense<0.000000e+00> : vector<64x16xf32>
    %26 = tpu.matmul %23, %25, %cst_58 {dimension_numbers = #tpu.dot_dimension_numbers<[1], [0], [0], [1], [0, 0, 1, 1], [], []>} : vector<64x8xbf16>, vector<8x16xbf16>, vector<64x16xf32> -> vector<64x16xf32>
    %27 = vector.extract_strided_slice %20 {offsets = [0, 0, 1, 0], sizes = [1, 8, 8, 8], strides = [1, 1, 1, 1]} : vector<1x10x10x8xf32> to vector<1x8x8x8xf32>
    %28 = vector.shape_cast %27 : vector<1x8x8x8xf32> to vector<64x8xf32>
    %29 = arith.truncf %28 : vector<64x8xf32> to vector<64x8xbf16>
    %c1_59 = arith.constant 1 : index
    %c0_60 = arith.constant 0 : index
    %c0_61 = arith.constant 0 : index
    %30 = vector.load %arg3[%c1_59, %c0_60, %c0_61] : memref<9x8x16xbf16, #tpu.memory_space<vmem>>, vector<1x8x16xbf16>
    %31 = vector.shape_cast %30 : vector<1x8x16xbf16> to vector<8x16xbf16>
    %cst_62 = arith.constant dense<0.000000e+00> : vector<64x16xf32>
    %32 = tpu.matmul %29, %31, %cst_62 {dimension_numbers = #tpu.dot_dimension_numbers<[1], [0], [0], [1], [0, 0, 1, 1], [], []>} : vector<64x8xbf16>, vector<8x16xbf16>, vector<64x16xf32> -> vector<64x16xf32>
    %33 = arith.addf %26, %32 : vector<64x16xf32>
    %34 = vector.extract_strided_slice %20 {offsets = [0, 0, 2, 0], sizes = [1, 8, 8, 8], strides = [1, 1, 1, 1]} : vector<1x10x10x8xf32> to vector<1x8x8x8xf32>
    %35 = vector.shape_cast %34 : vector<1x8x8x8xf32> to vector<64x8xf32>
    %36 = arith.truncf %35 : vector<64x8xf32> to vector<64x8xbf16>
    %c2 = arith.constant 2 : index
    %c0_63 = arith.constant 0 : index
    %c0_64 = arith.constant 0 : index
    %37 = vector.load %arg3[%c2, %c0_63, %c0_64] : memref<9x8x16xbf16, #tpu.memory_space<vmem>>, vector<1x8x16xbf16>
    %38 = vector.shape_cast %37 : vector<1x8x16xbf16> to vector<8x16xbf16>
    %cst_65 = arith.constant dense<0.000000e+00> : vector<64x16xf32>
    %39 = tpu.matmul %36, %38, %cst_65 {dimension_numbers = #tpu.dot_dimension_numbers<[1], [0], [0], [1], [0, 0, 1, 1], [], []>} : vector<64x8xbf16>, vector<8x16xbf16>, vector<64x16xf32> -> vector<64x16xf32>
    %40 = arith.addf %33, %39 : vector<64x16xf32>
    %41 = vector.extract_strided_slice %20 {offsets = [0, 1, 0, 0], sizes = [1, 8, 8, 8], strides = [1, 1, 1, 1]} : vector<1x10x10x8xf32> to vector<1x8x8x8xf32>
    %42 = vector.shape_cast %41 : vector<1x8x8x8xf32> to vector<64x8xf32>
    %43 = arith.truncf %42 : vector<64x8xf32> to vector<64x8xbf16>
    %c3 = arith.constant 3 : index
    %c0_66 = arith.constant 0 : index
    %c0_67 = arith.constant 0 : index
    %44 = vector.load %arg3[%c3, %c0_66, %c0_67] : memref<9x8x16xbf16, #tpu.memory_space<vmem>>, vector<1x8x16xbf16>
    %45 = vector.shape_cast %44 : vector<1x8x16xbf16> to vector<8x16xbf16>
    %cst_68 = arith.constant dense<0.000000e+00> : vector<64x16xf32>
    %46 = tpu.matmul %43, %45, %cst_68 {dimension_numbers = #tpu.dot_dimension_numbers<[1], [0], [0], [1], [0, 0, 1, 1], [], []>} : vector<64x8xbf16>, vector<8x16xbf16>, vector<64x16xf32> -> vector<64x16xf32>
    %47 = arith.addf %40, %46 : vector<64x16xf32>
    %48 = vector.extract_strided_slice %20 {offsets = [0, 1, 1, 0], sizes = [1, 8, 8, 8], strides = [1, 1, 1, 1]} : vector<1x10x10x8xf32> to vector<1x8x8x8xf32>
    %49 = vector.shape_cast %48 : vector<1x8x8x8xf32> to vector<64x8xf32>
    %50 = arith.truncf %49 : vector<64x8xf32> to vector<64x8xbf16>
    %c4_69 = arith.constant 4 : index
    %c0_70 = arith.constant 0 : index
    %c0_71 = arith.constant 0 : index
    %51 = vector.load %arg3[%c4_69, %c0_70, %c0_71] : memref<9x8x16xbf16, #tpu.memory_space<vmem>>, vector<1x8x16xbf16>
    %52 = vector.shape_cast %51 : vector<1x8x16xbf16> to vector<8x16xbf16>
    %cst_72 = arith.constant dense<0.000000e+00> : vector<64x16xf32>
    %53 = tpu.matmul %50, %52, %cst_72 {dimension_numbers = #tpu.dot_dimension_numbers<[1], [0], [0], [1], [0, 0, 1, 1], [], []>} : vector<64x8xbf16>, vector<8x16xbf16>, vector<64x16xf32> -> vector<64x16xf32>
    %54 = arith.addf %47, %53 : vector<64x16xf32>
    %55 = vector.extract_strided_slice %20 {offsets = [0, 1, 2, 0], sizes = [1, 8, 8, 8], strides = [1, 1, 1, 1]} : vector<1x10x10x8xf32> to vector<1x8x8x8xf32>
    %56 = vector.shape_cast %55 : vector<1x8x8x8xf32> to vector<64x8xf32>
    %57 = arith.truncf %56 : vector<64x8xf32> to vector<64x8xbf16>
    %c5 = arith.constant 5 : index
    %c0_73 = arith.constant 0 : index
    %c0_74 = arith.constant 0 : index
    %58 = vector.load %arg3[%c5, %c0_73, %c0_74] : memref<9x8x16xbf16, #tpu.memory_space<vmem>>, vector<1x8x16xbf16>
    %59 = vector.shape_cast %58 : vector<1x8x16xbf16> to vector<8x16xbf16>
    %cst_75 = arith.constant dense<0.000000e+00> : vector<64x16xf32>
    %60 = tpu.matmul %57, %59, %cst_75 {dimension_numbers = #tpu.dot_dimension_numbers<[1], [0], [0], [1], [0, 0, 1, 1], [], []>} : vector<64x8xbf16>, vector<8x16xbf16>, vector<64x16xf32> -> vector<64x16xf32>
    %61 = arith.addf %54, %60 : vector<64x16xf32>
    %62 = vector.extract_strided_slice %20 {offsets = [0, 2, 0, 0], sizes = [1, 8, 8, 8], strides = [1, 1, 1, 1]} : vector<1x10x10x8xf32> to vector<1x8x8x8xf32>
    %63 = vector.shape_cast %62 : vector<1x8x8x8xf32> to vector<64x8xf32>
    %64 = arith.truncf %63 : vector<64x8xf32> to vector<64x8xbf16>
    %c6 = arith.constant 6 : index
    %c0_76 = arith.constant 0 : index
    %c0_77 = arith.constant 0 : index
    %65 = vector.load %arg3[%c6, %c0_76, %c0_77] : memref<9x8x16xbf16, #tpu.memory_space<vmem>>, vector<1x8x16xbf16>
    %66 = vector.shape_cast %65 : vector<1x8x16xbf16> to vector<8x16xbf16>
    %cst_78 = arith.constant dense<0.000000e+00> : vector<64x16xf32>
    %67 = tpu.matmul %64, %66, %cst_78 {dimension_numbers = #tpu.dot_dimension_numbers<[1], [0], [0], [1], [0, 0, 1, 1], [], []>} : vector<64x8xbf16>, vector<8x16xbf16>, vector<64x16xf32> -> vector<64x16xf32>
    %68 = arith.addf %61, %67 : vector<64x16xf32>
    %69 = vector.extract_strided_slice %20 {offsets = [0, 2, 1, 0], sizes = [1, 8, 8, 8], strides = [1, 1, 1, 1]} : vector<1x10x10x8xf32> to vector<1x8x8x8xf32>
    %70 = vector.shape_cast %69 : vector<1x8x8x8xf32> to vector<64x8xf32>
    %71 = arith.truncf %70 : vector<64x8xf32> to vector<64x8xbf16>
    %c7 = arith.constant 7 : index
    %c0_79 = arith.constant 0 : index
    %c0_80 = arith.constant 0 : index
    %72 = vector.load %arg3[%c7, %c0_79, %c0_80] : memref<9x8x16xbf16, #tpu.memory_space<vmem>>, vector<1x8x16xbf16>
    %73 = vector.shape_cast %72 : vector<1x8x16xbf16> to vector<8x16xbf16>
    %cst_81 = arith.constant dense<0.000000e+00> : vector<64x16xf32>
    %74 = tpu.matmul %71, %73, %cst_81 {dimension_numbers = #tpu.dot_dimension_numbers<[1], [0], [0], [1], [0, 0, 1, 1], [], []>} : vector<64x8xbf16>, vector<8x16xbf16>, vector<64x16xf32> -> vector<64x16xf32>
    %75 = arith.addf %68, %74 : vector<64x16xf32>
    %76 = vector.extract_strided_slice %20 {offsets = [0, 2, 2, 0], sizes = [1, 8, 8, 8], strides = [1, 1, 1, 1]} : vector<1x10x10x8xf32> to vector<1x8x8x8xf32>
    %77 = vector.shape_cast %76 : vector<1x8x8x8xf32> to vector<64x8xf32>
    %78 = arith.truncf %77 : vector<64x8xf32> to vector<64x8xbf16>
    %c8 = arith.constant 8 : index
    %c0_82 = arith.constant 0 : index
    %c0_83 = arith.constant 0 : index
    %79 = vector.load %arg3[%c8, %c0_82, %c0_83] : memref<9x8x16xbf16, #tpu.memory_space<vmem>>, vector<1x8x16xbf16>
    %80 = vector.shape_cast %79 : vector<1x8x16xbf16> to vector<8x16xbf16>
    %cst_84 = arith.constant dense<0.000000e+00> : vector<64x16xf32>
    %81 = tpu.matmul %78, %80, %cst_84 {dimension_numbers = #tpu.dot_dimension_numbers<[1], [0], [0], [1], [0, 0, 1, 1], [], []>} : vector<64x8xbf16>, vector<8x16xbf16>, vector<64x16xf32> -> vector<64x16xf32>
    %82 = arith.addf %75, %81 : vector<64x16xf32>
    %c0_85 = arith.constant 0 : index
    %c0_86 = arith.constant 0 : index
    %83 = vector.load %arg4[%c0_85, %c0_86] : memref<1x16xf32, #tpu.memory_space<vmem>>, vector<1x16xf32>
    %84 = vector.broadcast %83 : vector<1x16xf32> to vector<64x16xf32>
    %85 = arith.addf %82, %84 : vector<64x16xf32>
    %86 = vector.shape_cast %85 : vector<64x16xf32> to vector<1x8x8x16xf32>
    %c0_87 = arith.constant 0 : index
    %c1_88 = arith.constant 1 : index
    %c1_89 = arith.constant 1 : index
    %c0_90 = arith.constant 0 : index
    %87 = vector.load %arg12[%c0_87, %c1_88, %c1_89, %c0_90] : memref<1x10x10x16xf32, #tpu.memory_space<vmem>>, vector<1x8x8x16xf32>
    tpu.vector_store %arg12[%c0_87, %c1_88, %c1_89, %c0_90], %86 {strides = array<i32>} : memref<1x10x10x16xf32, #tpu.memory_space<vmem>>, vector<1x8x8x16xf32>,
    %c0_91 = arith.constant 0 : index
    %c0_92 = arith.constant 0 : index
    %c0_93 = arith.constant 0 : index
    %c0_94 = arith.constant 0 : index
    %88 = vector.load %arg12[%c0_91, %c0_92, %c0_93, %c0_94] : memref<1x10x10x16xf32, #tpu.memory_space<vmem>>, vector<1x10x10x16xf32>
    %89 = vector.extract_strided_slice %88 {offsets = [0, 0, 0, 0], sizes = [1, 8, 8, 16], strides = [1, 1, 1, 1]} : vector<1x10x10x16xf32> to vector<1x8x8x16xf32>
    %90 = vector.shape_cast %89 : vector<1x8x8x16xf32> to vector<64x16xf32>
    %91 = arith.truncf %90 : vector<64x16xf32> to vector<64x16xbf16>
    %c0_95 = arith.constant 0 : index
    %c0_96 = arith.constant 0 : index
    %c0_97 = arith.constant 0 : index
    %92 = vector.load %arg5[%c0_95, %c0_96, %c0_97] : memref<9x16x16xbf16, #tpu.memory_space<vmem>>, vector<1x16x16xbf16>
    %93 = vector.shape_cast %92 : vector<1x16x16xbf16> to vector<16x16xbf16>
    %cst_98 = arith.constant dense<0.000000e+00> : vector<64x16xf32>
    %94 = tpu.matmul %91, %93, %cst_98 {dimension_numbers = #tpu.dot_dimension_numbers<[1], [0], [0], [1], [0, 0, 1, 1], [], []>} : vector<64x16xbf16>, vector<16x16xbf16>, vector<64x16xf32> -> vector<64x16xf32>
    %95 = vector.extract_strided_slice %88 {offsets = [0, 0, 1, 0], sizes = [1, 8, 8, 16], strides = [1, 1, 1, 1]} : vector<1x10x10x16xf32> to vector<1x8x8x16xf32>
    %96 = vector.shape_cast %95 : vector<1x8x8x16xf32> to vector<64x16xf32>
    %97 = arith.truncf %96 : vector<64x16xf32> to vector<64x16xbf16>
    %c1_99 = arith.constant 1 : index
    %c0_100 = arith.constant 0 : index
    %c0_101 = arith.constant 0 : index
    %98 = vector.load %arg5[%c1_99, %c0_100, %c0_101] : memref<9x16x16xbf16, #tpu.memory_space<vmem>>, vector<1x16x16xbf16>
    %99 = vector.shape_cast %98 : vector<1x16x16xbf16> to vector<16x16xbf16>
    %cst_102 = arith.constant dense<0.000000e+00> : vector<64x16xf32>
    %100 = tpu.matmul %97, %99, %cst_102 {dimension_numbers = #tpu.dot_dimension_numbers<[1], [0], [0], [1], [0, 0, 1, 1], [], []>} : vector<64x16xbf16>, vector<16x16xbf16>, vector<64x16xf32> -> vector<64x16xf32>
    %101 = arith.addf %94, %100 : vector<64x16xf32>
    %102 = vector.extract_strided_slice %88 {offsets = [0, 0, 2, 0], sizes = [1, 8, 8, 16], strides = [1, 1, 1, 1]} : vector<1x10x10x16xf32> to vector<1x8x8x16xf32>
    %103 = vector.shape_cast %102 : vector<1x8x8x16xf32> to vector<64x16xf32>
    %104 = arith.truncf %103 : vector<64x16xf32> to vector<64x16xbf16>
    %c2_103 = arith.constant 2 : index
    %c0_104 = arith.constant 0 : index
    %c0_105 = arith.constant 0 : index
    %105 = vector.load %arg5[%c2_103, %c0_104, %c0_105] : memref<9x16x16xbf16, #tpu.memory_space<vmem>>, vector<1x16x16xbf16>
    %106 = vector.shape_cast %105 : vector<1x16x16xbf16> to vector<16x16xbf16>
    %cst_106 = arith.constant dense<0.000000e+00> : vector<64x16xf32>
    %107 = tpu.matmul %104, %106, %cst_106 {dimension_numbers = #tpu.dot_dimension_numbers<[1], [0], [0], [1], [0, 0, 1, 1], [], []>} : vector<64x16xbf16>, vector<16x16xbf16>, vector<64x16xf32> -> vector<64x16xf32>
    %108 = arith.addf %101, %107 : vector<64x16xf32>
    %109 = vector.extract_strided_slice %88 {offsets = [0, 1, 0, 0], sizes = [1, 8, 8, 16], strides = [1, 1, 1, 1]} : vector<1x10x10x16xf32> to vector<1x8x8x16xf32>
    %110 = vector.shape_cast %109 : vector<1x8x8x16xf32> to vector<64x16xf32>
    %111 = arith.truncf %110 : vector<64x16xf32> to vector<64x16xbf16>
    %c3_107 = arith.constant 3 : index
    %c0_108 = arith.constant 0 : index
    %c0_109 = arith.constant 0 : index
    %112 = vector.load %arg5[%c3_107, %c0_108, %c0_109] : memref<9x16x16xbf16, #tpu.memory_space<vmem>>, vector<1x16x16xbf16>
    %113 = vector.shape_cast %112 : vector<1x16x16xbf16> to vector<16x16xbf16>
    %cst_110 = arith.constant dense<0.000000e+00> : vector<64x16xf32>
    %114 = tpu.matmul %111, %113, %cst_110 {dimension_numbers = #tpu.dot_dimension_numbers<[1], [0], [0], [1], [0, 0, 1, 1], [], []>} : vector<64x16xbf16>, vector<16x16xbf16>, vector<64x16xf32> -> vector<64x16xf32>
    %115 = arith.addf %108, %114 : vector<64x16xf32>
    %116 = vector.extract_strided_slice %88 {offsets = [0, 1, 1, 0], sizes = [1, 8, 8, 16], strides = [1, 1, 1, 1]} : vector<1x10x10x16xf32> to vector<1x8x8x16xf32>
    %117 = vector.shape_cast %116 : vector<1x8x8x16xf32> to vector<64x16xf32>
    %118 = arith.truncf %117 : vector<64x16xf32> to vector<64x16xbf16>
    %c4_111 = arith.constant 4 : index
    %c0_112 = arith.constant 0 : index
    %c0_113 = arith.constant 0 : index
    %119 = vector.load %arg5[%c4_111, %c0_112, %c0_113] : memref<9x16x16xbf16, #tpu.memory_space<vmem>>, vector<1x16x16xbf16>
    %120 = vector.shape_cast %119 : vector<1x16x16xbf16> to vector<16x16xbf16>
    %cst_114 = arith.constant dense<0.000000e+00> : vector<64x16xf32>
    %121 = tpu.matmul %118, %120, %cst_114 {dimension_numbers = #tpu.dot_dimension_numbers<[1], [0], [0], [1], [0, 0, 1, 1], [], []>} : vector<64x16xbf16>, vector<16x16xbf16>, vector<64x16xf32> -> vector<64x16xf32>
    %122 = arith.addf %115, %121 : vector<64x16xf32>
    %123 = vector.extract_strided_slice %88 {offsets = [0, 1, 2, 0], sizes = [1, 8, 8, 16], strides = [1, 1, 1, 1]} : vector<1x10x10x16xf32> to vector<1x8x8x16xf32>
    %124 = vector.shape_cast %123 : vector<1x8x8x16xf32> to vector<64x16xf32>
    %125 = arith.truncf %124 : vector<64x16xf32> to vector<64x16xbf16>
    %c5_115 = arith.constant 5 : index
    %c0_116 = arith.constant 0 : index
    %c0_117 = arith.constant 0 : index
    %126 = vector.load %arg5[%c5_115, %c0_116, %c0_117] : memref<9x16x16xbf16, #tpu.memory_space<vmem>>, vector<1x16x16xbf16>
    %127 = vector.shape_cast %126 : vector<1x16x16xbf16> to vector<16x16xbf16>
    %cst_118 = arith.constant dense<0.000000e+00> : vector<64x16xf32>
    %128 = tpu.matmul %125, %127, %cst_118 {dimension_numbers = #tpu.dot_dimension_numbers<[1], [0], [0], [1], [0, 0, 1, 1], [], []>} : vector<64x16xbf16>, vector<16x16xbf16>, vector<64x16xf32> -> vector<64x16xf32>
    %129 = arith.addf %122, %128 : vector<64x16xf32>
    %130 = vector.extract_strided_slice %88 {offsets = [0, 2, 0, 0], sizes = [1, 8, 8, 16], strides = [1, 1, 1, 1]} : vector<1x10x10x16xf32> to vector<1x8x8x16xf32>
    %131 = vector.shape_cast %130 : vector<1x8x8x16xf32> to vector<64x16xf32>
    %132 = arith.truncf %131 : vector<64x16xf32> to vector<64x16xbf16>
    %c6_119 = arith.constant 6 : index
    %c0_120 = arith.constant 0 : index
    %c0_121 = arith.constant 0 : index
    %133 = vector.load %arg5[%c6_119, %c0_120, %c0_121] : memref<9x16x16xbf16, #tpu.memory_space<vmem>>, vector<1x16x16xbf16>
    %134 = vector.shape_cast %133 : vector<1x16x16xbf16> to vector<16x16xbf16>
    %cst_122 = arith.constant dense<0.000000e+00> : vector<64x16xf32>
    %135 = tpu.matmul %132, %134, %cst_122 {dimension_numbers = #tpu.dot_dimension_numbers<[1], [0], [0], [1], [0, 0, 1, 1], [], []>} : vector<64x16xbf16>, vector<16x16xbf16>, vector<64x16xf32> -> vector<64x16xf32>
    %136 = arith.addf %129, %135 : vector<64x16xf32>
    %137 = vector.extract_strided_slice %88 {offsets = [0, 2, 1, 0], sizes = [1, 8, 8, 16], strides = [1, 1, 1, 1]} : vector<1x10x10x16xf32> to vector<1x8x8x16xf32>
    %138 = vector.shape_cast %137 : vector<1x8x8x16xf32> to vector<64x16xf32>
    %139 = arith.truncf %138 : vector<64x16xf32> to vector<64x16xbf16>
    %c7_123 = arith.constant 7 : index
    %c0_124 = arith.constant 0 : index
    %c0_125 = arith.constant 0 : index
    %140 = vector.load %arg5[%c7_123, %c0_124, %c0_125] : memref<9x16x16xbf16, #tpu.memory_space<vmem>>, vector<1x16x16xbf16>
    %141 = vector.shape_cast %140 : vector<1x16x16xbf16> to vector<16x16xbf16>
    %cst_126 = arith.constant dense<0.000000e+00> : vector<64x16xf32>
    %142 = tpu.matmul %139, %141, %cst_126 {dimension_numbers = #tpu.dot_dimension_numbers<[1], [0], [0], [1], [0, 0, 1, 1], [], []>} : vector<64x16xbf16>, vector<16x16xbf16>, vector<64x16xf32> -> vector<64x16xf32>
    %143 = arith.addf %136, %142 : vector<64x16xf32>
    %144 = vector.extract_strided_slice %88 {offsets = [0, 2, 2, 0], sizes = [1, 8, 8, 16], strides = [1, 1, 1, 1]} : vector<1x10x10x16xf32> to vector<1x8x8x16xf32>
    %145 = vector.shape_cast %144 : vector<1x8x8x16xf32> to vector<64x16xf32>
    %146 = arith.truncf %145 : vector<64x16xf32> to vector<64x16xbf16>
    %c8_127 = arith.constant 8 : index
    %c0_128 = arith.constant 0 : index
    %c0_129 = arith.constant 0 : index
    %147 = vector.load %arg5[%c8_127, %c0_128, %c0_129] : memref<9x16x16xbf16, #tpu.memory_space<vmem>>, vector<1x16x16xbf16>
    %148 = vector.shape_cast %147 : vector<1x16x16xbf16> to vector<16x16xbf16>
    %cst_130 = arith.constant dense<0.000000e+00> : vector<64x16xf32>
    %149 = tpu.matmul %146, %148, %cst_130 {dimension_numbers = #tpu.dot_dimension_numbers<[1], [0], [0], [1], [0, 0, 1, 1], [], []>} : vector<64x16xbf16>, vector<16x16xbf16>, vector<64x16xf32> -> vector<64x16xf32>
    %150 = arith.addf %143, %149 : vector<64x16xf32>
    %c0_131 = arith.constant 0 : index
    %c0_132 = arith.constant 0 : index
    %151 = vector.load %arg6[%c0_131, %c0_132] : memref<1x16xf32, #tpu.memory_space<vmem>>, vector<1x16xf32>
    %152 = vector.broadcast %151 : vector<1x16xf32> to vector<64x16xf32>
    %153 = arith.addf %150, %152 : vector<64x16xf32>
    %cst_133 = arith.constant 0.000000e+00 : f32
    %154 = vector.broadcast %cst_133 : f32 to vector<64x16xf32>
    %155 = arith.maximumf %153, %154 : vector<64x16xf32>
    %156 = vector.shape_cast %155 : vector<64x16xf32> to vector<1x8x8x16xf32>
    %c0_134 = arith.constant 0 : index
    %c1_135 = arith.constant 1 : index
    %c1_136 = arith.constant 1 : index
    %c0_137 = arith.constant 0 : index
    %157 = vector.load %arg12[%c0_134, %c1_135, %c1_136, %c0_137] : memref<1x10x10x16xf32, #tpu.memory_space<vmem>>, vector<1x8x8x16xf32>
    tpu.vector_store %arg12[%c0_134, %c1_135, %c1_136, %c0_137], %156 {strides = array<i32>} : memref<1x10x10x16xf32, #tpu.memory_space<vmem>>, vector<1x8x8x16xf32>,
    %c0_138 = arith.constant 0 : index
    %c0_139 = arith.constant 0 : index
    %c0_140 = arith.constant 0 : index
    %c0_141 = arith.constant 0 : index
    %158 = vector.load %arg12[%c0_138, %c0_139, %c0_140, %c0_141] : memref<1x10x10x16xf32, #tpu.memory_space<vmem>>, vector<1x10x10x16xf32>
    %159 = vector.extract_strided_slice %158 {offsets = [0, 0, 0, 0], sizes = [1, 8, 8, 16], strides = [1, 1, 1, 1]} : vector<1x10x10x16xf32> to vector<1x8x8x16xf32>
    %160 = vector.shape_cast %159 : vector<1x8x8x16xf32> to vector<64x16xf32>
    %161 = arith.truncf %160 : vector<64x16xf32> to vector<64x16xbf16>
    %c0_142 = arith.constant 0 : index
    %c0_143 = arith.constant 0 : index
    %c0_144 = arith.constant 0 : index
    %162 = vector.load %arg7[%c0_142, %c0_143, %c0_144] : memref<9x16x16xbf16, #tpu.memory_space<vmem>>, vector<1x16x16xbf16>
    %163 = vector.shape_cast %162 : vector<1x16x16xbf16> to vector<16x16xbf16>
    %cst_145 = arith.constant dense<0.000000e+00> : vector<64x16xf32>
    %164 = tpu.matmul %161, %163, %cst_145 {dimension_numbers = #tpu.dot_dimension_numbers<[1], [0], [0], [1], [0, 0, 1, 1], [], []>} : vector<64x16xbf16>, vector<16x16xbf16>, vector<64x16xf32> -> vector<64x16xf32>
    %165 = vector.extract_strided_slice %158 {offsets = [0, 0, 1, 0], sizes = [1, 8, 8, 16], strides = [1, 1, 1, 1]} : vector<1x10x10x16xf32> to vector<1x8x8x16xf32>
    %166 = vector.shape_cast %165 : vector<1x8x8x16xf32> to vector<64x16xf32>
    %167 = arith.truncf %166 : vector<64x16xf32> to vector<64x16xbf16>
    %c1_146 = arith.constant 1 : index
    %c0_147 = arith.constant 0 : index
    %c0_148 = arith.constant 0 : index
    %168 = vector.load %arg7[%c1_146, %c0_147, %c0_148] : memref<9x16x16xbf16, #tpu.memory_space<vmem>>, vector<1x16x16xbf16>
    %169 = vector.shape_cast %168 : vector<1x16x16xbf16> to vector<16x16xbf16>
    %cst_149 = arith.constant dense<0.000000e+00> : vector<64x16xf32>
    %170 = tpu.matmul %167, %169, %cst_149 {dimension_numbers = #tpu.dot_dimension_numbers<[1], [0], [0], [1], [0, 0, 1, 1], [], []>} : vector<64x16xbf16>, vector<16x16xbf16>, vector<64x16xf32> -> vector<64x16xf32>
    %171 = arith.addf %164, %170 : vector<64x16xf32>
    %172 = vector.extract_strided_slice %158 {offsets = [0, 0, 2, 0], sizes = [1, 8, 8, 16], strides = [1, 1, 1, 1]} : vector<1x10x10x16xf32> to vector<1x8x8x16xf32>
    %173 = vector.shape_cast %172 : vector<1x8x8x16xf32> to vector<64x16xf32>
    %174 = arith.truncf %173 : vector<64x16xf32> to vector<64x16xbf16>
    %c2_150 = arith.constant 2 : index
    %c0_151 = arith.constant 0 : index
    %c0_152 = arith.constant 0 : index
    %175 = vector.load %arg7[%c2_150, %c0_151, %c0_152] : memref<9x16x16xbf16, #tpu.memory_space<vmem>>, vector<1x16x16xbf16>
    %176 = vector.shape_cast %175 : vector<1x16x16xbf16> to vector<16x16xbf16>
    %cst_153 = arith.constant dense<0.000000e+00> : vector<64x16xf32>
    %177 = tpu.matmul %174, %176, %cst_153 {dimension_numbers = #tpu.dot_dimension_numbers<[1], [0], [0], [1], [0, 0, 1, 1], [], []>} : vector<64x16xbf16>, vector<16x16xbf16>, vector<64x16xf32> -> vector<64x16xf32>
    %178 = arith.addf %171, %177 : vector<64x16xf32>
    %179 = vector.extract_strided_slice %158 {offsets = [0, 1, 0, 0], sizes = [1, 8, 8, 16], strides = [1, 1, 1, 1]} : vector<1x10x10x16xf32> to vector<1x8x8x16xf32>
    %180 = vector.shape_cast %179 : vector<1x8x8x16xf32> to vector<64x16xf32>
    %181 = arith.truncf %180 : vector<64x16xf32> to vector<64x16xbf16>
    %c3_154 = arith.constant 3 : index
    %c0_155 = arith.constant 0 : index
    %c0_156 = arith.constant 0 : index
    %182 = vector.load %arg7[%c3_154, %c0_155, %c0_156] : memref<9x16x16xbf16, #tpu.memory_space<vmem>>, vector<1x16x16xbf16>
    %183 = vector.shape_cast %182 : vector<1x16x16xbf16> to vector<16x16xbf16>
    %cst_157 = arith.constant dense<0.000000e+00> : vector<64x16xf32>
    %184 = tpu.matmul %181, %183, %cst_157 {dimension_numbers = #tpu.dot_dimension_numbers<[1], [0], [0], [1], [0, 0, 1, 1], [], []>} : vector<64x16xbf16>, vector<16x16xbf16>, vector<64x16xf32> -> vector<64x16xf32>
    %185 = arith.addf %178, %184 : vector<64x16xf32>
    %186 = vector.extract_strided_slice %158 {offsets = [0, 1, 1, 0], sizes = [1, 8, 8, 16], strides = [1, 1, 1, 1]} : vector<1x10x10x16xf32> to vector<1x8x8x16xf32>
    %187 = vector.shape_cast %186 : vector<1x8x8x16xf32> to vector<64x16xf32>
    %188 = arith.truncf %187 : vector<64x16xf32> to vector<64x16xbf16>
    %c4_158 = arith.constant 4 : index
    %c0_159 = arith.constant 0 : index
    %c0_160 = arith.constant 0 : index
    %189 = vector.load %arg7[%c4_158, %c0_159, %c0_160] : memref<9x16x16xbf16, #tpu.memory_space<vmem>>, vector<1x16x16xbf16>
    %190 = vector.shape_cast %189 : vector<1x16x16xbf16> to vector<16x16xbf16>
    %cst_161 = arith.constant dense<0.000000e+00> : vector<64x16xf32>
    %191 = tpu.matmul %188, %190, %cst_161 {dimension_numbers = #tpu.dot_dimension_numbers<[1], [0], [0], [1], [0, 0, 1, 1], [], []>} : vector<64x16xbf16>, vector<16x16xbf16>, vector<64x16xf32> -> vector<64x16xf32>
    %192 = arith.addf %185, %191 : vector<64x16xf32>
    %193 = vector.extract_strided_slice %158 {offsets = [0, 1, 2, 0], sizes = [1, 8, 8, 16], strides = [1, 1, 1, 1]} : vector<1x10x10x16xf32> to vector<1x8x8x16xf32>
    %194 = vector.shape_cast %193 : vector<1x8x8x16xf32> to vector<64x16xf32>
    %195 = arith.truncf %194 : vector<64x16xf32> to vector<64x16xbf16>
    %c5_162 = arith.constant 5 : index
    %c0_163 = arith.constant 0 : index
    %c0_164 = arith.constant 0 : index
    %196 = vector.load %arg7[%c5_162, %c0_163, %c0_164] : memref<9x16x16xbf16, #tpu.memory_space<vmem>>, vector<1x16x16xbf16>
    %197 = vector.shape_cast %196 : vector<1x16x16xbf16> to vector<16x16xbf16>
    %cst_165 = arith.constant dense<0.000000e+00> : vector<64x16xf32>
    %198 = tpu.matmul %195, %197, %cst_165 {dimension_numbers = #tpu.dot_dimension_numbers<[1], [0], [0], [1], [0, 0, 1, 1], [], []>} : vector<64x16xbf16>, vector<16x16xbf16>, vector<64x16xf32> -> vector<64x16xf32>
    %199 = arith.addf %192, %198 : vector<64x16xf32>
    %200 = vector.extract_strided_slice %158 {offsets = [0, 2, 0, 0], sizes = [1, 8, 8, 16], strides = [1, 1, 1, 1]} : vector<1x10x10x16xf32> to vector<1x8x8x16xf32>
    %201 = vector.shape_cast %200 : vector<1x8x8x16xf32> to vector<64x16xf32>
    %202 = arith.truncf %201 : vector<64x16xf32> to vector<64x16xbf16>
    %c6_166 = arith.constant 6 : index
    %c0_167 = arith.constant 0 : index
    %c0_168 = arith.constant 0 : index
    %203 = vector.load %arg7[%c6_166, %c0_167, %c0_168] : memref<9x16x16xbf16, #tpu.memory_space<vmem>>, vector<1x16x16xbf16>
    %204 = vector.shape_cast %203 : vector<1x16x16xbf16> to vector<16x16xbf16>
    %cst_169 = arith.constant dense<0.000000e+00> : vector<64x16xf32>
    %205 = tpu.matmul %202, %204, %cst_169 {dimension_numbers = #tpu.dot_dimension_numbers<[1], [0], [0], [1], [0, 0, 1, 1], [], []>} : vector<64x16xbf16>, vector<16x16xbf16>, vector<64x16xf32> -> vector<64x16xf32>
    %206 = arith.addf %199, %205 : vector<64x16xf32>
    %207 = vector.extract_strided_slice %158 {offsets = [0, 2, 1, 0], sizes = [1, 8, 8, 16], strides = [1, 1, 1, 1]} : vector<1x10x10x16xf32> to vector<1x8x8x16xf32>
    %208 = vector.shape_cast %207 : vector<1x8x8x16xf32> to vector<64x16xf32>
    %209 = arith.truncf %208 : vector<64x16xf32> to vector<64x16xbf16>
    %c7_170 = arith.constant 7 : index
    %c0_171 = arith.constant 0 : index
    %c0_172 = arith.constant 0 : index
    %210 = vector.load %arg7[%c7_170, %c0_171, %c0_172] : memref<9x16x16xbf16, #tpu.memory_space<vmem>>, vector<1x16x16xbf16>
    %211 = vector.shape_cast %210 : vector<1x16x16xbf16> to vector<16x16xbf16>
    %cst_173 = arith.constant dense<0.000000e+00> : vector<64x16xf32>
    %212 = tpu.matmul %209, %211, %cst_173 {dimension_numbers = #tpu.dot_dimension_numbers<[1], [0], [0], [1], [0, 0, 1, 1], [], []>} : vector<64x16xbf16>, vector<16x16xbf16>, vector<64x16xf32> -> vector<64x16xf32>
    %213 = arith.addf %206, %212 : vector<64x16xf32>
    %214 = vector.extract_strided_slice %158 {offsets = [0, 2, 2, 0], sizes = [1, 8, 8, 16], strides = [1, 1, 1, 1]} : vector<1x10x10x16xf32> to vector<1x8x8x16xf32>
    %215 = vector.shape_cast %214 : vector<1x8x8x16xf32> to vector<64x16xf32>
    %216 = arith.truncf %215 : vector<64x16xf32> to vector<64x16xbf16>
    %c8_174 = arith.constant 8 : index
    %c0_175 = arith.constant 0 : index
    %c0_176 = arith.constant 0 : index
    %217 = vector.load %arg7[%c8_174, %c0_175, %c0_176] : memref<9x16x16xbf16, #tpu.memory_space<vmem>>, vector<1x16x16xbf16>
    %218 = vector.shape_cast %217 : vector<1x16x16xbf16> to vector<16x16xbf16>
    %cst_177 = arith.constant dense<0.000000e+00> : vector<64x16xf32>
    %219 = tpu.matmul %216, %218, %cst_177 {dimension_numbers = #tpu.dot_dimension_numbers<[1], [0], [0], [1], [0, 0, 1, 1], [], []>} : vector<64x16xbf16>, vector<16x16xbf16>, vector<64x16xf32> -> vector<64x16xf32>
    %220 = arith.addf %213, %219 : vector<64x16xf32>
    %c0_178 = arith.constant 0 : index
    %c0_179 = arith.constant 0 : index
    %221 = vector.load %arg8[%c0_178, %c0_179] : memref<1x16xf32, #tpu.memory_space<vmem>>, vector<1x16xf32>
    %222 = vector.broadcast %221 : vector<1x16xf32> to vector<64x16xf32>
    %223 = arith.addf %220, %222 : vector<64x16xf32>
    %224 = arith.addf %223, %85 : vector<64x16xf32>
    %cst_180 = arith.constant 0.000000e+00 : f32
    %225 = vector.broadcast %cst_180 : f32 to vector<64x16xf32>
    %226 = arith.maximumf %224, %225 : vector<64x16xf32>
    %227 = tpu.transpose %226, [1, 0] : vector<64x16xf32> -> vector<16x64xf32>
    %228 = vector.extract_strided_slice %227 {offsets = [0, 0], sizes = [1, 64], strides = [1, 1]} : vector<16x64xf32> to vector<1x64xf32>
    %229 = vector.extract_strided_slice %227 {offsets = [1, 0], sizes = [1, 64], strides = [1, 1]} : vector<16x64xf32> to vector<1x64xf32>
    %230 = vector.extract_strided_slice %227 {offsets = [2, 0], sizes = [1, 64], strides = [1, 1]} : vector<16x64xf32> to vector<1x64xf32>
    %231 = vector.extract_strided_slice %227 {offsets = [3, 0], sizes = [1, 64], strides = [1, 1]} : vector<16x64xf32> to vector<1x64xf32>
    %232 = vector.extract_strided_slice %227 {offsets = [4, 0], sizes = [1, 64], strides = [1, 1]} : vector<16x64xf32> to vector<1x64xf32>
    %233 = vector.extract_strided_slice %227 {offsets = [5, 0], sizes = [1, 64], strides = [1, 1]} : vector<16x64xf32> to vector<1x64xf32>
    %234 = vector.extract_strided_slice %227 {offsets = [6, 0], sizes = [1, 64], strides = [1, 1]} : vector<16x64xf32> to vector<1x64xf32>
    %235 = vector.extract_strided_slice %227 {offsets = [7, 0], sizes = [1, 64], strides = [1, 1]} : vector<16x64xf32> to vector<1x64xf32>
    %236 = vector.extract_strided_slice %227 {offsets = [8, 0], sizes = [1, 64], strides = [1, 1]} : vector<16x64xf32> to vector<1x64xf32>
    %237 = vector.extract_strided_slice %227 {offsets = [9, 0], sizes = [1, 64], strides = [1, 1]} : vector<16x64xf32> to vector<1x64xf32>
    %238 = vector.extract_strided_slice %227 {offsets = [10, 0], sizes = [1, 64], strides = [1, 1]} : vector<16x64xf32> to vector<1x64xf32>
    %239 = vector.extract_strided_slice %227 {offsets = [11, 0], sizes = [1, 64], strides = [1, 1]} : vector<16x64xf32> to vector<1x64xf32>
    %240 = vector.extract_strided_slice %227 {offsets = [12, 0], sizes = [1, 64], strides = [1, 1]} : vector<16x64xf32> to vector<1x64xf32>
    %241 = vector.extract_strided_slice %227 {offsets = [13, 0], sizes = [1, 64], strides = [1, 1]} : vector<16x64xf32> to vector<1x64xf32>
    %242 = vector.extract_strided_slice %227 {offsets = [14, 0], sizes = [1, 64], strides = [1, 1]} : vector<16x64xf32> to vector<1x64xf32>
    %243 = vector.extract_strided_slice %227 {offsets = [15, 0], sizes = [1, 64], strides = [1, 1]} : vector<16x64xf32> to vector<1x64xf32>
    %c0_181 = arith.constant 0 : index
    %244 = memref.load %arg9[%c0_181] : memref<80xf32, #tpu.memory_space<smem>>
    %c1_182 = arith.constant 1 : index
    %245 = memref.load %arg9[%c1_182] : memref<80xf32, #tpu.memory_space<smem>>
    %c2_183 = arith.constant 2 : index
    %246 = memref.load %arg9[%c2_183] : memref<80xf32, #tpu.memory_space<smem>>
    %c3_184 = arith.constant 3 : index
    %247 = memref.load %arg9[%c3_184] : memref<80xf32, #tpu.memory_space<smem>>
    %c4_185 = arith.constant 4 : index
    %248 = memref.load %arg9[%c4_185] : memref<80xf32, #tpu.memory_space<smem>>
    %c5_186 = arith.constant 5 : index
    %249 = memref.load %arg9[%c5_186] : memref<80xf32, #tpu.memory_space<smem>>
    %c6_187 = arith.constant 6 : index
    %250 = memref.load %arg9[%c6_187] : memref<80xf32, #tpu.memory_space<smem>>
    %c7_188 = arith.constant 7 : index
    %251 = memref.load %arg9[%c7_188] : memref<80xf32, #tpu.memory_space<smem>>
    %c8_189 = arith.constant 8 : index
    %252 = memref.load %arg9[%c8_189] : memref<80xf32, #tpu.memory_space<smem>>
    %c9_190 = arith.constant 9 : index
    %253 = memref.load %arg9[%c9_190] : memref<80xf32, #tpu.memory_space<smem>>
    %c10 = arith.constant 10 : index
    %254 = memref.load %arg9[%c10] : memref<80xf32, #tpu.memory_space<smem>>
    %c11 = arith.constant 11 : index
    %255 = memref.load %arg9[%c11] : memref<80xf32, #tpu.memory_space<smem>>
    %c12 = arith.constant 12 : index
    %256 = memref.load %arg9[%c12] : memref<80xf32, #tpu.memory_space<smem>>
    %c13 = arith.constant 13 : index
    %257 = memref.load %arg9[%c13] : memref<80xf32, #tpu.memory_space<smem>>
    %c14 = arith.constant 14 : index
    %258 = memref.load %arg9[%c14] : memref<80xf32, #tpu.memory_space<smem>>
    %c15 = arith.constant 15 : index
    %259 = memref.load %arg9[%c15] : memref<80xf32, #tpu.memory_space<smem>>
    %c16 = arith.constant 16 : index
    %260 = memref.load %arg9[%c16] : memref<80xf32, #tpu.memory_space<smem>>
    %c17 = arith.constant 17 : index
    %261 = memref.load %arg9[%c17] : memref<80xf32, #tpu.memory_space<smem>>
    %c18 = arith.constant 18 : index
    %262 = memref.load %arg9[%c18] : memref<80xf32, #tpu.memory_space<smem>>
    %c19 = arith.constant 19 : index
    %263 = memref.load %arg9[%c19] : memref<80xf32, #tpu.memory_space<smem>>
    %c20 = arith.constant 20 : index
    %264 = memref.load %arg9[%c20] : memref<80xf32, #tpu.memory_space<smem>>
    %c21 = arith.constant 21 : index
    %265 = memref.load %arg9[%c21] : memref<80xf32, #tpu.memory_space<smem>>
    %c22 = arith.constant 22 : index
    %266 = memref.load %arg9[%c22] : memref<80xf32, #tpu.memory_space<smem>>
    %c23 = arith.constant 23 : index
    %267 = memref.load %arg9[%c23] : memref<80xf32, #tpu.memory_space<smem>>
    %c24 = arith.constant 24 : index
    %268 = memref.load %arg9[%c24] : memref<80xf32, #tpu.memory_space<smem>>
    %c25 = arith.constant 25 : index
    %269 = memref.load %arg9[%c25] : memref<80xf32, #tpu.memory_space<smem>>
    %c26 = arith.constant 26 : index
    %270 = memref.load %arg9[%c26] : memref<80xf32, #tpu.memory_space<smem>>
    %c27 = arith.constant 27 : index
    %271 = memref.load %arg9[%c27] : memref<80xf32, #tpu.memory_space<smem>>
    %c28 = arith.constant 28 : index
    %272 = memref.load %arg9[%c28] : memref<80xf32, #tpu.memory_space<smem>>
    %c29 = arith.constant 29 : index
    %273 = memref.load %arg9[%c29] : memref<80xf32, #tpu.memory_space<smem>>
    %c30 = arith.constant 30 : index
    %274 = memref.load %arg9[%c30] : memref<80xf32, #tpu.memory_space<smem>>
    %c31 = arith.constant 31 : index
    %275 = memref.load %arg9[%c31] : memref<80xf32, #tpu.memory_space<smem>>
    %c32 = arith.constant 32 : index
    %276 = memref.load %arg9[%c32] : memref<80xf32, #tpu.memory_space<smem>>
    %c33 = arith.constant 33 : index
    %277 = memref.load %arg9[%c33] : memref<80xf32, #tpu.memory_space<smem>>
    %c34 = arith.constant 34 : index
    %278 = memref.load %arg9[%c34] : memref<80xf32, #tpu.memory_space<smem>>
    %c35 = arith.constant 35 : index
    %279 = memref.load %arg9[%c35] : memref<80xf32, #tpu.memory_space<smem>>
    %c36 = arith.constant 36 : index
    %280 = memref.load %arg9[%c36] : memref<80xf32, #tpu.memory_space<smem>>
    %c37 = arith.constant 37 : index
    %281 = memref.load %arg9[%c37] : memref<80xf32, #tpu.memory_space<smem>>
    %c38 = arith.constant 38 : index
    %282 = memref.load %arg9[%c38] : memref<80xf32, #tpu.memory_space<smem>>
    %c39 = arith.constant 39 : index
    %283 = memref.load %arg9[%c39] : memref<80xf32, #tpu.memory_space<smem>>
    %c40 = arith.constant 40 : index
    %284 = memref.load %arg9[%c40] : memref<80xf32, #tpu.memory_space<smem>>
    %c41 = arith.constant 41 : index
    %285 = memref.load %arg9[%c41] : memref<80xf32, #tpu.memory_space<smem>>
    %c42 = arith.constant 42 : index
    %286 = memref.load %arg9[%c42] : memref<80xf32, #tpu.memory_space<smem>>
    %c43 = arith.constant 43 : index
    %287 = memref.load %arg9[%c43] : memref<80xf32, #tpu.memory_space<smem>>
    %c44 = arith.constant 44 : index
    %288 = memref.load %arg9[%c44] : memref<80xf32, #tpu.memory_space<smem>>
    %c45 = arith.constant 45 : index
    %289 = memref.load %arg9[%c45] : memref<80xf32, #tpu.memory_space<smem>>
    %c46 = arith.constant 46 : index
    %290 = memref.load %arg9[%c46] : memref<80xf32, #tpu.memory_space<smem>>
    %c47 = arith.constant 47 : index
    %291 = memref.load %arg9[%c47] : memref<80xf32, #tpu.memory_space<smem>>
    %c48 = arith.constant 48 : index
    %292 = memref.load %arg9[%c48] : memref<80xf32, #tpu.memory_space<smem>>
    %c49 = arith.constant 49 : index
    %293 = memref.load %arg9[%c49] : memref<80xf32, #tpu.memory_space<smem>>
    %c50 = arith.constant 50 : index
    %294 = memref.load %arg9[%c50] : memref<80xf32, #tpu.memory_space<smem>>
    %c51 = arith.constant 51 : index
    %295 = memref.load %arg9[%c51] : memref<80xf32, #tpu.memory_space<smem>>
    %c52 = arith.constant 52 : index
    %296 = memref.load %arg9[%c52] : memref<80xf32, #tpu.memory_space<smem>>
    %c53 = arith.constant 53 : index
    %297 = memref.load %arg9[%c53] : memref<80xf32, #tpu.memory_space<smem>>
    %c54 = arith.constant 54 : index
    %298 = memref.load %arg9[%c54] : memref<80xf32, #tpu.memory_space<smem>>
    %c55 = arith.constant 55 : index
    %299 = memref.load %arg9[%c55] : memref<80xf32, #tpu.memory_space<smem>>
    %c56 = arith.constant 56 : index
    %300 = memref.load %arg9[%c56] : memref<80xf32, #tpu.memory_space<smem>>
    %c57 = arith.constant 57 : index
    %301 = memref.load %arg9[%c57] : memref<80xf32, #tpu.memory_space<smem>>
    %c58 = arith.constant 58 : index
    %302 = memref.load %arg9[%c58] : memref<80xf32, #tpu.memory_space<smem>>
    %c59 = arith.constant 59 : index
    %303 = memref.load %arg9[%c59] : memref<80xf32, #tpu.memory_space<smem>>
    %c60 = arith.constant 60 : index
    %304 = memref.load %arg9[%c60] : memref<80xf32, #tpu.memory_space<smem>>
    %c61 = arith.constant 61 : index
    %305 = memref.load %arg9[%c61] : memref<80xf32, #tpu.memory_space<smem>>
    %c62 = arith.constant 62 : index
    %306 = memref.load %arg9[%c62] : memref<80xf32, #tpu.memory_space<smem>>
    %c63 = arith.constant 63 : index
    %307 = memref.load %arg9[%c63] : memref<80xf32, #tpu.memory_space<smem>>
    %c64 = arith.constant 64 : index
    %308 = memref.load %arg9[%c64] : memref<80xf32, #tpu.memory_space<smem>>
    %c65 = arith.constant 65 : index
    %309 = memref.load %arg9[%c65] : memref<80xf32, #tpu.memory_space<smem>>
    %c66 = arith.constant 66 : index
    %310 = memref.load %arg9[%c66] : memref<80xf32, #tpu.memory_space<smem>>
    %c67 = arith.constant 67 : index
    %311 = memref.load %arg9[%c67] : memref<80xf32, #tpu.memory_space<smem>>
    %c68 = arith.constant 68 : index
    %312 = memref.load %arg9[%c68] : memref<80xf32, #tpu.memory_space<smem>>
    %c69 = arith.constant 69 : index
    %313 = memref.load %arg9[%c69] : memref<80xf32, #tpu.memory_space<smem>>
    %c70 = arith.constant 70 : index
    %314 = memref.load %arg9[%c70] : memref<80xf32, #tpu.memory_space<smem>>
    %c71 = arith.constant 71 : index
    %315 = memref.load %arg9[%c71] : memref<80xf32, #tpu.memory_space<smem>>
    %c72 = arith.constant 72 : index
    %316 = memref.load %arg9[%c72] : memref<80xf32, #tpu.memory_space<smem>>
    %c73 = arith.constant 73 : index
    %317 = memref.load %arg9[%c73] : memref<80xf32, #tpu.memory_space<smem>>
    %c74 = arith.constant 74 : index
    %318 = memref.load %arg9[%c74] : memref<80xf32, #tpu.memory_space<smem>>
    %c75 = arith.constant 75 : index
    %319 = memref.load %arg9[%c75] : memref<80xf32, #tpu.memory_space<smem>>
    %c76 = arith.constant 76 : index
    %320 = memref.load %arg9[%c76] : memref<80xf32, #tpu.memory_space<smem>>
    %c77 = arith.constant 77 : index
    %321 = memref.load %arg9[%c77] : memref<80xf32, #tpu.memory_space<smem>>
    %c78 = arith.constant 78 : index
    %322 = memref.load %arg9[%c78] : memref<80xf32, #tpu.memory_space<smem>>
    %c79 = arith.constant 79 : index
    %323 = memref.load %arg9[%c79] : memref<80xf32, #tpu.memory_space<smem>>
    %324 = vector.broadcast %244 : f32 to vector<1x64xf32>
    %325 = arith.mulf %228, %324 : vector<1x64xf32>
    %326 = vector.broadcast %248 : f32 to vector<1x64xf32>
    %327 = arith.mulf %229, %326 : vector<1x64xf32>
    %328 = arith.addf %325, %327 : vector<1x64xf32>
    %329 = vector.broadcast %252 : f32 to vector<1x64xf32>
    %330 = arith.mulf %230, %329 : vector<1x64xf32>
    %331 = arith.addf %328, %330 : vector<1x64xf32>
    %332 = vector.broadcast %256 : f32 to vector<1x64xf32>
    %333 = arith.mulf %231, %332 : vector<1x64xf32>
    %334 = arith.addf %331, %333 : vector<1x64xf32>
    %335 = vector.broadcast %308 : f32 to vector<1x64xf32>
    %336 = arith.addf %334, %335 : vector<1x64xf32>
    %337 = vector.broadcast %245 : f32 to vector<1x64xf32>
    %338 = arith.mulf %228, %337 : vector<1x64xf32>
    %339 = vector.broadcast %249 : f32 to vector<1x64xf32>
    %340 = arith.mulf %229, %339 : vector<1x64xf32>
    %341 = arith.addf %338, %340 : vector<1x64xf32>
    %342 = vector.broadcast %253 : f32 to vector<1x64xf32>
    %343 = arith.mulf %230, %342 : vector<1x64xf32>
    %344 = arith.addf %341, %343 : vector<1x64xf32>
    %345 = vector.broadcast %257 : f32 to vector<1x64xf32>
    %346 = arith.mulf %231, %345 : vector<1x64xf32>
    %347 = arith.addf %344, %346 : vector<1x64xf32>
    %348 = vector.broadcast %309 : f32 to vector<1x64xf32>
    %349 = arith.addf %347, %348 : vector<1x64xf32>
    %350 = vector.broadcast %246 : f32 to vector<1x64xf32>
    %351 = arith.mulf %228, %350 : vector<1x64xf32>
    %352 = vector.broadcast %250 : f32 to vector<1x64xf32>
    %353 = arith.mulf %229, %352 : vector<1x64xf32>
    %354 = arith.addf %351, %353 : vector<1x64xf32>
    %355 = vector.broadcast %254 : f32 to vector<1x64xf32>
    %356 = arith.mulf %230, %355 : vector<1x64xf32>
    %357 = arith.addf %354, %356 : vector<1x64xf32>
    %358 = vector.broadcast %258 : f32 to vector<1x64xf32>
    %359 = arith.mulf %231, %358 : vector<1x64xf32>
    %360 = arith.addf %357, %359 : vector<1x64xf32>
    %361 = vector.broadcast %310 : f32 to vector<1x64xf32>
    %362 = arith.addf %360, %361 : vector<1x64xf32>
    %363 = vector.broadcast %247 : f32 to vector<1x64xf32>
    %364 = arith.mulf %228, %363 : vector<1x64xf32>
    %365 = vector.broadcast %251 : f32 to vector<1x64xf32>
    %366 = arith.mulf %229, %365 : vector<1x64xf32>
    %367 = arith.addf %364, %366 : vector<1x64xf32>
    %368 = vector.broadcast %255 : f32 to vector<1x64xf32>
    %369 = arith.mulf %230, %368 : vector<1x64xf32>
    %370 = arith.addf %367, %369 : vector<1x64xf32>
    %371 = vector.broadcast %259 : f32 to vector<1x64xf32>
    %372 = arith.mulf %231, %371 : vector<1x64xf32>
    %373 = arith.addf %370, %372 : vector<1x64xf32>
    %374 = vector.broadcast %311 : f32 to vector<1x64xf32>
    %375 = arith.addf %373, %374 : vector<1x64xf32>
    %376 = vector.broadcast %244 : f32 to vector<1x64xf32>
    %377 = arith.mulf %232, %376 : vector<1x64xf32>
    %378 = vector.broadcast %248 : f32 to vector<1x64xf32>
    %379 = arith.mulf %233, %378 : vector<1x64xf32>
    %380 = arith.addf %377, %379 : vector<1x64xf32>
    %381 = vector.broadcast %252 : f32 to vector<1x64xf32>
    %382 = arith.mulf %234, %381 : vector<1x64xf32>
    %383 = arith.addf %380, %382 : vector<1x64xf32>
    %384 = vector.broadcast %256 : f32 to vector<1x64xf32>
    %385 = arith.mulf %235, %384 : vector<1x64xf32>
    %386 = arith.addf %383, %385 : vector<1x64xf32>
    %387 = vector.broadcast %308 : f32 to vector<1x64xf32>
    %388 = arith.addf %386, %387 : vector<1x64xf32>
    %389 = vector.broadcast %245 : f32 to vector<1x64xf32>
    %390 = arith.mulf %232, %389 : vector<1x64xf32>
    %391 = vector.broadcast %249 : f32 to vector<1x64xf32>
    %392 = arith.mulf %233, %391 : vector<1x64xf32>
    %393 = arith.addf %390, %392 : vector<1x64xf32>
    %394 = vector.broadcast %253 : f32 to vector<1x64xf32>
    %395 = arith.mulf %234, %394 : vector<1x64xf32>
    %396 = arith.addf %393, %395 : vector<1x64xf32>
    %397 = vector.broadcast %257 : f32 to vector<1x64xf32>
    %398 = arith.mulf %235, %397 : vector<1x64xf32>
    %399 = arith.addf %396, %398 : vector<1x64xf32>
    %400 = vector.broadcast %309 : f32 to vector<1x64xf32>
    %401 = arith.addf %399, %400 : vector<1x64xf32>
    %402 = vector.broadcast %246 : f32 to vector<1x64xf32>
    %403 = arith.mulf %232, %402 : vector<1x64xf32>
    %404 = vector.broadcast %250 : f32 to vector<1x64xf32>
    %405 = arith.mulf %233, %404 : vector<1x64xf32>
    %406 = arith.addf %403, %405 : vector<1x64xf32>
    %407 = vector.broadcast %254 : f32 to vector<1x64xf32>
    %408 = arith.mulf %234, %407 : vector<1x64xf32>
    %409 = arith.addf %406, %408 : vector<1x64xf32>
    %410 = vector.broadcast %258 : f32 to vector<1x64xf32>
    %411 = arith.mulf %235, %410 : vector<1x64xf32>
    %412 = arith.addf %409, %411 : vector<1x64xf32>
    %413 = vector.broadcast %310 : f32 to vector<1x64xf32>
    %414 = arith.addf %412, %413 : vector<1x64xf32>
    %415 = vector.broadcast %247 : f32 to vector<1x64xf32>
    %416 = arith.mulf %232, %415 : vector<1x64xf32>
    %417 = vector.broadcast %251 : f32 to vector<1x64xf32>
    %418 = arith.mulf %233, %417 : vector<1x64xf32>
    %419 = arith.addf %416, %418 : vector<1x64xf32>
    %420 = vector.broadcast %255 : f32 to vector<1x64xf32>
    %421 = arith.mulf %234, %420 : vector<1x64xf32>
    %422 = arith.addf %419, %421 : vector<1x64xf32>
    %423 = vector.broadcast %259 : f32 to vector<1x64xf32>
    %424 = arith.mulf %235, %423 : vector<1x64xf32>
    %425 = arith.addf %422, %424 : vector<1x64xf32>
    %426 = vector.broadcast %311 : f32 to vector<1x64xf32>
    %427 = arith.addf %425, %426 : vector<1x64xf32>
    %428 = vector.broadcast %244 : f32 to vector<1x64xf32>
    %429 = arith.mulf %236, %428 : vector<1x64xf32>
    %430 = vector.broadcast %248 : f32 to vector<1x64xf32>
    %431 = arith.mulf %237, %430 : vector<1x64xf32>
    %432 = arith.addf %429, %431 : vector<1x64xf32>
    %433 = vector.broadcast %252 : f32 to vector<1x64xf32>
    %434 = arith.mulf %238, %433 : vector<1x64xf32>
    %435 = arith.addf %432, %434 : vector<1x64xf32>
    %436 = vector.broadcast %256 : f32 to vector<1x64xf32>
    %437 = arith.mulf %239, %436 : vector<1x64xf32>
    %438 = arith.addf %435, %437 : vector<1x64xf32>
    %439 = vector.broadcast %308 : f32 to vector<1x64xf32>
    %440 = arith.addf %438, %439 : vector<1x64xf32>
    %441 = vector.broadcast %245 : f32 to vector<1x64xf32>
    %442 = arith.mulf %236, %441 : vector<1x64xf32>
    %443 = vector.broadcast %249 : f32 to vector<1x64xf32>
    %444 = arith.mulf %237, %443 : vector<1x64xf32>
    %445 = arith.addf %442, %444 : vector<1x64xf32>
    %446 = vector.broadcast %253 : f32 to vector<1x64xf32>
    %447 = arith.mulf %238, %446 : vector<1x64xf32>
    %448 = arith.addf %445, %447 : vector<1x64xf32>
    %449 = vector.broadcast %257 : f32 to vector<1x64xf32>
    %450 = arith.mulf %239, %449 : vector<1x64xf32>
    %451 = arith.addf %448, %450 : vector<1x64xf32>
    %452 = vector.broadcast %309 : f32 to vector<1x64xf32>
    %453 = arith.addf %451, %452 : vector<1x64xf32>
    %454 = vector.broadcast %246 : f32 to vector<1x64xf32>
    %455 = arith.mulf %236, %454 : vector<1x64xf32>
    %456 = vector.broadcast %250 : f32 to vector<1x64xf32>
    %457 = arith.mulf %237, %456 : vector<1x64xf32>
    %458 = arith.addf %455, %457 : vector<1x64xf32>
    %459 = vector.broadcast %254 : f32 to vector<1x64xf32>
    %460 = arith.mulf %238, %459 : vector<1x64xf32>
    %461 = arith.addf %458, %460 : vector<1x64xf32>
    %462 = vector.broadcast %258 : f32 to vector<1x64xf32>
    %463 = arith.mulf %239, %462 : vector<1x64xf32>
    %464 = arith.addf %461, %463 : vector<1x64xf32>
    %465 = vector.broadcast %310 : f32 to vector<1x64xf32>
    %466 = arith.addf %464, %465 : vector<1x64xf32>
    %467 = vector.broadcast %247 : f32 to vector<1x64xf32>
    %468 = arith.mulf %236, %467 : vector<1x64xf32>
    %469 = vector.broadcast %251 : f32 to vector<1x64xf32>
    %470 = arith.mulf %237, %469 : vector<1x64xf32>
    %471 = arith.addf %468, %470 : vector<1x64xf32>
    %472 = vector.broadcast %255 : f32 to vector<1x64xf32>
    %473 = arith.mulf %238, %472 : vector<1x64xf32>
    %474 = arith.addf %471, %473 : vector<1x64xf32>
    %475 = vector.broadcast %259 : f32 to vector<1x64xf32>
    %476 = arith.mulf %239, %475 : vector<1x64xf32>
    %477 = arith.addf %474, %476 : vector<1x64xf32>
    %478 = vector.broadcast %311 : f32 to vector<1x64xf32>
    %479 = arith.addf %477, %478 : vector<1x64xf32>
    %480 = vector.broadcast %244 : f32 to vector<1x64xf32>
    %481 = arith.mulf %240, %480 : vector<1x64xf32>
    %482 = vector.broadcast %248 : f32 to vector<1x64xf32>
    %483 = arith.mulf %241, %482 : vector<1x64xf32>
    %484 = arith.addf %481, %483 : vector<1x64xf32>
    %485 = vector.broadcast %252 : f32 to vector<1x64xf32>
    %486 = arith.mulf %242, %485 : vector<1x64xf32>
    %487 = arith.addf %484, %486 : vector<1x64xf32>
    %488 = vector.broadcast %256 : f32 to vector<1x64xf32>
    %489 = arith.mulf %243, %488 : vector<1x64xf32>
    %490 = arith.addf %487, %489 : vector<1x64xf32>
    %491 = vector.broadcast %308 : f32 to vector<1x64xf32>
    %492 = arith.addf %490, %491 : vector<1x64xf32>
    %493 = vector.broadcast %245 : f32 to vector<1x64xf32>
    %494 = arith.mulf %240, %493 : vector<1x64xf32>
    %495 = vector.broadcast %249 : f32 to vector<1x64xf32>
    %496 = arith.mulf %241, %495 : vector<1x64xf32>
    %497 = arith.addf %494, %496 : vector<1x64xf32>
    %498 = vector.broadcast %253 : f32 to vector<1x64xf32>
    %499 = arith.mulf %242, %498 : vector<1x64xf32>
    %500 = arith.addf %497, %499 : vector<1x64xf32>
    %501 = vector.broadcast %257 : f32 to vector<1x64xf32>
    %502 = arith.mulf %243, %501 : vector<1x64xf32>
    %503 = arith.addf %500, %502 : vector<1x64xf32>
    %504 = vector.broadcast %309 : f32 to vector<1x64xf32>
    %505 = arith.addf %503, %504 : vector<1x64xf32>
    %506 = vector.broadcast %246 : f32 to vector<1x64xf32>
    %507 = arith.mulf %240, %506 : vector<1x64xf32>
    %508 = vector.broadcast %250 : f32 to vector<1x64xf32>
    %509 = arith.mulf %241, %508 : vector<1x64xf32>
    %510 = arith.addf %507, %509 : vector<1x64xf32>
    %511 = vector.broadcast %254 : f32 to vector<1x64xf32>
    %512 = arith.mulf %242, %511 : vector<1x64xf32>
    %513 = arith.addf %510, %512 : vector<1x64xf32>
    %514 = vector.broadcast %258 : f32 to vector<1x64xf32>
    %515 = arith.mulf %243, %514 : vector<1x64xf32>
    %516 = arith.addf %513, %515 : vector<1x64xf32>
    %517 = vector.broadcast %310 : f32 to vector<1x64xf32>
    %518 = arith.addf %516, %517 : vector<1x64xf32>
    %519 = vector.broadcast %247 : f32 to vector<1x64xf32>
    %520 = arith.mulf %240, %519 : vector<1x64xf32>
    %521 = vector.broadcast %251 : f32 to vector<1x64xf32>
    %522 = arith.mulf %241, %521 : vector<1x64xf32>
    %523 = arith.addf %520, %522 : vector<1x64xf32>
    %524 = vector.broadcast %255 : f32 to vector<1x64xf32>
    %525 = arith.mulf %242, %524 : vector<1x64xf32>
    %526 = arith.addf %523, %525 : vector<1x64xf32>
    %527 = vector.broadcast %259 : f32 to vector<1x64xf32>
    %528 = arith.mulf %243, %527 : vector<1x64xf32>
    %529 = arith.addf %526, %528 : vector<1x64xf32>
    %530 = vector.broadcast %311 : f32 to vector<1x64xf32>
    %531 = arith.addf %529, %530 : vector<1x64xf32>
    %532 = vector.broadcast %260 : f32 to vector<1x64xf32>
    %533 = arith.mulf %228, %532 : vector<1x64xf32>
    %534 = vector.broadcast %264 : f32 to vector<1x64xf32>
    %535 = arith.mulf %229, %534 : vector<1x64xf32>
    %536 = arith.addf %533, %535 : vector<1x64xf32>
    %537 = vector.broadcast %268 : f32 to vector<1x64xf32>
    %538 = arith.mulf %230, %537 : vector<1x64xf32>
    %539 = arith.addf %536, %538 : vector<1x64xf32>
    %540 = vector.broadcast %272 : f32 to vector<1x64xf32>
    %541 = arith.mulf %231, %540 : vector<1x64xf32>
    %542 = arith.addf %539, %541 : vector<1x64xf32>
    %543 = vector.broadcast %312 : f32 to vector<1x64xf32>
    %544 = arith.addf %542, %543 : vector<1x64xf32>
    %545 = vector.broadcast %261 : f32 to vector<1x64xf32>
    %546 = arith.mulf %228, %545 : vector<1x64xf32>
    %547 = vector.broadcast %265 : f32 to vector<1x64xf32>
    %548 = arith.mulf %229, %547 : vector<1x64xf32>
    %549 = arith.addf %546, %548 : vector<1x64xf32>
    %550 = vector.broadcast %269 : f32 to vector<1x64xf32>
    %551 = arith.mulf %230, %550 : vector<1x64xf32>
    %552 = arith.addf %549, %551 : vector<1x64xf32>
    %553 = vector.broadcast %273 : f32 to vector<1x64xf32>
    %554 = arith.mulf %231, %553 : vector<1x64xf32>
    %555 = arith.addf %552, %554 : vector<1x64xf32>
    %556 = vector.broadcast %313 : f32 to vector<1x64xf32>
    %557 = arith.addf %555, %556 : vector<1x64xf32>
    %558 = vector.broadcast %262 : f32 to vector<1x64xf32>
    %559 = arith.mulf %228, %558 : vector<1x64xf32>
    %560 = vector.broadcast %266 : f32 to vector<1x64xf32>
    %561 = arith.mulf %229, %560 : vector<1x64xf32>
    %562 = arith.addf %559, %561 : vector<1x64xf32>
    %563 = vector.broadcast %270 : f32 to vector<1x64xf32>
    %564 = arith.mulf %230, %563 : vector<1x64xf32>
    %565 = arith.addf %562, %564 : vector<1x64xf32>
    %566 = vector.broadcast %274 : f32 to vector<1x64xf32>
    %567 = arith.mulf %231, %566 : vector<1x64xf32>
    %568 = arith.addf %565, %567 : vector<1x64xf32>
    %569 = vector.broadcast %314 : f32 to vector<1x64xf32>
    %570 = arith.addf %568, %569 : vector<1x64xf32>
    %571 = vector.broadcast %263 : f32 to vector<1x64xf32>
    %572 = arith.mulf %228, %571 : vector<1x64xf32>
    %573 = vector.broadcast %267 : f32 to vector<1x64xf32>
    %574 = arith.mulf %229, %573 : vector<1x64xf32>
    %575 = arith.addf %572, %574 : vector<1x64xf32>
    %576 = vector.broadcast %271 : f32 to vector<1x64xf32>
    %577 = arith.mulf %230, %576 : vector<1x64xf32>
    %578 = arith.addf %575, %577 : vector<1x64xf32>
    %579 = vector.broadcast %275 : f32 to vector<1x64xf32>
    %580 = arith.mulf %231, %579 : vector<1x64xf32>
    %581 = arith.addf %578, %580 : vector<1x64xf32>
    %582 = vector.broadcast %315 : f32 to vector<1x64xf32>
    %583 = arith.addf %581, %582 : vector<1x64xf32>
    %584 = vector.broadcast %260 : f32 to vector<1x64xf32>
    %585 = arith.mulf %232, %584 : vector<1x64xf32>
    %586 = vector.broadcast %264 : f32 to vector<1x64xf32>
    %587 = arith.mulf %233, %586 : vector<1x64xf32>
    %588 = arith.addf %585, %587 : vector<1x64xf32>
    %589 = vector.broadcast %268 : f32 to vector<1x64xf32>
    %590 = arith.mulf %234, %589 : vector<1x64xf32>
    %591 = arith.addf %588, %590 : vector<1x64xf32>
    %592 = vector.broadcast %272 : f32 to vector<1x64xf32>
    %593 = arith.mulf %235, %592 : vector<1x64xf32>
    %594 = arith.addf %591, %593 : vector<1x64xf32>
    %595 = vector.broadcast %312 : f32 to vector<1x64xf32>
    %596 = arith.addf %594, %595 : vector<1x64xf32>
    %597 = vector.broadcast %261 : f32 to vector<1x64xf32>
    %598 = arith.mulf %232, %597 : vector<1x64xf32>
    %599 = vector.broadcast %265 : f32 to vector<1x64xf32>
    %600 = arith.mulf %233, %599 : vector<1x64xf32>
    %601 = arith.addf %598, %600 : vector<1x64xf32>
    %602 = vector.broadcast %269 : f32 to vector<1x64xf32>
    %603 = arith.mulf %234, %602 : vector<1x64xf32>
    %604 = arith.addf %601, %603 : vector<1x64xf32>
    %605 = vector.broadcast %273 : f32 to vector<1x64xf32>
    %606 = arith.mulf %235, %605 : vector<1x64xf32>
    %607 = arith.addf %604, %606 : vector<1x64xf32>
    %608 = vector.broadcast %313 : f32 to vector<1x64xf32>
    %609 = arith.addf %607, %608 : vector<1x64xf32>
    %610 = vector.broadcast %262 : f32 to vector<1x64xf32>
    %611 = arith.mulf %232, %610 : vector<1x64xf32>
    %612 = vector.broadcast %266 : f32 to vector<1x64xf32>
    %613 = arith.mulf %233, %612 : vector<1x64xf32>
    %614 = arith.addf %611, %613 : vector<1x64xf32>
    %615 = vector.broadcast %270 : f32 to vector<1x64xf32>
    %616 = arith.mulf %234, %615 : vector<1x64xf32>
    %617 = arith.addf %614, %616 : vector<1x64xf32>
    %618 = vector.broadcast %274 : f32 to vector<1x64xf32>
    %619 = arith.mulf %235, %618 : vector<1x64xf32>
    %620 = arith.addf %617, %619 : vector<1x64xf32>
    %621 = vector.broadcast %314 : f32 to vector<1x64xf32>
    %622 = arith.addf %620, %621 : vector<1x64xf32>
    %623 = vector.broadcast %263 : f32 to vector<1x64xf32>
    %624 = arith.mulf %232, %623 : vector<1x64xf32>
    %625 = vector.broadcast %267 : f32 to vector<1x64xf32>
    %626 = arith.mulf %233, %625 : vector<1x64xf32>
    %627 = arith.addf %624, %626 : vector<1x64xf32>
    %628 = vector.broadcast %271 : f32 to vector<1x64xf32>
    %629 = arith.mulf %234, %628 : vector<1x64xf32>
    %630 = arith.addf %627, %629 : vector<1x64xf32>
    %631 = vector.broadcast %275 : f32 to vector<1x64xf32>
    %632 = arith.mulf %235, %631 : vector<1x64xf32>
    %633 = arith.addf %630, %632 : vector<1x64xf32>
    %634 = vector.broadcast %315 : f32 to vector<1x64xf32>
    %635 = arith.addf %633, %634 : vector<1x64xf32>
    %636 = vector.broadcast %260 : f32 to vector<1x64xf32>
    %637 = arith.mulf %236, %636 : vector<1x64xf32>
    %638 = vector.broadcast %264 : f32 to vector<1x64xf32>
    %639 = arith.mulf %237, %638 : vector<1x64xf32>
    %640 = arith.addf %637, %639 : vector<1x64xf32>
    %641 = vector.broadcast %268 : f32 to vector<1x64xf32>
    %642 = arith.mulf %238, %641 : vector<1x64xf32>
    %643 = arith.addf %640, %642 : vector<1x64xf32>
    %644 = vector.broadcast %272 : f32 to vector<1x64xf32>
    %645 = arith.mulf %239, %644 : vector<1x64xf32>
    %646 = arith.addf %643, %645 : vector<1x64xf32>
    %647 = vector.broadcast %312 : f32 to vector<1x64xf32>
    %648 = arith.addf %646, %647 : vector<1x64xf32>
    %649 = vector.broadcast %261 : f32 to vector<1x64xf32>
    %650 = arith.mulf %236, %649 : vector<1x64xf32>
    %651 = vector.broadcast %265 : f32 to vector<1x64xf32>
    %652 = arith.mulf %237, %651 : vector<1x64xf32>
    %653 = arith.addf %650, %652 : vector<1x64xf32>
    %654 = vector.broadcast %269 : f32 to vector<1x64xf32>
    %655 = arith.mulf %238, %654 : vector<1x64xf32>
    %656 = arith.addf %653, %655 : vector<1x64xf32>
    %657 = vector.broadcast %273 : f32 to vector<1x64xf32>
    %658 = arith.mulf %239, %657 : vector<1x64xf32>
    %659 = arith.addf %656, %658 : vector<1x64xf32>
    %660 = vector.broadcast %313 : f32 to vector<1x64xf32>
    %661 = arith.addf %659, %660 : vector<1x64xf32>
    %662 = vector.broadcast %262 : f32 to vector<1x64xf32>
    %663 = arith.mulf %236, %662 : vector<1x64xf32>
    %664 = vector.broadcast %266 : f32 to vector<1x64xf32>
    %665 = arith.mulf %237, %664 : vector<1x64xf32>
    %666 = arith.addf %663, %665 : vector<1x64xf32>
    %667 = vector.broadcast %270 : f32 to vector<1x64xf32>
    %668 = arith.mulf %238, %667 : vector<1x64xf32>
    %669 = arith.addf %666, %668 : vector<1x64xf32>
    %670 = vector.broadcast %274 : f32 to vector<1x64xf32>
    %671 = arith.mulf %239, %670 : vector<1x64xf32>
    %672 = arith.addf %669, %671 : vector<1x64xf32>
    %673 = vector.broadcast %314 : f32 to vector<1x64xf32>
    %674 = arith.addf %672, %673 : vector<1x64xf32>
    %675 = vector.broadcast %263 : f32 to vector<1x64xf32>
    %676 = arith.mulf %236, %675 : vector<1x64xf32>
    %677 = vector.broadcast %267 : f32 to vector<1x64xf32>
    %678 = arith.mulf %237, %677 : vector<1x64xf32>
    %679 = arith.addf %676, %678 : vector<1x64xf32>
    %680 = vector.broadcast %271 : f32 to vector<1x64xf32>
    %681 = arith.mulf %238, %680 : vector<1x64xf32>
    %682 = arith.addf %679, %681 : vector<1x64xf32>
    %683 = vector.broadcast %275 : f32 to vector<1x64xf32>
    %684 = arith.mulf %239, %683 : vector<1x64xf32>
    %685 = arith.addf %682, %684 : vector<1x64xf32>
    %686 = vector.broadcast %315 : f32 to vector<1x64xf32>
    %687 = arith.addf %685, %686 : vector<1x64xf32>
    %688 = vector.broadcast %260 : f32 to vector<1x64xf32>
    %689 = arith.mulf %240, %688 : vector<1x64xf32>
    %690 = vector.broadcast %264 : f32 to vector<1x64xf32>
    %691 = arith.mulf %241, %690 : vector<1x64xf32>
    %692 = arith.addf %689, %691 : vector<1x64xf32>
    %693 = vector.broadcast %268 : f32 to vector<1x64xf32>
    %694 = arith.mulf %242, %693 : vector<1x64xf32>
    %695 = arith.addf %692, %694 : vector<1x64xf32>
    %696 = vector.broadcast %272 : f32 to vector<1x64xf32>
    %697 = arith.mulf %243, %696 : vector<1x64xf32>
    %698 = arith.addf %695, %697 : vector<1x64xf32>
    %699 = vector.broadcast %312 : f32 to vector<1x64xf32>
    %700 = arith.addf %698, %699 : vector<1x64xf32>
    %701 = vector.broadcast %261 : f32 to vector<1x64xf32>
    %702 = arith.mulf %240, %701 : vector<1x64xf32>
    %703 = vector.broadcast %265 : f32 to vector<1x64xf32>
    %704 = arith.mulf %241, %703 : vector<1x64xf32>
    %705 = arith.addf %702, %704 : vector<1x64xf32>
    %706 = vector.broadcast %269 : f32 to vector<1x64xf32>
    %707 = arith.mulf %242, %706 : vector<1x64xf32>
    %708 = arith.addf %705, %707 : vector<1x64xf32>
    %709 = vector.broadcast %273 : f32 to vector<1x64xf32>
    %710 = arith.mulf %243, %709 : vector<1x64xf32>
    %711 = arith.addf %708, %710 : vector<1x64xf32>
    %712 = vector.broadcast %313 : f32 to vector<1x64xf32>
    %713 = arith.addf %711, %712 : vector<1x64xf32>
    %714 = vector.broadcast %262 : f32 to vector<1x64xf32>
    %715 = arith.mulf %240, %714 : vector<1x64xf32>
    %716 = vector.broadcast %266 : f32 to vector<1x64xf32>
    %717 = arith.mulf %241, %716 : vector<1x64xf32>
    %718 = arith.addf %715, %717 : vector<1x64xf32>
    %719 = vector.broadcast %270 : f32 to vector<1x64xf32>
    %720 = arith.mulf %242, %719 : vector<1x64xf32>
    %721 = arith.addf %718, %720 : vector<1x64xf32>
    %722 = vector.broadcast %274 : f32 to vector<1x64xf32>
    %723 = arith.mulf %243, %722 : vector<1x64xf32>
    %724 = arith.addf %721, %723 : vector<1x64xf32>
    %725 = vector.broadcast %314 : f32 to vector<1x64xf32>
    %726 = arith.addf %724, %725 : vector<1x64xf32>
    %727 = vector.broadcast %263 : f32 to vector<1x64xf32>
    %728 = arith.mulf %240, %727 : vector<1x64xf32>
    %729 = vector.broadcast %267 : f32 to vector<1x64xf32>
    %730 = arith.mulf %241, %729 : vector<1x64xf32>
    %731 = arith.addf %728, %730 : vector<1x64xf32>
    %732 = vector.broadcast %271 : f32 to vector<1x64xf32>
    %733 = arith.mulf %242, %732 : vector<1x64xf32>
    %734 = arith.addf %731, %733 : vector<1x64xf32>
    %735 = vector.broadcast %275 : f32 to vector<1x64xf32>
    %736 = arith.mulf %243, %735 : vector<1x64xf32>
    %737 = arith.addf %734, %736 : vector<1x64xf32>
    %738 = vector.broadcast %315 : f32 to vector<1x64xf32>
    %739 = arith.addf %737, %738 : vector<1x64xf32>
    %740 = vector.broadcast %276 : f32 to vector<1x64xf32>
    %741 = arith.mulf %228, %740 : vector<1x64xf32>
    %742 = vector.broadcast %280 : f32 to vector<1x64xf32>
    %743 = arith.mulf %229, %742 : vector<1x64xf32>
    %744 = arith.addf %741, %743 : vector<1x64xf32>
    %745 = vector.broadcast %284 : f32 to vector<1x64xf32>
    %746 = arith.mulf %230, %745 : vector<1x64xf32>
    %747 = arith.addf %744, %746 : vector<1x64xf32>
    %748 = vector.broadcast %288 : f32 to vector<1x64xf32>
    %749 = arith.mulf %231, %748 : vector<1x64xf32>
    %750 = arith.addf %747, %749 : vector<1x64xf32>
    %751 = vector.broadcast %316 : f32 to vector<1x64xf32>
    %752 = arith.addf %750, %751 : vector<1x64xf32>
    %753 = vector.broadcast %277 : f32 to vector<1x64xf32>
    %754 = arith.mulf %228, %753 : vector<1x64xf32>
    %755 = vector.broadcast %281 : f32 to vector<1x64xf32>
    %756 = arith.mulf %229, %755 : vector<1x64xf32>
    %757 = arith.addf %754, %756 : vector<1x64xf32>
    %758 = vector.broadcast %285 : f32 to vector<1x64xf32>
    %759 = arith.mulf %230, %758 : vector<1x64xf32>
    %760 = arith.addf %757, %759 : vector<1x64xf32>
    %761 = vector.broadcast %289 : f32 to vector<1x64xf32>
    %762 = arith.mulf %231, %761 : vector<1x64xf32>
    %763 = arith.addf %760, %762 : vector<1x64xf32>
    %764 = vector.broadcast %317 : f32 to vector<1x64xf32>
    %765 = arith.addf %763, %764 : vector<1x64xf32>
    %766 = vector.broadcast %278 : f32 to vector<1x64xf32>
    %767 = arith.mulf %228, %766 : vector<1x64xf32>
    %768 = vector.broadcast %282 : f32 to vector<1x64xf32>
    %769 = arith.mulf %229, %768 : vector<1x64xf32>
    %770 = arith.addf %767, %769 : vector<1x64xf32>
    %771 = vector.broadcast %286 : f32 to vector<1x64xf32>
    %772 = arith.mulf %230, %771 : vector<1x64xf32>
    %773 = arith.addf %770, %772 : vector<1x64xf32>
    %774 = vector.broadcast %290 : f32 to vector<1x64xf32>
    %775 = arith.mulf %231, %774 : vector<1x64xf32>
    %776 = arith.addf %773, %775 : vector<1x64xf32>
    %777 = vector.broadcast %318 : f32 to vector<1x64xf32>
    %778 = arith.addf %776, %777 : vector<1x64xf32>
    %779 = vector.broadcast %279 : f32 to vector<1x64xf32>
    %780 = arith.mulf %228, %779 : vector<1x64xf32>
    %781 = vector.broadcast %283 : f32 to vector<1x64xf32>
    %782 = arith.mulf %229, %781 : vector<1x64xf32>
    %783 = arith.addf %780, %782 : vector<1x64xf32>
    %784 = vector.broadcast %287 : f32 to vector<1x64xf32>
    %785 = arith.mulf %230, %784 : vector<1x64xf32>
    %786 = arith.addf %783, %785 : vector<1x64xf32>
    %787 = vector.broadcast %291 : f32 to vector<1x64xf32>
    %788 = arith.mulf %231, %787 : vector<1x64xf32>
    %789 = arith.addf %786, %788 : vector<1x64xf32>
    %790 = vector.broadcast %319 : f32 to vector<1x64xf32>
    %791 = arith.addf %789, %790 : vector<1x64xf32>
    %792 = vector.broadcast %276 : f32 to vector<1x64xf32>
    %793 = arith.mulf %232, %792 : vector<1x64xf32>
    %794 = vector.broadcast %280 : f32 to vector<1x64xf32>
    %795 = arith.mulf %233, %794 : vector<1x64xf32>
    %796 = arith.addf %793, %795 : vector<1x64xf32>
    %797 = vector.broadcast %284 : f32 to vector<1x64xf32>
    %798 = arith.mulf %234, %797 : vector<1x64xf32>
    %799 = arith.addf %796, %798 : vector<1x64xf32>
    %800 = vector.broadcast %288 : f32 to vector<1x64xf32>
    %801 = arith.mulf %235, %800 : vector<1x64xf32>
    %802 = arith.addf %799, %801 : vector<1x64xf32>
    %803 = vector.broadcast %316 : f32 to vector<1x64xf32>
    %804 = arith.addf %802, %803 : vector<1x64xf32>
    %805 = vector.broadcast %277 : f32 to vector<1x64xf32>
    %806 = arith.mulf %232, %805 : vector<1x64xf32>
    %807 = vector.broadcast %281 : f32 to vector<1x64xf32>
    %808 = arith.mulf %233, %807 : vector<1x64xf32>
    %809 = arith.addf %806, %808 : vector<1x64xf32>
    %810 = vector.broadcast %285 : f32 to vector<1x64xf32>
    %811 = arith.mulf %234, %810 : vector<1x64xf32>
    %812 = arith.addf %809, %811 : vector<1x64xf32>
    %813 = vector.broadcast %289 : f32 to vector<1x64xf32>
    %814 = arith.mulf %235, %813 : vector<1x64xf32>
    %815 = arith.addf %812, %814 : vector<1x64xf32>
    %816 = vector.broadcast %317 : f32 to vector<1x64xf32>
    %817 = arith.addf %815, %816 : vector<1x64xf32>
    %818 = vector.broadcast %278 : f32 to vector<1x64xf32>
    %819 = arith.mulf %232, %818 : vector<1x64xf32>
    %820 = vector.broadcast %282 : f32 to vector<1x64xf32>
    %821 = arith.mulf %233, %820 : vector<1x64xf32>
    %822 = arith.addf %819, %821 : vector<1x64xf32>
    %823 = vector.broadcast %286 : f32 to vector<1x64xf32>
    %824 = arith.mulf %234, %823 : vector<1x64xf32>
    %825 = arith.addf %822, %824 : vector<1x64xf32>
    %826 = vector.broadcast %290 : f32 to vector<1x64xf32>
    %827 = arith.mulf %235, %826 : vector<1x64xf32>
    %828 = arith.addf %825, %827 : vector<1x64xf32>
    %829 = vector.broadcast %318 : f32 to vector<1x64xf32>
    %830 = arith.addf %828, %829 : vector<1x64xf32>
    %831 = vector.broadcast %279 : f32 to vector<1x64xf32>
    %832 = arith.mulf %232, %831 : vector<1x64xf32>
    %833 = vector.broadcast %283 : f32 to vector<1x64xf32>
    %834 = arith.mulf %233, %833 : vector<1x64xf32>
    %835 = arith.addf %832, %834 : vector<1x64xf32>
    %836 = vector.broadcast %287 : f32 to vector<1x64xf32>
    %837 = arith.mulf %234, %836 : vector<1x64xf32>
    %838 = arith.addf %835, %837 : vector<1x64xf32>
    %839 = vector.broadcast %291 : f32 to vector<1x64xf32>
    %840 = arith.mulf %235, %839 : vector<1x64xf32>
    %841 = arith.addf %838, %840 : vector<1x64xf32>
    %842 = vector.broadcast %319 : f32 to vector<1x64xf32>
    %843 = arith.addf %841, %842 : vector<1x64xf32>
    %844 = vector.broadcast %276 : f32 to vector<1x64xf32>
    %845 = arith.mulf %236, %844 : vector<1x64xf32>
    %846 = vector.broadcast %280 : f32 to vector<1x64xf32>
    %847 = arith.mulf %237, %846 : vector<1x64xf32>
    %848 = arith.addf %845, %847 : vector<1x64xf32>
    %849 = vector.broadcast %284 : f32 to vector<1x64xf32>
    %850 = arith.mulf %238, %849 : vector<1x64xf32>
    %851 = arith.addf %848, %850 : vector<1x64xf32>
    %852 = vector.broadcast %288 : f32 to vector<1x64xf32>
    %853 = arith.mulf %239, %852 : vector<1x64xf32>
    %854 = arith.addf %851, %853 : vector<1x64xf32>
    %855 = vector.broadcast %316 : f32 to vector<1x64xf32>
    %856 = arith.addf %854, %855 : vector<1x64xf32>
    %857 = vector.broadcast %277 : f32 to vector<1x64xf32>
    %858 = arith.mulf %236, %857 : vector<1x64xf32>
    %859 = vector.broadcast %281 : f32 to vector<1x64xf32>
    %860 = arith.mulf %237, %859 : vector<1x64xf32>
    %861 = arith.addf %858, %860 : vector<1x64xf32>
    %862 = vector.broadcast %285 : f32 to vector<1x64xf32>
    %863 = arith.mulf %238, %862 : vector<1x64xf32>
    %864 = arith.addf %861, %863 : vector<1x64xf32>
    %865 = vector.broadcast %289 : f32 to vector<1x64xf32>
    %866 = arith.mulf %239, %865 : vector<1x64xf32>
    %867 = arith.addf %864, %866 : vector<1x64xf32>
    %868 = vector.broadcast %317 : f32 to vector<1x64xf32>
    %869 = arith.addf %867, %868 : vector<1x64xf32>
    %870 = vector.broadcast %278 : f32 to vector<1x64xf32>
    %871 = arith.mulf %236, %870 : vector<1x64xf32>
    %872 = vector.broadcast %282 : f32 to vector<1x64xf32>
    %873 = arith.mulf %237, %872 : vector<1x64xf32>
    %874 = arith.addf %871, %873 : vector<1x64xf32>
    %875 = vector.broadcast %286 : f32 to vector<1x64xf32>
    %876 = arith.mulf %238, %875 : vector<1x64xf32>
    %877 = arith.addf %874, %876 : vector<1x64xf32>
    %878 = vector.broadcast %290 : f32 to vector<1x64xf32>
    %879 = arith.mulf %239, %878 : vector<1x64xf32>
    %880 = arith.addf %877, %879 : vector<1x64xf32>
    %881 = vector.broadcast %318 : f32 to vector<1x64xf32>
    %882 = arith.addf %880, %881 : vector<1x64xf32>
    %883 = vector.broadcast %279 : f32 to vector<1x64xf32>
    %884 = arith.mulf %236, %883 : vector<1x64xf32>
    %885 = vector.broadcast %283 : f32 to vector<1x64xf32>
    %886 = arith.mulf %237, %885 : vector<1x64xf32>
    %887 = arith.addf %884, %886 : vector<1x64xf32>
    %888 = vector.broadcast %287 : f32 to vector<1x64xf32>
    %889 = arith.mulf %238, %888 : vector<1x64xf32>
    %890 = arith.addf %887, %889 : vector<1x64xf32>
    %891 = vector.broadcast %291 : f32 to vector<1x64xf32>
    %892 = arith.mulf %239, %891 : vector<1x64xf32>
    %893 = arith.addf %890, %892 : vector<1x64xf32>
    %894 = vector.broadcast %319 : f32 to vector<1x64xf32>
    %895 = arith.addf %893, %894 : vector<1x64xf32>
    %896 = vector.broadcast %276 : f32 to vector<1x64xf32>
    %897 = arith.mulf %240, %896 : vector<1x64xf32>
    %898 = vector.broadcast %280 : f32 to vector<1x64xf32>
    %899 = arith.mulf %241, %898 : vector<1x64xf32>
    %900 = arith.addf %897, %899 : vector<1x64xf32>
    %901 = vector.broadcast %284 : f32 to vector<1x64xf32>
    %902 = arith.mulf %242, %901 : vector<1x64xf32>
    %903 = arith.addf %900, %902 : vector<1x64xf32>
    %904 = vector.broadcast %288 : f32 to vector<1x64xf32>
    %905 = arith.mulf %243, %904 : vector<1x64xf32>
    %906 = arith.addf %903, %905 : vector<1x64xf32>
    %907 = vector.broadcast %316 : f32 to vector<1x64xf32>
    %908 = arith.addf %906, %907 : vector<1x64xf32>
    %909 = vector.broadcast %277 : f32 to vector<1x64xf32>
    %910 = arith.mulf %240, %909 : vector<1x64xf32>
    %911 = vector.broadcast %281 : f32 to vector<1x64xf32>
    %912 = arith.mulf %241, %911 : vector<1x64xf32>
    %913 = arith.addf %910, %912 : vector<1x64xf32>
    %914 = vector.broadcast %285 : f32 to vector<1x64xf32>
    %915 = arith.mulf %242, %914 : vector<1x64xf32>
    %916 = arith.addf %913, %915 : vector<1x64xf32>
    %917 = vector.broadcast %289 : f32 to vector<1x64xf32>
    %918 = arith.mulf %243, %917 : vector<1x64xf32>
    %919 = arith.addf %916, %918 : vector<1x64xf32>
    %920 = vector.broadcast %317 : f32 to vector<1x64xf32>
    %921 = arith.addf %919, %920 : vector<1x64xf32>
    %922 = vector.broadcast %278 : f32 to vector<1x64xf32>
    %923 = arith.mulf %240, %922 : vector<1x64xf32>
    %924 = vector.broadcast %282 : f32 to vector<1x64xf32>
    %925 = arith.mulf %241, %924 : vector<1x64xf32>
    %926 = arith.addf %923, %925 : vector<1x64xf32>
    %927 = vector.broadcast %286 : f32 to vector<1x64xf32>
    %928 = arith.mulf %242, %927 : vector<1x64xf32>
    %929 = arith.addf %926, %928 : vector<1x64xf32>
    %930 = vector.broadcast %290 : f32 to vector<1x64xf32>
    %931 = arith.mulf %243, %930 : vector<1x64xf32>
    %932 = arith.addf %929, %931 : vector<1x64xf32>
    %933 = vector.broadcast %318 : f32 to vector<1x64xf32>
    %934 = arith.addf %932, %933 : vector<1x64xf32>
    %935 = vector.broadcast %279 : f32 to vector<1x64xf32>
    %936 = arith.mulf %240, %935 : vector<1x64xf32>
    %937 = vector.broadcast %283 : f32 to vector<1x64xf32>
    %938 = arith.mulf %241, %937 : vector<1x64xf32>
    %939 = arith.addf %936, %938 : vector<1x64xf32>
    %940 = vector.broadcast %287 : f32 to vector<1x64xf32>
    %941 = arith.mulf %242, %940 : vector<1x64xf32>
    %942 = arith.addf %939, %941 : vector<1x64xf32>
    %943 = vector.broadcast %291 : f32 to vector<1x64xf32>
    %944 = arith.mulf %243, %943 : vector<1x64xf32>
    %945 = arith.addf %942, %944 : vector<1x64xf32>
    %946 = vector.broadcast %319 : f32 to vector<1x64xf32>
    %947 = arith.addf %945, %946 : vector<1x64xf32>
    %948 = arith.mulf %336, %544 : vector<1x64xf32>
    %949 = arith.mulf %349, %557 : vector<1x64xf32>
    %950 = arith.addf %948, %949 : vector<1x64xf32>
    %cst_191 = arith.constant 0.707106769 : f32
    %951 = vector.broadcast %cst_191 : f32 to vector<1x64xf32>
    %952 = arith.mulf %950, %951 : vector<1x64xf32>
    %953 = arith.mulf %336, %596 : vector<1x64xf32>
    %954 = arith.mulf %349, %609 : vector<1x64xf32>
    %955 = arith.addf %953, %954 : vector<1x64xf32>
    %cst_192 = arith.constant 0.707106769 : f32
    %956 = vector.broadcast %cst_192 : f32 to vector<1x64xf32>
    %957 = arith.mulf %955, %956 : vector<1x64xf32>
    %958 = arith.mulf %336, %648 : vector<1x64xf32>
    %959 = arith.mulf %349, %661 : vector<1x64xf32>
    %960 = arith.addf %958, %959 : vector<1x64xf32>
    %cst_193 = arith.constant 0.707106769 : f32
    %961 = vector.broadcast %cst_193 : f32 to vector<1x64xf32>
    %962 = arith.mulf %960, %961 : vector<1x64xf32>
    %963 = arith.mulf %336, %700 : vector<1x64xf32>
    %964 = arith.mulf %349, %713 : vector<1x64xf32>
    %965 = arith.addf %963, %964 : vector<1x64xf32>
    %cst_194 = arith.constant 0.707106769 : f32
    %966 = vector.broadcast %cst_194 : f32 to vector<1x64xf32>
    %967 = arith.mulf %965, %966 : vector<1x64xf32>
    %968 = arith.maximumf %952, %957 : vector<1x64xf32>
    %969 = arith.maximumf %968, %962 : vector<1x64xf32>
    %970 = arith.maximumf %969, %967 : vector<1x64xf32>
    %971 = arith.subf %952, %970 : vector<1x64xf32>
    %972 = math.exp %971 : vector<1x64xf32>
    %973 = arith.subf %957, %970 : vector<1x64xf32>
    %974 = math.exp %973 : vector<1x64xf32>
    %975 = arith.subf %962, %970 : vector<1x64xf32>
    %976 = math.exp %975 : vector<1x64xf32>
    %977 = arith.subf %967, %970 : vector<1x64xf32>
    %978 = math.exp %977 : vector<1x64xf32>
    %979 = arith.addf %972, %974 : vector<1x64xf32>
    %980 = arith.addf %979, %976 : vector<1x64xf32>
    %981 = arith.addf %980, %978 : vector<1x64xf32>
    %982 = tpu.reciprocal %981 {approx = true} : vector<1x64xf32> -> vector<1x64xf32>
    %983 = arith.mulf %972, %752 : vector<1x64xf32>
    %984 = arith.mulf %974, %804 : vector<1x64xf32>
    %985 = arith.addf %983, %984 : vector<1x64xf32>
    %986 = arith.mulf %976, %856 : vector<1x64xf32>
    %987 = arith.addf %985, %986 : vector<1x64xf32>
    %988 = arith.mulf %978, %908 : vector<1x64xf32>
    %989 = arith.addf %987, %988 : vector<1x64xf32>
    %990 = arith.mulf %989, %982 : vector<1x64xf32>
    %991 = arith.mulf %972, %765 : vector<1x64xf32>
    %992 = arith.mulf %974, %817 : vector<1x64xf32>
    %993 = arith.addf %991, %992 : vector<1x64xf32>
    %994 = arith.mulf %976, %869 : vector<1x64xf32>
    %995 = arith.addf %993, %994 : vector<1x64xf32>
    %996 = arith.mulf %978, %921 : vector<1x64xf32>
    %997 = arith.addf %995, %996 : vector<1x64xf32>
    %998 = arith.mulf %997, %982 : vector<1x64xf32>
    %999 = arith.mulf %388, %544 : vector<1x64xf32>
    %1000 = arith.mulf %401, %557 : vector<1x64xf32>
    %1001 = arith.addf %999, %1000 : vector<1x64xf32>
    %cst_195 = arith.constant 0.707106769 : f32
    %1002 = vector.broadcast %cst_195 : f32 to vector<1x64xf32>
    %1003 = arith.mulf %1001, %1002 : vector<1x64xf32>
    %1004 = arith.mulf %388, %596 : vector<1x64xf32>
    %1005 = arith.mulf %401, %609 : vector<1x64xf32>
    %1006 = arith.addf %1004, %1005 : vector<1x64xf32>
    %cst_196 = arith.constant 0.707106769 : f32
    %1007 = vector.broadcast %cst_196 : f32 to vector<1x64xf32>
    %1008 = arith.mulf %1006, %1007 : vector<1x64xf32>
    %1009 = arith.mulf %388, %648 : vector<1x64xf32>
    %1010 = arith.mulf %401, %661 : vector<1x64xf32>
    %1011 = arith.addf %1009, %1010 : vector<1x64xf32>
    %cst_197 = arith.constant 0.707106769 : f32
    %1012 = vector.broadcast %cst_197 : f32 to vector<1x64xf32>
    %1013 = arith.mulf %1011, %1012 : vector<1x64xf32>
    %1014 = arith.mulf %388, %700 : vector<1x64xf32>
    %1015 = arith.mulf %401, %713 : vector<1x64xf32>
    %1016 = arith.addf %1014, %1015 : vector<1x64xf32>
    %cst_198 = arith.constant 0.707106769 : f32
    %1017 = vector.broadcast %cst_198 : f32 to vector<1x64xf32>
    %1018 = arith.mulf %1016, %1017 : vector<1x64xf32>
    %1019 = arith.maximumf %1003, %1008 : vector<1x64xf32>
    %1020 = arith.maximumf %1019, %1013 : vector<1x64xf32>
    %1021 = arith.maximumf %1020, %1018 : vector<1x64xf32>
    %1022 = arith.subf %1003, %1021 : vector<1x64xf32>
    %1023 = math.exp %1022 : vector<1x64xf32>
    %1024 = arith.subf %1008, %1021 : vector<1x64xf32>
    %1025 = math.exp %1024 : vector<1x64xf32>
    %1026 = arith.subf %1013, %1021 : vector<1x64xf32>
    %1027 = math.exp %1026 : vector<1x64xf32>
    %1028 = arith.subf %1018, %1021 : vector<1x64xf32>
    %1029 = math.exp %1028 : vector<1x64xf32>
    %1030 = arith.addf %1023, %1025 : vector<1x64xf32>
    %1031 = arith.addf %1030, %1027 : vector<1x64xf32>
    %1032 = arith.addf %1031, %1029 : vector<1x64xf32>
    %1033 = tpu.reciprocal %1032 {approx = true} : vector<1x64xf32> -> vector<1x64xf32>
    %1034 = arith.mulf %1023, %752 : vector<1x64xf32>
    %1035 = arith.mulf %1025, %804 : vector<1x64xf32>
    %1036 = arith.addf %1034, %1035 : vector<1x64xf32>
    %1037 = arith.mulf %1027, %856 : vector<1x64xf32>
    %1038 = arith.addf %1036, %1037 : vector<1x64xf32>
    %1039 = arith.mulf %1029, %908 : vector<1x64xf32>
    %1040 = arith.addf %1038, %1039 : vector<1x64xf32>
    %1041 = arith.mulf %1040, %1033 : vector<1x64xf32>
    %1042 = arith.mulf %1023, %765 : vector<1x64xf32>
    %1043 = arith.mulf %1025, %817 : vector<1x64xf32>
    %1044 = arith.addf %1042, %1043 : vector<1x64xf32>
    %1045 = arith.mulf %1027, %869 : vector<1x64xf32>
    %1046 = arith.addf %1044, %1045 : vector<1x64xf32>
    %1047 = arith.mulf %1029, %921 : vector<1x64xf32>
    %1048 = arith.addf %1046, %1047 : vector<1x64xf32>
    %1049 = arith.mulf %1048, %1033 : vector<1x64xf32>
    %1050 = arith.mulf %440, %544 : vector<1x64xf32>
    %1051 = arith.mulf %453, %557 : vector<1x64xf32>
    %1052 = arith.addf %1050, %1051 : vector<1x64xf32>
    %cst_199 = arith.constant 0.707106769 : f32
    %1053 = vector.broadcast %cst_199 : f32 to vector<1x64xf32>
    %1054 = arith.mulf %1052, %1053 : vector<1x64xf32>
    %1055 = arith.mulf %440, %596 : vector<1x64xf32>
    %1056 = arith.mulf %453, %609 : vector<1x64xf32>
    %1057 = arith.addf %1055, %1056 : vector<1x64xf32>
    %cst_200 = arith.constant 0.707106769 : f32
    %1058 = vector.broadcast %cst_200 : f32 to vector<1x64xf32>
    %1059 = arith.mulf %1057, %1058 : vector<1x64xf32>
    %1060 = arith.mulf %440, %648 : vector<1x64xf32>
    %1061 = arith.mulf %453, %661 : vector<1x64xf32>
    %1062 = arith.addf %1060, %1061 : vector<1x64xf32>
    %cst_201 = arith.constant 0.707106769 : f32
    %1063 = vector.broadcast %cst_201 : f32 to vector<1x64xf32>
    %1064 = arith.mulf %1062, %1063 : vector<1x64xf32>
    %1065 = arith.mulf %440, %700 : vector<1x64xf32>
    %1066 = arith.mulf %453, %713 : vector<1x64xf32>
    %1067 = arith.addf %1065, %1066 : vector<1x64xf32>
    %cst_202 = arith.constant 0.707106769 : f32
    %1068 = vector.broadcast %cst_202 : f32 to vector<1x64xf32>
    %1069 = arith.mulf %1067, %1068 : vector<1x64xf32>
    %1070 = arith.maximumf %1054, %1059 : vector<1x64xf32>
    %1071 = arith.maximumf %1070, %1064 : vector<1x64xf32>
    %1072 = arith.maximumf %1071, %1069 : vector<1x64xf32>
    %1073 = arith.subf %1054, %1072 : vector<1x64xf32>
    %1074 = math.exp %1073 : vector<1x64xf32>
    %1075 = arith.subf %1059, %1072 : vector<1x64xf32>
    %1076 = math.exp %1075 : vector<1x64xf32>
    %1077 = arith.subf %1064, %1072 : vector<1x64xf32>
    %1078 = math.exp %1077 : vector<1x64xf32>
    %1079 = arith.subf %1069, %1072 : vector<1x64xf32>
    %1080 = math.exp %1079 : vector<1x64xf32>
    %1081 = arith.addf %1074, %1076 : vector<1x64xf32>
    %1082 = arith.addf %1081, %1078 : vector<1x64xf32>
    %1083 = arith.addf %1082, %1080 : vector<1x64xf32>
    %1084 = tpu.reciprocal %1083 {approx = true} : vector<1x64xf32> -> vector<1x64xf32>
    %1085 = arith.mulf %1074, %752 : vector<1x64xf32>
    %1086 = arith.mulf %1076, %804 : vector<1x64xf32>
    %1087 = arith.addf %1085, %1086 : vector<1x64xf32>
    %1088 = arith.mulf %1078, %856 : vector<1x64xf32>
    %1089 = arith.addf %1087, %1088 : vector<1x64xf32>
    %1090 = arith.mulf %1080, %908 : vector<1x64xf32>
    %1091 = arith.addf %1089, %1090 : vector<1x64xf32>
    %1092 = arith.mulf %1091, %1084 : vector<1x64xf32>
    %1093 = arith.mulf %1074, %765 : vector<1x64xf32>
    %1094 = arith.mulf %1076, %817 : vector<1x64xf32>
    %1095 = arith.addf %1093, %1094 : vector<1x64xf32>
    %1096 = arith.mulf %1078, %869 : vector<1x64xf32>
    %1097 = arith.addf %1095, %1096 : vector<1x64xf32>
    %1098 = arith.mulf %1080, %921 : vector<1x64xf32>
    %1099 = arith.addf %1097, %1098 : vector<1x64xf32>
    %1100 = arith.mulf %1099, %1084 : vector<1x64xf32>
    %1101 = arith.mulf %492, %544 : vector<1x64xf32>
    %1102 = arith.mulf %505, %557 : vector<1x64xf32>
    %1103 = arith.addf %1101, %1102 : vector<1x64xf32>
    %cst_203 = arith.constant 0.707106769 : f32
    %1104 = vector.broadcast %cst_203 : f32 to vector<1x64xf32>
    %1105 = arith.mulf %1103, %1104 : vector<1x64xf32>
    %1106 = arith.mulf %492, %596 : vector<1x64xf32>
    %1107 = arith.mulf %505, %609 : vector<1x64xf32>
    %1108 = arith.addf %1106, %1107 : vector<1x64xf32>
    %cst_204 = arith.constant 0.707106769 : f32
    %1109 = vector.broadcast %cst_204 : f32 to vector<1x64xf32>
    %1110 = arith.mulf %1108, %1109 : vector<1x64xf32>
    %1111 = arith.mulf %492, %648 : vector<1x64xf32>
    %1112 = arith.mulf %505, %661 : vector<1x64xf32>
    %1113 = arith.addf %1111, %1112 : vector<1x64xf32>
    %cst_205 = arith.constant 0.707106769 : f32
    %1114 = vector.broadcast %cst_205 : f32 to vector<1x64xf32>
    %1115 = arith.mulf %1113, %1114 : vector<1x64xf32>
    %1116 = arith.mulf %492, %700 : vector<1x64xf32>
    %1117 = arith.mulf %505, %713 : vector<1x64xf32>
    %1118 = arith.addf %1116, %1117 : vector<1x64xf32>
    %cst_206 = arith.constant 0.707106769 : f32
    %1119 = vector.broadcast %cst_206 : f32 to vector<1x64xf32>
    %1120 = arith.mulf %1118, %1119 : vector<1x64xf32>
    %1121 = arith.maximumf %1105, %1110 : vector<1x64xf32>
    %1122 = arith.maximumf %1121, %1115 : vector<1x64xf32>
    %1123 = arith.maximumf %1122, %1120 : vector<1x64xf32>
    %1124 = arith.subf %1105, %1123 : vector<1x64xf32>
    %1125 = math.exp %1124 : vector<1x64xf32>
    %1126 = arith.subf %1110, %1123 : vector<1x64xf32>
    %1127 = math.exp %1126 : vector<1x64xf32>
    %1128 = arith.subf %1115, %1123 : vector<1x64xf32>
    %1129 = math.exp %1128 : vector<1x64xf32>
    %1130 = arith.subf %1120, %1123 : vector<1x64xf32>
    %1131 = math.exp %1130 : vector<1x64xf32>
    %1132 = arith.addf %1125, %1127 : vector<1x64xf32>
    %1133 = arith.addf %1132, %1129 : vector<1x64xf32>
    %1134 = arith.addf %1133, %1131 : vector<1x64xf32>
    %1135 = tpu.reciprocal %1134 {approx = true} : vector<1x64xf32> -> vector<1x64xf32>
    %1136 = arith.mulf %1125, %752 : vector<1x64xf32>
    %1137 = arith.mulf %1127, %804 : vector<1x64xf32>
    %1138 = arith.addf %1136, %1137 : vector<1x64xf32>
    %1139 = arith.mulf %1129, %856 : vector<1x64xf32>
    %1140 = arith.addf %1138, %1139 : vector<1x64xf32>
    %1141 = arith.mulf %1131, %908 : vector<1x64xf32>
    %1142 = arith.addf %1140, %1141 : vector<1x64xf32>
    %1143 = arith.mulf %1142, %1135 : vector<1x64xf32>
    %1144 = arith.mulf %1125, %765 : vector<1x64xf32>
    %1145 = arith.mulf %1127, %817 : vector<1x64xf32>
    %1146 = arith.addf %1144, %1145 : vector<1x64xf32>
    %1147 = arith.mulf %1129, %869 : vector<1x64xf32>
    %1148 = arith.addf %1146, %1147 : vector<1x64xf32>
    %1149 = arith.mulf %1131, %921 : vector<1x64xf32>
    %1150 = arith.addf %1148, %1149 : vector<1x64xf32>
    %1151 = arith.mulf %1150, %1135 : vector<1x64xf32>
    %1152 = arith.mulf %362, %570 : vector<1x64xf32>
    %1153 = arith.mulf %375, %583 : vector<1x64xf32>
    %1154 = arith.addf %1152, %1153 : vector<1x64xf32>
    %cst_207 = arith.constant 0.707106769 : f32
    %1155 = vector.broadcast %cst_207 : f32 to vector<1x64xf32>
    %1156 = arith.mulf %1154, %1155 : vector<1x64xf32>
    %1157 = arith.mulf %362, %622 : vector<1x64xf32>
    %1158 = arith.mulf %375, %635 : vector<1x64xf32>
    %1159 = arith.addf %1157, %1158 : vector<1x64xf32>
    %cst_208 = arith.constant 0.707106769 : f32
    %1160 = vector.broadcast %cst_208 : f32 to vector<1x64xf32>
    %1161 = arith.mulf %1159, %1160 : vector<1x64xf32>
    %1162 = arith.mulf %362, %674 : vector<1x64xf32>
    %1163 = arith.mulf %375, %687 : vector<1x64xf32>
    %1164 = arith.addf %1162, %1163 : vector<1x64xf32>
    %cst_209 = arith.constant 0.707106769 : f32
    %1165 = vector.broadcast %cst_209 : f32 to vector<1x64xf32>
    %1166 = arith.mulf %1164, %1165 : vector<1x64xf32>
    %1167 = arith.mulf %362, %726 : vector<1x64xf32>
    %1168 = arith.mulf %375, %739 : vector<1x64xf32>
    %1169 = arith.addf %1167, %1168 : vector<1x64xf32>
    %cst_210 = arith.constant 0.707106769 : f32
    %1170 = vector.broadcast %cst_210 : f32 to vector<1x64xf32>
    %1171 = arith.mulf %1169, %1170 : vector<1x64xf32>
    %1172 = arith.maximumf %1156, %1161 : vector<1x64xf32>
    %1173 = arith.maximumf %1172, %1166 : vector<1x64xf32>
    %1174 = arith.maximumf %1173, %1171 : vector<1x64xf32>
    %1175 = arith.subf %1156, %1174 : vector<1x64xf32>
    %1176 = math.exp %1175 : vector<1x64xf32>
    %1177 = arith.subf %1161, %1174 : vector<1x64xf32>
    %1178 = math.exp %1177 : vector<1x64xf32>
    %1179 = arith.subf %1166, %1174 : vector<1x64xf32>
    %1180 = math.exp %1179 : vector<1x64xf32>
    %1181 = arith.subf %1171, %1174 : vector<1x64xf32>
    %1182 = math.exp %1181 : vector<1x64xf32>
    %1183 = arith.addf %1176, %1178 : vector<1x64xf32>
    %1184 = arith.addf %1183, %1180 : vector<1x64xf32>
    %1185 = arith.addf %1184, %1182 : vector<1x64xf32>
    %1186 = tpu.reciprocal %1185 {approx = true} : vector<1x64xf32> -> vector<1x64xf32>
    %1187 = arith.mulf %1176, %778 : vector<1x64xf32>
    %1188 = arith.mulf %1178, %830 : vector<1x64xf32>
    %1189 = arith.addf %1187, %1188 : vector<1x64xf32>
    %1190 = arith.mulf %1180, %882 : vector<1x64xf32>
    %1191 = arith.addf %1189, %1190 : vector<1x64xf32>
    %1192 = arith.mulf %1182, %934 : vector<1x64xf32>
    %1193 = arith.addf %1191, %1192 : vector<1x64xf32>
    %1194 = arith.mulf %1193, %1186 : vector<1x64xf32>
    %1195 = arith.mulf %1176, %791 : vector<1x64xf32>
    %1196 = arith.mulf %1178, %843 : vector<1x64xf32>
    %1197 = arith.addf %1195, %1196 : vector<1x64xf32>
    %1198 = arith.mulf %1180, %895 : vector<1x64xf32>
    %1199 = arith.addf %1197, %1198 : vector<1x64xf32>
    %1200 = arith.mulf %1182, %947 : vector<1x64xf32>
    %1201 = arith.addf %1199, %1200 : vector<1x64xf32>
    %1202 = arith.mulf %1201, %1186 : vector<1x64xf32>
    %1203 = arith.mulf %414, %570 : vector<1x64xf32>
    %1204 = arith.mulf %427, %583 : vector<1x64xf32>
    %1205 = arith.addf %1203, %1204 : vector<1x64xf32>
    %cst_211 = arith.constant 0.707106769 : f32
    %1206 = vector.broadcast %cst_211 : f32 to vector<1x64xf32>
    %1207 = arith.mulf %1205, %1206 : vector<1x64xf32>
    %1208 = arith.mulf %414, %622 : vector<1x64xf32>
    %1209 = arith.mulf %427, %635 : vector<1x64xf32>
    %1210 = arith.addf %1208, %1209 : vector<1x64xf32>
    %cst_212 = arith.constant 0.707106769 : f32
    %1211 = vector.broadcast %cst_212 : f32 to vector<1x64xf32>
    %1212 = arith.mulf %1210, %1211 : vector<1x64xf32>
    %1213 = arith.mulf %414, %674 : vector<1x64xf32>
    %1214 = arith.mulf %427, %687 : vector<1x64xf32>
    %1215 = arith.addf %1213, %1214 : vector<1x64xf32>
    %cst_213 = arith.constant 0.707106769 : f32
    %1216 = vector.broadcast %cst_213 : f32 to vector<1x64xf32>
    %1217 = arith.mulf %1215, %1216 : vector<1x64xf32>
    %1218 = arith.mulf %414, %726 : vector<1x64xf32>
    %1219 = arith.mulf %427, %739 : vector<1x64xf32>
    %1220 = arith.addf %1218, %1219 : vector<1x64xf32>
    %cst_214 = arith.constant 0.707106769 : f32
    %1221 = vector.broadcast %cst_214 : f32 to vector<1x64xf32>
    %1222 = arith.mulf %1220, %1221 : vector<1x64xf32>
    %1223 = arith.maximumf %1207, %1212 : vector<1x64xf32>
    %1224 = arith.maximumf %1223, %1217 : vector<1x64xf32>
    %1225 = arith.maximumf %1224, %1222 : vector<1x64xf32>
    %1226 = arith.subf %1207, %1225 : vector<1x64xf32>
    %1227 = math.exp %1226 : vector<1x64xf32>
    %1228 = arith.subf %1212, %1225 : vector<1x64xf32>
    %1229 = math.exp %1228 : vector<1x64xf32>
    %1230 = arith.subf %1217, %1225 : vector<1x64xf32>
    %1231 = math.exp %1230 : vector<1x64xf32>
    %1232 = arith.subf %1222, %1225 : vector<1x64xf32>
    %1233 = math.exp %1232 : vector<1x64xf32>
    %1234 = arith.addf %1227, %1229 : vector<1x64xf32>
    %1235 = arith.addf %1234, %1231 : vector<1x64xf32>
    %1236 = arith.addf %1235, %1233 : vector<1x64xf32>
    %1237 = tpu.reciprocal %1236 {approx = true} : vector<1x64xf32> -> vector<1x64xf32>
    %1238 = arith.mulf %1227, %778 : vector<1x64xf32>
    %1239 = arith.mulf %1229, %830 : vector<1x64xf32>
    %1240 = arith.addf %1238, %1239 : vector<1x64xf32>
    %1241 = arith.mulf %1231, %882 : vector<1x64xf32>
    %1242 = arith.addf %1240, %1241 : vector<1x64xf32>
    %1243 = arith.mulf %1233, %934 : vector<1x64xf32>
    %1244 = arith.addf %1242, %1243 : vector<1x64xf32>
    %1245 = arith.mulf %1244, %1237 : vector<1x64xf32>
    %1246 = arith.mulf %1227, %791 : vector<1x64xf32>
    %1247 = arith.mulf %1229, %843 : vector<1x64xf32>
    %1248 = arith.addf %1246, %1247 : vector<1x64xf32>
    %1249 = arith.mulf %1231, %895 : vector<1x64xf32>
    %1250 = arith.addf %1248, %1249 : vector<1x64xf32>
    %1251 = arith.mulf %1233, %947 : vector<1x64xf32>
    %1252 = arith.addf %1250, %1251 : vector<1x64xf32>
    %1253 = arith.mulf %1252, %1237 : vector<1x64xf32>
    %1254 = arith.mulf %466, %570 : vector<1x64xf32>
    %1255 = arith.mulf %479, %583 : vector<1x64xf32>
    %1256 = arith.addf %1254, %1255 : vector<1x64xf32>
    %cst_215 = arith.constant 0.707106769 : f32
    %1257 = vector.broadcast %cst_215 : f32 to vector<1x64xf32>
    %1258 = arith.mulf %1256, %1257 : vector<1x64xf32>
    %1259 = arith.mulf %466, %622 : vector<1x64xf32>
    %1260 = arith.mulf %479, %635 : vector<1x64xf32>
    %1261 = arith.addf %1259, %1260 : vector<1x64xf32>
    %cst_216 = arith.constant 0.707106769 : f32
    %1262 = vector.broadcast %cst_216 : f32 to vector<1x64xf32>
    %1263 = arith.mulf %1261, %1262 : vector<1x64xf32>
    %1264 = arith.mulf %466, %674 : vector<1x64xf32>
    %1265 = arith.mulf %479, %687 : vector<1x64xf32>
    %1266 = arith.addf %1264, %1265 : vector<1x64xf32>
    %cst_217 = arith.constant 0.707106769 : f32
    %1267 = vector.broadcast %cst_217 : f32 to vector<1x64xf32>
    %1268 = arith.mulf %1266, %1267 : vector<1x64xf32>
    %1269 = arith.mulf %466, %726 : vector<1x64xf32>
    %1270 = arith.mulf %479, %739 : vector<1x64xf32>
    %1271 = arith.addf %1269, %1270 : vector<1x64xf32>
    %cst_218 = arith.constant 0.707106769 : f32
    %1272 = vector.broadcast %cst_218 : f32 to vector<1x64xf32>
    %1273 = arith.mulf %1271, %1272 : vector<1x64xf32>
    %1274 = arith.maximumf %1258, %1263 : vector<1x64xf32>
    %1275 = arith.maximumf %1274, %1268 : vector<1x64xf32>
    %1276 = arith.maximumf %1275, %1273 : vector<1x64xf32>
    %1277 = arith.subf %1258, %1276 : vector<1x64xf32>
    %1278 = math.exp %1277 : vector<1x64xf32>
    %1279 = arith.subf %1263, %1276 : vector<1x64xf32>
    %1280 = math.exp %1279 : vector<1x64xf32>
    %1281 = arith.subf %1268, %1276 : vector<1x64xf32>
    %1282 = math.exp %1281 : vector<1x64xf32>
    %1283 = arith.subf %1273, %1276 : vector<1x64xf32>
    %1284 = math.exp %1283 : vector<1x64xf32>
    %1285 = arith.addf %1278, %1280 : vector<1x64xf32>
    %1286 = arith.addf %1285, %1282 : vector<1x64xf32>
    %1287 = arith.addf %1286, %1284 : vector<1x64xf32>
    %1288 = tpu.reciprocal %1287 {approx = true} : vector<1x64xf32> -> vector<1x64xf32>
    %1289 = arith.mulf %1278, %778 : vector<1x64xf32>
    %1290 = arith.mulf %1280, %830 : vector<1x64xf32>
    %1291 = arith.addf %1289, %1290 : vector<1x64xf32>
    %1292 = arith.mulf %1282, %882 : vector<1x64xf32>
    %1293 = arith.addf %1291, %1292 : vector<1x64xf32>
    %1294 = arith.mulf %1284, %934 : vector<1x64xf32>
    %1295 = arith.addf %1293, %1294 : vector<1x64xf32>
    %1296 = arith.mulf %1295, %1288 : vector<1x64xf32>
    %1297 = arith.mulf %1278, %791 : vector<1x64xf32>
    %1298 = arith.mulf %1280, %843 : vector<1x64xf32>
    %1299 = arith.addf %1297, %1298 : vector<1x64xf32>
    %1300 = arith.mulf %1282, %895 : vector<1x64xf32>
    %1301 = arith.addf %1299, %1300 : vector<1x64xf32>
    %1302 = arith.mulf %1284, %947 : vector<1x64xf32>
    %1303 = arith.addf %1301, %1302 : vector<1x64xf32>
    %1304 = arith.mulf %1303, %1288 : vector<1x64xf32>
    %1305 = arith.mulf %518, %570 : vector<1x64xf32>
    %1306 = arith.mulf %531, %583 : vector<1x64xf32>
    %1307 = arith.addf %1305, %1306 : vector<1x64xf32>
    %cst_219 = arith.constant 0.707106769 : f32
    %1308 = vector.broadcast %cst_219 : f32 to vector<1x64xf32>
    %1309 = arith.mulf %1307, %1308 : vector<1x64xf32>
    %1310 = arith.mulf %518, %622 : vector<1x64xf32>
    %1311 = arith.mulf %531, %635 : vector<1x64xf32>
    %1312 = arith.addf %1310, %1311 : vector<1x64xf32>
    %cst_220 = arith.constant 0.707106769 : f32
    %1313 = vector.broadcast %cst_220 : f32 to vector<1x64xf32>
    %1314 = arith.mulf %1312, %1313 : vector<1x64xf32>
    %1315 = arith.mulf %518, %674 : vector<1x64xf32>
    %1316 = arith.mulf %531, %687 : vector<1x64xf32>
    %1317 = arith.addf %1315, %1316 : vector<1x64xf32>
    %cst_221 = arith.constant 0.707106769 : f32
    %1318 = vector.broadcast %cst_221 : f32 to vector<1x64xf32>
    %1319 = arith.mulf %1317, %1318 : vector<1x64xf32>
    %1320 = arith.mulf %518, %726 : vector<1x64xf32>
    %1321 = arith.mulf %531, %739 : vector<1x64xf32>
    %1322 = arith.addf %1320, %1321 : vector<1x64xf32>
    %cst_222 = arith.constant 0.707106769 : f32
    %1323 = vector.broadcast %cst_222 : f32 to vector<1x64xf32>
    %1324 = arith.mulf %1322, %1323 : vector<1x64xf32>
    %1325 = arith.maximumf %1309, %1314 : vector<1x64xf32>
    %1326 = arith.maximumf %1325, %1319 : vector<1x64xf32>
    %1327 = arith.maximumf %1326, %1324 : vector<1x64xf32>
    %1328 = arith.subf %1309, %1327 : vector<1x64xf32>
    %1329 = math.exp %1328 : vector<1x64xf32>
    %1330 = arith.subf %1314, %1327 : vector<1x64xf32>
    %1331 = math.exp %1330 : vector<1x64xf32>
    %1332 = arith.subf %1319, %1327 : vector<1x64xf32>
    %1333 = math.exp %1332 : vector<1x64xf32>
    %1334 = arith.subf %1324, %1327 : vector<1x64xf32>
    %1335 = math.exp %1334 : vector<1x64xf32>
    %1336 = arith.addf %1329, %1331 : vector<1x64xf32>
    %1337 = arith.addf %1336, %1333 : vector<1x64xf32>
    %1338 = arith.addf %1337, %1335 : vector<1x64xf32>
    %1339 = tpu.reciprocal %1338 {approx = true} : vector<1x64xf32> -> vector<1x64xf32>
    %1340 = arith.mulf %1329, %778 : vector<1x64xf32>
    %1341 = arith.mulf %1331, %830 : vector<1x64xf32>
    %1342 = arith.addf %1340, %1341 : vector<1x64xf32>
    %1343 = arith.mulf %1333, %882 : vector<1x64xf32>
    %1344 = arith.addf %1342, %1343 : vector<1x64xf32>
    %1345 = arith.mulf %1335, %934 : vector<1x64xf32>
    %1346 = arith.addf %1344, %1345 : vector<1x64xf32>
    %1347 = arith.mulf %1346, %1339 : vector<1x64xf32>
    %1348 = arith.mulf %1329, %791 : vector<1x64xf32>
    %1349 = arith.mulf %1331, %843 : vector<1x64xf32>
    %1350 = arith.addf %1348, %1349 : vector<1x64xf32>
    %1351 = arith.mulf %1333, %895 : vector<1x64xf32>
    %1352 = arith.addf %1350, %1351 : vector<1x64xf32>
    %1353 = arith.mulf %1335, %947 : vector<1x64xf32>
    %1354 = arith.addf %1352, %1353 : vector<1x64xf32>
    %1355 = arith.mulf %1354, %1339 : vector<1x64xf32>
    %1356 = vector.broadcast %292 : f32 to vector<1x64xf32>
    %1357 = arith.mulf %990, %1356 : vector<1x64xf32>
    %1358 = vector.broadcast %296 : f32 to vector<1x64xf32>
    %1359 = arith.mulf %998, %1358 : vector<1x64xf32>
    %1360 = arith.addf %1357, %1359 : vector<1x64xf32>
    %1361 = vector.broadcast %300 : f32 to vector<1x64xf32>
    %1362 = arith.mulf %1194, %1361 : vector<1x64xf32>
    %1363 = arith.addf %1360, %1362 : vector<1x64xf32>
    %1364 = vector.broadcast %304 : f32 to vector<1x64xf32>
    %1365 = arith.mulf %1202, %1364 : vector<1x64xf32>
    %1366 = arith.addf %1363, %1365 : vector<1x64xf32>
    %1367 = arith.addf %228, %1366 : vector<1x64xf32>
    %1368 = vector.broadcast %320 : f32 to vector<1x64xf32>
    %1369 = arith.addf %1367, %1368 : vector<1x64xf32>
    %1370 = vector.broadcast %293 : f32 to vector<1x64xf32>
    %1371 = arith.mulf %990, %1370 : vector<1x64xf32>
    %1372 = vector.broadcast %297 : f32 to vector<1x64xf32>
    %1373 = arith.mulf %998, %1372 : vector<1x64xf32>
    %1374 = arith.addf %1371, %1373 : vector<1x64xf32>
    %1375 = vector.broadcast %301 : f32 to vector<1x64xf32>
    %1376 = arith.mulf %1194, %1375 : vector<1x64xf32>
    %1377 = arith.addf %1374, %1376 : vector<1x64xf32>
    %1378 = vector.broadcast %305 : f32 to vector<1x64xf32>
    %1379 = arith.mulf %1202, %1378 : vector<1x64xf32>
    %1380 = arith.addf %1377, %1379 : vector<1x64xf32>
    %1381 = arith.addf %229, %1380 : vector<1x64xf32>
    %1382 = vector.broadcast %321 : f32 to vector<1x64xf32>
    %1383 = arith.addf %1381, %1382 : vector<1x64xf32>
    %1384 = vector.broadcast %294 : f32 to vector<1x64xf32>
    %1385 = arith.mulf %990, %1384 : vector<1x64xf32>
    %1386 = vector.broadcast %298 : f32 to vector<1x64xf32>
    %1387 = arith.mulf %998, %1386 : vector<1x64xf32>
    %1388 = arith.addf %1385, %1387 : vector<1x64xf32>
    %1389 = vector.broadcast %302 : f32 to vector<1x64xf32>
    %1390 = arith.mulf %1194, %1389 : vector<1x64xf32>
    %1391 = arith.addf %1388, %1390 : vector<1x64xf32>
    %1392 = vector.broadcast %306 : f32 to vector<1x64xf32>
    %1393 = arith.mulf %1202, %1392 : vector<1x64xf32>
    %1394 = arith.addf %1391, %1393 : vector<1x64xf32>
    %1395 = arith.addf %230, %1394 : vector<1x64xf32>
    %1396 = vector.broadcast %322 : f32 to vector<1x64xf32>
    %1397 = arith.addf %1395, %1396 : vector<1x64xf32>
    %1398 = vector.broadcast %295 : f32 to vector<1x64xf32>
    %1399 = arith.mulf %990, %1398 : vector<1x64xf32>
    %1400 = vector.broadcast %299 : f32 to vector<1x64xf32>
    %1401 = arith.mulf %998, %1400 : vector<1x64xf32>
    %1402 = arith.addf %1399, %1401 : vector<1x64xf32>
    %1403 = vector.broadcast %303 : f32 to vector<1x64xf32>
    %1404 = arith.mulf %1194, %1403 : vector<1x64xf32>
    %1405 = arith.addf %1402, %1404 : vector<1x64xf32>
    %1406 = vector.broadcast %307 : f32 to vector<1x64xf32>
    %1407 = arith.mulf %1202, %1406 : vector<1x64xf32>
    %1408 = arith.addf %1405, %1407 : vector<1x64xf32>
    %1409 = arith.addf %231, %1408 : vector<1x64xf32>
    %1410 = vector.broadcast %323 : f32 to vector<1x64xf32>
    %1411 = arith.addf %1409, %1410 : vector<1x64xf32>
    %1412 = vector.broadcast %292 : f32 to vector<1x64xf32>
    %1413 = arith.mulf %1041, %1412 : vector<1x64xf32>
    %1414 = vector.broadcast %296 : f32 to vector<1x64xf32>
    %1415 = arith.mulf %1049, %1414 : vector<1x64xf32>
    %1416 = arith.addf %1413, %1415 : vector<1x64xf32>
    %1417 = vector.broadcast %300 : f32 to vector<1x64xf32>
    %1418 = arith.mulf %1245, %1417 : vector<1x64xf32>
    %1419 = arith.addf %1416, %1418 : vector<1x64xf32>
    %1420 = vector.broadcast %304 : f32 to vector<1x64xf32>
    %1421 = arith.mulf %1253, %1420 : vector<1x64xf32>
    %1422 = arith.addf %1419, %1421 : vector<1x64xf32>
    %1423 = arith.addf %232, %1422 : vector<1x64xf32>
    %1424 = vector.broadcast %320 : f32 to vector<1x64xf32>
    %1425 = arith.addf %1423, %1424 : vector<1x64xf32>
    %1426 = vector.broadcast %293 : f32 to vector<1x64xf32>
    %1427 = arith.mulf %1041, %1426 : vector<1x64xf32>
    %1428 = vector.broadcast %297 : f32 to vector<1x64xf32>
    %1429 = arith.mulf %1049, %1428 : vector<1x64xf32>
    %1430 = arith.addf %1427, %1429 : vector<1x64xf32>
    %1431 = vector.broadcast %301 : f32 to vector<1x64xf32>
    %1432 = arith.mulf %1245, %1431 : vector<1x64xf32>
    %1433 = arith.addf %1430, %1432 : vector<1x64xf32>
    %1434 = vector.broadcast %305 : f32 to vector<1x64xf32>
    %1435 = arith.mulf %1253, %1434 : vector<1x64xf32>
    %1436 = arith.addf %1433, %1435 : vector<1x64xf32>
    %1437 = arith.addf %233, %1436 : vector<1x64xf32>
    %1438 = vector.broadcast %321 : f32 to vector<1x64xf32>
    %1439 = arith.addf %1437, %1438 : vector<1x64xf32>
    %1440 = vector.broadcast %294 : f32 to vector<1x64xf32>
    %1441 = arith.mulf %1041, %1440 : vector<1x64xf32>
    %1442 = vector.broadcast %298 : f32 to vector<1x64xf32>
    %1443 = arith.mulf %1049, %1442 : vector<1x64xf32>
    %1444 = arith.addf %1441, %1443 : vector<1x64xf32>
    %1445 = vector.broadcast %302 : f32 to vector<1x64xf32>
    %1446 = arith.mulf %1245, %1445 : vector<1x64xf32>
    %1447 = arith.addf %1444, %1446 : vector<1x64xf32>
    %1448 = vector.broadcast %306 : f32 to vector<1x64xf32>
    %1449 = arith.mulf %1253, %1448 : vector<1x64xf32>
    %1450 = arith.addf %1447, %1449 : vector<1x64xf32>
    %1451 = arith.addf %234, %1450 : vector<1x64xf32>
    %1452 = vector.broadcast %322 : f32 to vector<1x64xf32>
    %1453 = arith.addf %1451, %1452 : vector<1x64xf32>
    %1454 = vector.broadcast %295 : f32 to vector<1x64xf32>
    %1455 = arith.mulf %1041, %1454 : vector<1x64xf32>
    %1456 = vector.broadcast %299 : f32 to vector<1x64xf32>
    %1457 = arith.mulf %1049, %1456 : vector<1x64xf32>
    %1458 = arith.addf %1455, %1457 : vector<1x64xf32>
    %1459 = vector.broadcast %303 : f32 to vector<1x64xf32>
    %1460 = arith.mulf %1245, %1459 : vector<1x64xf32>
    %1461 = arith.addf %1458, %1460 : vector<1x64xf32>
    %1462 = vector.broadcast %307 : f32 to vector<1x64xf32>
    %1463 = arith.mulf %1253, %1462 : vector<1x64xf32>
    %1464 = arith.addf %1461, %1463 : vector<1x64xf32>
    %1465 = arith.addf %235, %1464 : vector<1x64xf32>
    %1466 = vector.broadcast %323 : f32 to vector<1x64xf32>
    %1467 = arith.addf %1465, %1466 : vector<1x64xf32>
    %1468 = vector.broadcast %292 : f32 to vector<1x64xf32>
    %1469 = arith.mulf %1092, %1468 : vector<1x64xf32>
    %1470 = vector.broadcast %296 : f32 to vector<1x64xf32>
    %1471 = arith.mulf %1100, %1470 : vector<1x64xf32>
    %1472 = arith.addf %1469, %1471 : vector<1x64xf32>
    %1473 = vector.broadcast %300 : f32 to vector<1x64xf32>
    %1474 = arith.mulf %1296, %1473 : vector<1x64xf32>
    %1475 = arith.addf %1472, %1474 : vector<1x64xf32>
    %1476 = vector.broadcast %304 : f32 to vector<1x64xf32>
    %1477 = arith.mulf %1304, %1476 : vector<1x64xf32>
    %1478 = arith.addf %1475, %1477 : vector<1x64xf32>
    %1479 = arith.addf %236, %1478 : vector<1x64xf32>
    %1480 = vector.broadcast %320 : f32 to vector<1x64xf32>
    %1481 = arith.addf %1479, %1480 : vector<1x64xf32>
    %1482 = vector.broadcast %293 : f32 to vector<1x64xf32>
    %1483 = arith.mulf %1092, %1482 : vector<1x64xf32>
    %1484 = vector.broadcast %297 : f32 to vector<1x64xf32>
    %1485 = arith.mulf %1100, %1484 : vector<1x64xf32>
    %1486 = arith.addf %1483, %1485 : vector<1x64xf32>
    %1487 = vector.broadcast %301 : f32 to vector<1x64xf32>
    %1488 = arith.mulf %1296, %1487 : vector<1x64xf32>
    %1489 = arith.addf %1486, %1488 : vector<1x64xf32>
    %1490 = vector.broadcast %305 : f32 to vector<1x64xf32>
    %1491 = arith.mulf %1304, %1490 : vector<1x64xf32>
    %1492 = arith.addf %1489, %1491 : vector<1x64xf32>
    %1493 = arith.addf %237, %1492 : vector<1x64xf32>
    %1494 = vector.broadcast %321 : f32 to vector<1x64xf32>
    %1495 = arith.addf %1493, %1494 : vector<1x64xf32>
    %1496 = vector.broadcast %294 : f32 to vector<1x64xf32>
    %1497 = arith.mulf %1092, %1496 : vector<1x64xf32>
    %1498 = vector.broadcast %298 : f32 to vector<1x64xf32>
    %1499 = arith.mulf %1100, %1498 : vector<1x64xf32>
    %1500 = arith.addf %1497, %1499 : vector<1x64xf32>
    %1501 = vector.broadcast %302 : f32 to vector<1x64xf32>
    %1502 = arith.mulf %1296, %1501 : vector<1x64xf32>
    %1503 = arith.addf %1500, %1502 : vector<1x64xf32>
    %1504 = vector.broadcast %306 : f32 to vector<1x64xf32>
    %1505 = arith.mulf %1304, %1504 : vector<1x64xf32>
    %1506 = arith.addf %1503, %1505 : vector<1x64xf32>
    %1507 = arith.addf %238, %1506 : vector<1x64xf32>
    %1508 = vector.broadcast %322 : f32 to vector<1x64xf32>
    %1509 = arith.addf %1507, %1508 : vector<1x64xf32>
    %1510 = vector.broadcast %295 : f32 to vector<1x64xf32>
    %1511 = arith.mulf %1092, %1510 : vector<1x64xf32>
    %1512 = vector.broadcast %299 : f32 to vector<1x64xf32>
    %1513 = arith.mulf %1100, %1512 : vector<1x64xf32>
    %1514 = arith.addf %1511, %1513 : vector<1x64xf32>
    %1515 = vector.broadcast %303 : f32 to vector<1x64xf32>
    %1516 = arith.mulf %1296, %1515 : vector<1x64xf32>
    %1517 = arith.addf %1514, %1516 : vector<1x64xf32>
    %1518 = vector.broadcast %307 : f32 to vector<1x64xf32>
    %1519 = arith.mulf %1304, %1518 : vector<1x64xf32>
    %1520 = arith.addf %1517, %1519 : vector<1x64xf32>
    %1521 = arith.addf %239, %1520 : vector<1x64xf32>
    %1522 = vector.broadcast %323 : f32 to vector<1x64xf32>
    %1523 = arith.addf %1521, %1522 : vector<1x64xf32>
    %1524 = vector.broadcast %292 : f32 to vector<1x64xf32>
    %1525 = arith.mulf %1143, %1524 : vector<1x64xf32>
    %1526 = vector.broadcast %296 : f32 to vector<1x64xf32>
    %1527 = arith.mulf %1151, %1526 : vector<1x64xf32>
    %1528 = arith.addf %1525, %1527 : vector<1x64xf32>
    %1529 = vector.broadcast %300 : f32 to vector<1x64xf32>
    %1530 = arith.mulf %1347, %1529 : vector<1x64xf32>
    %1531 = arith.addf %1528, %1530 : vector<1x64xf32>
    %1532 = vector.broadcast %304 : f32 to vector<1x64xf32>
    %1533 = arith.mulf %1355, %1532 : vector<1x64xf32>
    %1534 = arith.addf %1531, %1533 : vector<1x64xf32>
    %1535 = arith.addf %240, %1534 : vector<1x64xf32>
    %1536 = vector.broadcast %320 : f32 to vector<1x64xf32>
    %1537 = arith.addf %1535, %1536 : vector<1x64xf32>
    %1538 = vector.broadcast %293 : f32 to vector<1x64xf32>
    %1539 = arith.mulf %1143, %1538 : vector<1x64xf32>
    %1540 = vector.broadcast %297 : f32 to vector<1x64xf32>
    %1541 = arith.mulf %1151, %1540 : vector<1x64xf32>
    %1542 = arith.addf %1539, %1541 : vector<1x64xf32>
    %1543 = vector.broadcast %301 : f32 to vector<1x64xf32>
    %1544 = arith.mulf %1347, %1543 : vector<1x64xf32>
    %1545 = arith.addf %1542, %1544 : vector<1x64xf32>
    %1546 = vector.broadcast %305 : f32 to vector<1x64xf32>
    %1547 = arith.mulf %1355, %1546 : vector<1x64xf32>
    %1548 = arith.addf %1545, %1547 : vector<1x64xf32>
    %1549 = arith.addf %241, %1548 : vector<1x64xf32>
    %1550 = vector.broadcast %321 : f32 to vector<1x64xf32>
    %1551 = arith.addf %1549, %1550 : vector<1x64xf32>
    %1552 = vector.broadcast %294 : f32 to vector<1x64xf32>
    %1553 = arith.mulf %1143, %1552 : vector<1x64xf32>
    %1554 = vector.broadcast %298 : f32 to vector<1x64xf32>
    %1555 = arith.mulf %1151, %1554 : vector<1x64xf32>
    %1556 = arith.addf %1553, %1555 : vector<1x64xf32>
    %1557 = vector.broadcast %302 : f32 to vector<1x64xf32>
    %1558 = arith.mulf %1347, %1557 : vector<1x64xf32>
    %1559 = arith.addf %1556, %1558 : vector<1x64xf32>
    %1560 = vector.broadcast %306 : f32 to vector<1x64xf32>
    %1561 = arith.mulf %1355, %1560 : vector<1x64xf32>
    %1562 = arith.addf %1559, %1561 : vector<1x64xf32>
    %1563 = arith.addf %242, %1562 : vector<1x64xf32>
    %1564 = vector.broadcast %322 : f32 to vector<1x64xf32>
    %1565 = arith.addf %1563, %1564 : vector<1x64xf32>
    %1566 = vector.broadcast %295 : f32 to vector<1x64xf32>
    %1567 = arith.mulf %1143, %1566 : vector<1x64xf32>
    %1568 = vector.broadcast %299 : f32 to vector<1x64xf32>
    %1569 = arith.mulf %1151, %1568 : vector<1x64xf32>
    %1570 = arith.addf %1567, %1569 : vector<1x64xf32>
    %1571 = vector.broadcast %303 : f32 to vector<1x64xf32>
    %1572 = arith.mulf %1347, %1571 : vector<1x64xf32>
    %1573 = arith.addf %1570, %1572 : vector<1x64xf32>
    %1574 = vector.broadcast %307 : f32 to vector<1x64xf32>
    %1575 = arith.mulf %1355, %1574 : vector<1x64xf32>
    %1576 = arith.addf %1573, %1575 : vector<1x64xf32>
    %1577 = arith.addf %243, %1576 : vector<1x64xf32>
    %1578 = vector.broadcast %323 : f32 to vector<1x64xf32>
    %1579 = arith.addf %1577, %1578 : vector<1x64xf32>
    %1580 = tpu.concatenate %1369, %1383, %1397, %1411, %1425, %1439, %1453, %1467, %1481, %1495, %1509, %1523, %1537, %1551, %1565, %1579 in 0 : vector<1x64xf32>, vector<1x64xf32>, vector<1x64xf32>, vector<1x64xf32>, vector<1x64xf32>, vector<1x64xf32>, vector<1x64xf32>, vector<1x64xf32>, vector<1x64xf32>, vector<1x64xf32>, vector<1x64xf32>, vector<1x64xf32>, vector<1x64xf32>, vector<1x64xf32>, vector<1x64xf32>, vector<1x64xf32> -> vector<16x64xf32>
    %1581 = vector.shape_cast %1580 : vector<16x64xf32> to vector<1x16x64xf32>
    %c0_223 = arith.constant 0 : index
    %c0_224 = arith.constant 0 : index
    %c0_225 = arith.constant 0 : index
    %1582 = vector.load %arg10[%c0_223, %c0_224, %c0_225] : memref<1x16x64xf32, #tpu.memory_space<vmem>>, vector<1x16x64xf32>
    tpu.vector_store %arg10[%c0_223, %c0_224, %c0_225], %1581 {strides = array<i32>} : memref<1x16x64xf32, #tpu.memory_space<vmem>>, vector<1x16x64xf32>,
    return
  }
  func.func @transform_0(%arg0: i32) -> (i32, i32, i32, i32) {
    %c0_i32 = arith.constant 0 : i32
    %c0_i32_0 = arith.constant 0 : i32
    %c0_i32_1 = arith.constant 0 : i32
    %c0_i32_2 = arith.constant 0 : i32
    return %arg0, %c0_i32, %c0_i32_0, %c0_i32_1 : i32, i32, i32, i32
  }
  func.func @transform_1(%arg0: i32) -> (i32, i32, i32, i32) {
    %c0_i32 = arith.constant 0 : i32
    %c0_i32_0 = arith.constant 0 : i32
    %c0_i32_1 = arith.constant 0 : i32
    %c0_i32_2 = arith.constant 0 : i32
    return %arg0, %c0_i32, %c0_i32_0, %c0_i32_1 : i32, i32, i32, i32
  }
  func.func @transform_2(%arg0: i32) -> (i32, i32, i32) {
    %c0_i32 = arith.constant 0 : i32
    %c0_i32_0 = arith.constant 0 : i32
    %c0_i32_1 = arith.constant 0 : i32
    %c0_i32_2 = arith.constant 0 : i32
    return %c0_i32, %c0_i32_0, %c0_i32_1 : i32, i32, i32
  }
  func.func @transform_3(%arg0: i32) -> (i32, i32) {
    %c0_i32 = arith.constant 0 : i32
    %c0_i32_0 = arith.constant 0 : i32
    %c0_i32_1 = arith.constant 0 : i32
    return %c0_i32, %c0_i32_0 : i32, i32
  }
  func.func @transform_4(%arg0: i32) -> (i32, i32, i32) {
    %c0_i32 = arith.constant 0 : i32
    %c0_i32_0 = arith.constant 0 : i32
    %c0_i32_1 = arith.constant 0 : i32
    %c0_i32_2 = arith.constant 0 : i32
    return %c0_i32, %c0_i32_0, %c0_i32_1 : i32, i32, i32
  }
  func.func @transform_5(%arg0: i32) -> (i32, i32) {
    %c0_i32 = arith.constant 0 : i32
    %c0_i32_0 = arith.constant 0 : i32
    %c0_i32_1 = arith.constant 0 : i32
    return %c0_i32, %c0_i32_0 : i32, i32
  }
  func.func @transform_6(%arg0: i32) -> (i32, i32, i32) {
    %c0_i32 = arith.constant 0 : i32
    %c0_i32_0 = arith.constant 0 : i32
    %c0_i32_1 = arith.constant 0 : i32
    %c0_i32_2 = arith.constant 0 : i32
    return %c0_i32, %c0_i32_0, %c0_i32_1 : i32, i32, i32
  }
  func.func @transform_7(%arg0: i32) -> (i32, i32) {
    %c0_i32 = arith.constant 0 : i32
    %c0_i32_0 = arith.constant 0 : i32
    %c0_i32_1 = arith.constant 0 : i32
    return %c0_i32, %c0_i32_0 : i32, i32
  }
  func.func @transform_8(%arg0: i32) -> i32 {
    %c0_i32 = arith.constant 0 : i32
    %c0_i32_0 = arith.constant 0 : i32
    return %c0_i32 : i32
  }
  func.func @transform_9(%arg0: i32) -> (i32, i32, i32) {
    %c0_i32 = arith.constant 0 : i32
    %c0_i32_0 = arith.constant 0 : i32
    %c0_i32_1 = arith.constant 0 : i32
    return %arg0, %c0_i32, %c0_i32_0 : i32, i32, i32
  }
}

</mosaic_0001>

<bundles_post_ra>
// kernel: cdm_forward.1
= control target key start
LH: loop header
LB: loop body
LE: loop exit
PB: predicated region body
PF: predicated region fallthrough
CT: control target
= control target key end

     0   :  { %s7695_s0 = inlined_call_operand.vmem [shape: f32[2,8,8,4], index: 0, kind: input, shape index: {}]   ;;  %s7696_s1 = inlined_call_operand.vmem [shape: f32[2,8,8,4], index: 1, kind: input, shape index: {}]   ;;  %s7697_s2 = inlined_call_operand.vmem [shape: bf16[9,8,16], index: 2, kind: input, shape index: {}]   ;;  %s7698_s3 = inlined_call_operand.vmem [shape: f32[1,16], index: 3, kind: input, shape index: {}]   ;;  %s7699_s4 = inlined_call_operand.vmem [shape: bf16[9,16,16], index: 4, kind: input, shape index: {}]   ;;  %s7700_s5 = inlined_call_operand.vmem [shape: f32[1,16], index: 5, kind: input, shape index: {}]   ;;  %s7701_s6 = inlined_call_operand.vmem [shape: bf16[9,16,16], index: 6, kind: input, shape index: {}]   ;;  %s7702_s7 = inlined_call_operand.vmem [shape: f32[1,16], index: 7, kind: input, shape index: {}]   ;;  %s7703_s8 = inlined_call_operand.vmem [shape: f32[80], index: 8, kind: input, shape index: {}]   ;;  %s7704_s9 = inlined_call_operand.vmem [shape: f32[2,16,64], index: 9, kind: output, shape index: {}]  }
   0x1   :  { %7868 = sst [smem:[#allocation99_spill]] %s7695_s0 }
   0x2   :  { %7869 = sst [smem:[#allocation100_spill]] %s7696_s1 }
   0x3   :  { %7870 = sst [smem:[#allocation101_spill]] %s7697_s2 }
   0x4   :  { %7871 = sst [smem:[#allocation102_spill]] %s7698_s3 }
   0x5   :  { %7872 = sst [smem:[#allocation103_spill]] %s7699_s4 }
   0x6   :  { %7873 = sst [smem:[#allocation104_spill]] %s7700_s5 }
   0x7   :  { %7874 = sst [smem:[#allocation105_spill]] %s7701_s6 }
   0x8   :  { %7875 = sst [smem:[#allocation106_spill]] %s7702_s7 }
   0x9   :  { %7876 = sst [smem:[#allocation107_spill]] %s7703_s8 }
   0xa   :  { %7877 = sst [smem:[#allocation108_spill]] %s7704_s9 }
   0xb   :  { %14 = vsyncpa [#allocation5], 0  ;;  %s5537_s30 = smov 0  }
   0xc LB: > { %7878 = sst [smem:[#allocation7_spill]] %s5482_s30  ;;  %s5543_s10 = sadd.s32 4294967295, %s5482_s30   ;;  %s5482_s30 = sphi %s5537_s30, %s20_s30  }
   0xd   : > { %p4657_p0 = scmp.ge.s32.totalorder %s5482_s30, 1  ;;  %p250_p1 = scmp.lt.s32.totalorder %s5482_s30, 3 }
   0xe   : > { %s7879_s8 = sld [smem:[#allocation107_spill]]  ;;  %p5346_p3 = scmp.eq.s32.totalorder %s5543_s10, 0 }
   0xf   : > { %p5550_p2 = pnand %p4657_p0, %p250_p1 }
  0x11   : > { %p5342_p4 = pneg %p5550_p2 }
  0x13   : > { %p5343_p5 = pnand %p5346_p3, %p5342_p4 }
  0x14   : > { %s281_s13 = sshll.u32 %s7879_s8, 4  ;;  %s282_s13 = int_to_ptr.vmem [resolvable:$true] %s281_s13 }
  0x15   : > { %s5457_s15 = scalar_lea.vmem %s282_s13, 16  ;;  %p5459_p7 = pneg %p5343_p5 }
  0x16   : > { %p5458_p6 = scmp.ne.s32.totalorder %s282_s13, %s5457_s15  ;;  %p5465_p10 = scmp.lt.s32.totalorder %s282_s13, %s282_s13 }
  0x17   : > { %p5466_p11 = scmp.lt.s32.totalorder %s5457_s15, %s5457_s15 }
  0x18   : > { %p5460_p8 = pnand %p5459_p7, %p5458_p6 }
  0x19   : > { %p5467_p12 = por %p5466_p11, %p5465_p10 }
  0x1a   : > { %p5461_p9 = pneg %p5460_p8 }
  0x1c   : > { %p5468_p13 = pnand %p5467_p12, %p5461_p9 }
  0x1e   : > { %5471 = shalt.err (!%p5468_p13)
}
  0x1f   : > { %s5484_s16 = smov [#allocation4]   ;;  %310 = sbr.rel (%p5550_p2) target bundleno = 1363 (0x553), region = 56 }
  0x20   : > { %5345 = dma.vmem_to_smem (!%p5343_p5), %s282_s13, 16, %s5484_s16, [#allocation5]  }
  0x24   : > { %5477 = dma.done.wait (%p5346_p3), [#allocation5], 16  }
  0x25   : > { %5479 = vsyncadd (%p5346_p3), [#allocation5], 4294967280 }
  0x26   : > { %316 = sfence }
  0x27   : > { %p352_p0 = scmp.lt.s32.totalorder %s5543_s10, 1  ;;  %vm376_vm0 = vcmask 57344   ;;  %vm368_vm1 = vcmask 64512   ;;  %v5485_v0 = vmov 0.0   ;;  %vm370_vm2 = vcmask 58368   ;;  %s7882_s1 = sld [smem:[#allocation100_spill]] }
  0x28   : > { %379 = vst.msk [vmem:[#allocation2 + $0x30] sm:$0x1] %vm376_vm0, %v5485_v0  ;;  %380 = vst.msk [vmem:[#allocation2 + $0x40] sm:$0x1] %vm376_vm0, %v5485_v0  ;;  %s7883_s0 = sld [smem:[#allocation99_spill]]  ;;  %s5486_s24 = smov 4  }
  0x29   : > { %381 = vst.msk [vmem:[#allocation2 + $0x50] sm:$0x1] %vm376_vm0, %v5485_v0  ;;  %382 = vst.msk [vmem:[#allocation2 + $0x60] sm:$0x1] %vm376_vm0, %v5485_v0  ;;  %s8271_s10 = smov (!%p352_p0, %s5543_s10), 1  ;;  %vm426_vm3 = vcmask 31744  }
  0x2a   : > { %383 = vst.msk [vmem:[#allocation2 + $0x70] sm:$0x1] %vm376_vm0, %v5485_v0  ;;  %387 = vst.msk [vmem:[#allocation2 + $0x39] sm:$0x1] %vm376_vm0, %v5485_v0  ;;  %7881 = sst [smem:[#allocation8_spill]] %s8271_s10  ;;  %s4918_s17 = sshll.u32 %s8271_s10, 6 }
  0x2b   : > { %388 = vst.msk [vmem:[#allocation2 + $0x49] sm:$0x1] %vm376_vm0, %v5485_v0  ;;  %389 = vst.msk [vmem:[#allocation2 + $0x59] sm:$0x1] %vm376_vm0, %v5485_v0  ;;  %vm576_vm4 = vcmask 1043456   ;;  %s7884_s2 = sld [smem:[#allocation101_spill]] }
  0x2c   : > { %390 = vst.msk [vmem:[#allocation2 + $0x69] sm:$0x1] %vm376_vm0, %v5485_v0  ;;  %391 = vst.msk [vmem:[#allocation2 + $0x79] sm:$0x1] %vm376_vm0, %v5485_v0  ;;  %vm475_vm5 = vcmask 64544   ;;  %vm525_vm6 = vcmask 1046528  }
  0x2d   : > { %377 = vst.msk [vmem:[#allocation2 + $0x10] sm:$0x1] %vm376_vm0, %v5485_v0  ;;  %378 = vst.msk [vmem:[#allocation2 + $0x20] sm:$0x1] %vm376_vm0, %v5485_v0  ;;  %s5613_s20 = scalar_lea.vmem %s7882_s1, %s4918_s17  ;;  %vm725_vm7 = vcmask 1045504   ;;  %vm393_vm8 = vcmask 130048  }
  0x2e   : > { %384 = vst.msk [vmem:[#allocation2 + $0x80] sm:$0x1] %vm376_vm0, %v5485_v0  ;;  %385 = vst.msk [vmem:[#allocation2 + $0x19] sm:$0x1] %vm376_vm0, %v5485_v0  ;;  %v440_v1 = vld [vmem:[%s5613_s20 + $0x28] sm:$0xff]  ;;  %s356_s23 = scalar_lea.vmem %s7883_s0, %s4918_s17  ;;  %v438_v2 = vld [vmem:[%s5613_s20 + $0x18] sm:$0xff] }
  0x2f   : > { %386 = vst.msk [vmem:[#allocation2 + $0x29] sm:$0x1] %vm376_vm0, %v5485_v0  ;;  %392 = vst.msk [vmem:[#allocation2 + $0x89] sm:$0x1] %vm376_vm0, %v5485_v0  ;;  %461 = vrot.lane.b32.xlu1 %v440_v1, %s5486_s24  ;;  %457 = vrot.lane.b32.xlu0 %v438_v2, %s5486_s24  ;;  %v441_v3 = vld [vmem:[%s5613_s20 + $0x30] sm:$0xff]  ;;  %v439_v4 = vld [vmem:[%s5613_s20 + $0x20] sm:$0xff] }
  0x30   : > { %369 = vst.msk [vmem:[#allocation2] sm:$0xff] %vm368_vm1, %v5485_v0  ;;  %373 = vst.msk [vmem:[#allocation2 + $0x90] sm:$0xff] %vm368_vm1, %v5485_v0  ;;  %v423_v5 = vld [vmem:[%s356_s23 + $0x28] sm:$0xff]  ;;  %v421_v6 = vld [vmem:[%s356_s23 + $0x18] sm:$0xff]  ;;  %s7885_s4 = sld [smem:[#allocation103_spill]]  ;;  %vm401_vm9 = vcmask 122880  }
  0x31   : > { %371 = vst.msk [vmem:[#allocation2 + $0x8] sm:$0x3] %vm370_vm2, %v5485_v0  ;;  %374 = vst.msk [vmem:[#allocation2 + $0x98] sm:$0x3] %vm370_vm2, %v5485_v0  ;;  %v424_v7 = vld [vmem:[%s356_s23 + $0x30] sm:$0xff]  ;;  %v422_v8 = vld [vmem:[%s356_s23 + $0x20] sm:$0xff] }
  0x32   : > { %432 = vst.msk [vmem:[#allocation2 + $0x61] sm:$0xff] %vm426_vm3, %v423_v5  ;;  %430 = vst.msk [vmem:[#allocation2 + $0x41] sm:$0xff] %vm426_vm3, %v421_v6  ;;  %v419_v9 = vld [vmem:[%s356_s23 + $0x8] sm:$0xff]  ;;  %v418_v10 = vld [vmem:[%s356_s23] sm:$0xff]  ;;  %vm395_vm10 = vcmask 123904   ;;  %s7889_s3 = sld [smem:[#allocation102_spill]] }
  0x33   : > { %433 = vst.msk [vmem:[#allocation2 + $0x71] sm:$0xff] %vm426_vm3, %v424_v7  ;;  %463 = vrot.lane.b32.xlu1 %v441_v3, %s5486_s24  ;;  %459 = vrot.lane.b32.xlu0 %v439_v4, %s5486_s24  ;;  %431 = vst.msk [vmem:[#allocation2 + $0x51] sm:$0xff] %vm426_vm3, %v422_v8  ;;  %v425_v11 = vld [vmem:[%s356_s23 + $0x38] sm:$0xff]  ;;  %v420_v12 = vld [vmem:[%s356_s23 + $0x10] sm:$0xff]  ;;  %s7903_s6 = sld [smem:[#allocation105_spill]]  ;;  %vm4555_vm11 = vcmask 1040384  }
  0x34   : > { %428 = vst.msk [vmem:[#allocation2 + $0x21] sm:$0xff] %vm426_vm3, %v419_v9  ;;  %427 = vst.msk [vmem:[#allocation2 + $0x11] sm:$0xff] %vm426_vm3, %v418_v10  ;;  %v436_v13 = vld [vmem:[%s5613_s20 + $0x8] sm:$0xff]  ;;  %v435_v14 = vld [vmem:[%s5613_s20] sm:$0xff]  ;;  %s7909_s5 = sld [smem:[#allocation104_spill]]  ;;  %vm4557_vm12 = vcmask 1041408  }
  0x35   : > { %434 = vst.msk [vmem:[#allocation2 + $0x81] sm:$0xff] %vm426_vm3, %v425_v11  ;;  %429 = vst.msk [vmem:[#allocation2 + $0x31] sm:$0xff] %vm426_vm3, %v420_v12  ;;  %v4668_v15 = vld [vmem:[%s7884_s2 + $0x4] sm:$0xf]  ;;  %v442_v17 = vld [vmem:[%s5613_s20 + $0x38] sm:$0xff]  ;;  %s7924_s7 = sld [smem:[#allocation106_spill]] }
  0x36   : > { %5329 = vmatprep.subr.msk.bf16.mxu1 %vm576_vm4, %v4668_v15  ;;  %v578_v16 = vsel %vm576_vm4, %v4668_v15, 0  ;;  %5328 = vmatprep.subr.msk.bf16.mxu0 %vm576_vm4, %v4668_v15  ;;  %v437_v18 = vld [vmem:[%s5613_s20 + $0x10] sm:$0xff]  ;;  %v508_v19 = vld [vmem:[%s7884_s2] sm:$0xf]  ;;  %v5652_v20 = vld [vmem:[%s7884_s2 + $0x8] sm:$0xf] }
  0x37   : > { %5327 = vmatpush3.bf16.msra.mxu1 %v578_v16  ;;  %5057 = vmatpush3.bf16.msra.mxu0 %v578_v16  ;;  %v484_v31 = vld [vmem:[#allocation2] sm:$0xff]  ;;  %v658_v58 = vsel %vm576_vm4, %v508_v19, 0  ;;  %v4682_v4 = vld [vmem:[%s7884_s2 + $0xc] sm:$0xf]  ;;  %394 = vst.msk [vmem:[#allocation3] sm:$0xff] %vm393_vm8, %v5485_v0  ;;  %398 = vst.msk [vmem:[#allocation3 + $0x90] sm:$0xff] %vm393_vm8, %v5485_v0 }
  0x38   : > { %453 = vrot.lane.b32.xlu1 %v436_v13, %s5486_s24  ;;  %451 = vrot.lane.b32.xlu0 %v435_v14, %s5486_s24  ;;  %v485_v32 = vld [vmem:[#allocation2 + $0x8] sm:$0x3]  ;;  %v526_v42 = vrot.slane %v484_v31, 1  ;;  %v726_v1 = vrot.slane %v484_v31, 2  ;;  %402 = vst.msk [vmem:[#allocation3 + $0x10] sm:$0x1] %vm401_vm9, %v5485_v0 }
  0x39   : > { %5330 = vmatprep.subr.msk.bf16.mxu1 %vm576_vm4, %v508_v19  ;;  %5331 = vmatprep.subr.msk.bf16.mxu0 %vm576_vm4, %v5652_v20  ;;  %v527_v43 = vrot.slane %v485_v32, 1  ;;  %v727_v3 = vrot.slane %v485_v32, 2  ;;  %v777_v19 = vsel %vm576_vm4, %v5652_v20, 0  ;;  %v4687_v20 = vld [vmem:[%s7884_s2 + $0x10] sm:$0xf]  ;;  %s6536_s28 = sld [smem:[#allocation4]] }
  0x3a   : > { %403 = vst.msk [vmem:[#allocation3 + $0x20] sm:$0x1] %vm401_vm9, %v5485_v0  ;;  %404 = vst.msk [vmem:[#allocation3 + $0x30] sm:$0x1] %vm401_vm9, %v5485_v0  ;;  %s6538_s29 = sld [smem:[#allocation4 + $0x1]]  ;;  %vm4559_vm13 = vcmask 1042432  }
  0x3b   : > { %v528_v57 = vsel %vm525_vm6, %v526_v42, %v527_v43  ;;  %v728_v16 = vsel %vm725_vm7, %v726_v1, %v727_v3  ;;  %405 = vst.msk [vmem:[#allocation3 + $0x40] sm:$0x1] %vm401_vm9, %v5485_v0  ;;  %406 = vst.msk [vmem:[#allocation3 + $0x50] sm:$0x1] %vm401_vm9, %v5485_v0  ;;  %s6540_s11 = sld [smem:[#allocation4 + $0x2]]  ;;  %vm4562_vm14 = vcmask 1044480  }
  0x3c   : > { %465 = vrot.lane.b32.xlu1 %v442_v17, %s5486_s24  ;;  %455 = vrot.lane.b32.xlu0 %v437_v18, %s5486_s24  ;;  %407 = vst.msk [vmem:[#allocation3 + $0x60] sm:$0x1] %vm401_vm9, %v5485_v0  ;;  %408 = vst.msk [vmem:[#allocation3 + $0x70] sm:$0x1] %vm401_vm9, %v5485_v0  ;;  %s6542_s12 = sld [smem:[#allocation4 + $0x3]]  ;;  %vm4573_vm15 = vcmask 523264  }
  0x3d   : > { %409 = vst.msk [vmem:[#allocation3 + $0x80] sm:$0x1] %vm401_vm9, %v5485_v0  ;;  %410 = vst.msk [vmem:[#allocation3 + $0x19] sm:$0x1] %vm401_vm9, %v5485_v0  ;;  %s6544_s13 = sld [smem:[#allocation4 + $0x4]] }
  0x3e   : > { %411 = vst.msk [vmem:[#allocation3 + $0x29] sm:$0x1] %vm401_vm9, %v5485_v0  ;;  %412 = vst.msk [vmem:[#allocation3 + $0x39] sm:$0x1] %vm401_vm9, %v5485_v0  ;;  %s6546_s14 = sld [smem:[#allocation4 + $0x5]] }
  0x3f   : > { %413 = vst.msk [vmem:[#allocation3 + $0x49] sm:$0x1] %vm401_vm9, %v5485_v0  ;;  %414 = vst.msk [vmem:[#allocation3 + $0x59] sm:$0x1] %vm401_vm9, %v5485_v0  ;;  %7936 = sst [smem:[#allocation24_spill]] %s6536_s28 }
  0x40   : > { %415 = vst.msk [vmem:[#allocation3 + $0x69] sm:$0x1] %vm401_vm9, %v5485_v0  ;;  %416 = vst.msk [vmem:[#allocation3 + $0x79] sm:$0x1] %vm401_vm9, %v5485_v0  ;;  %7937 = sst [smem:[#allocation25_spill]] %s6538_s29 }
  0x41   : > { %417 = vst.msk [vmem:[#allocation3 + $0x89] sm:$0x1] %vm401_vm9, %v5485_v0  ;;  %7938 = sst [smem:[#allocation26_spill]] %s6540_s11 }
  0x42   : > { %396 = vst.msk [vmem:[#allocation3 + $0x8] sm:$0x3] %vm395_vm10, %v5485_v0  ;;  %399 = vst.msk [vmem:[#allocation3 + $0x98] sm:$0x3] %vm395_vm10, %v5485_v0  ;;  %7939 = sst [smem:[#allocation27_spill]] %s6542_s12 }
  0x43   : > { %7940 = sst [smem:[#allocation28_spill]] %s6544_s13 }
  0x44   : > { %7941 = sst [smem:[#allocation29_spill]] %s6546_s14 }
  0x45   : > { %s6548_s15 = sld [smem:[#allocation4 + $0x6]] }
  0x46   : > { %s6550_s16 = sld [smem:[#allocation4 + $0x7]] }
  0x47   : > { %s6552_s17 = sld [smem:[#allocation4 + $0x8]] }
  0x48   : > { %s6554_s18 = sld [smem:[#allocation4 + $0x9]] }
  0x49   : > { %s6556_s19 = sld [smem:[#allocation4 + $0xa]] }
  0x4a   : > { %s6558_s20 = sld [smem:[#allocation4 + $0xb]] }
  0x4b   : > { %7942 = sst [smem:[#allocation30_spill]] %s6548_s15 }
  0x4c   : > { %7943 = sst [smem:[#allocation31_spill]] %s6550_s16 }
  0x4d   : > { %7944 = sst [smem:[#allocation32_spill]] %s6552_s17 }
  0x4e   : > { %7945 = sst [smem:[#allocation33_spill]] %s6554_s18 }
  0x4f   : > { %7946 = sst [smem:[#allocation34_spill]] %s6556_s19 }
  0x50   : > { %7947 = sst [smem:[#allocation35_spill]] %s6558_s20 }
  0x51   : > { %s6560_s21 = sld [smem:[#allocation4 + $0xc]] }
  0x52   : > { %s6562_s22 = sld [smem:[#allocation4 + $0xd]] }
  0x53   : > { %s6564_s23 = sld [smem:[#allocation4 + $0xe]] }
  0x54   : > { %s6566_s24 = sld [smem:[#allocation4 + $0xf]] }
  0x55   : > { %s6568_s25 = sld [smem:[#allocation4 + $0x10]] }
  0x56   : > { %s6570_s26 = sld [smem:[#allocation4 + $0x11]] }
  0x57   : > { %7948 = sst [smem:[#allocation36_spill]] %s6560_s21 }
  0x58   : > { %7949 = sst [smem:[#allocation37_spill]] %s6562_s22 }
  0x59   : > { %7950 = sst [smem:[#allocation38_spill]] %s6564_s23 }
  0x5a   : > { %7951 = sst [smem:[#allocation39_spill]] %s6566_s24 }
  0x5b   : > { %7952 = sst [smem:[#allocation40_spill]] %s6568_s25 }
  0x5c   : > { %7953 = sst [smem:[#allocation41_spill]] %s6570_s26 }
  0x5d   : > { %s6572_s27 = sld [smem:[#allocation4 + $0x12]] }
  0x5e   : > { %s6574_s0 = sld [smem:[#allocation4 + $0x13]] }
  0x5f   : > { %s6576_s1 = sld [smem:[#allocation4 + $0x14]] }
  0x60   : > { %s6590_s8 = sld [smem:[#allocation4 + $0x1b]] }
  0x61   : > { %s6592_s30 = sld [smem:[#allocation4 + $0x1c]] }
  0x62   : > { %s6594_s9 = sld [smem:[#allocation4 + $0x1d]] }
  0x63   : > { %7954 = sst [smem:[#allocation42_spill]] %s6572_s27 }
  0x64   : > { %7955 = sst [smem:[#allocation43_spill]] %s6574_s0 }
  0x65   : > { %7956 = sst [smem:[#allocation44_spill]] %s6576_s1 }
  0x66   : > { %7963 = sst [smem:[#allocation51_spill]] %s6590_s8 }
  0x67   : > { %7964 = sst [smem:[#allocation52_spill]] %s6592_s30 }
  0x68   : > { %7965 = sst [smem:[#allocation53_spill]] %s6594_s9 }
  0x69   : > { %s6596_s10 = sld [smem:[#allocation4 + $0x1e]] }
  0x6a   : > { %s6598_s0 = sld [smem:[#allocation4 + $0x1f]] }
  0x6b   : > { %s6612_s8 = sld [smem:[#allocation4 + $0x26]] }
  0x6c   : > { %s6614_s30 = sld [smem:[#allocation4 + $0x27]] }
  0x6d   : > { %s6616_s9 = sld [smem:[#allocation4 + $0x28]] }
  0x6f   : > { %7966 = sst [smem:[#allocation54_spill]] %s6596_s10 }
  0x70   : > { %7967 = sst [smem:[#allocation55_spill]] %s6598_s0 }
  0x71   : > { %7974 = sst [smem:[#allocation62_spill]] %s6612_s8 }
  0x72   : > { %7975 = sst [smem:[#allocation63_spill]] %s6614_s30 }
  0x73   : > { %7976 = sst [smem:[#allocation64_spill]] %s6616_s9 }
  0x74   : > { %s6618_s10 = sld [smem:[#allocation4 + $0x29]] }
  0x75   : > { %s6620_s0 = sld [smem:[#allocation4 + $0x2a]] }
  0x76   : > { %s6634_s8 = sld [smem:[#allocation4 + $0x31]] }
  0x77   : > { %s6636_s30 = sld [smem:[#allocation4 + $0x32]] }
  0x78   : > { %s6638_s9 = sld [smem:[#allocation4 + $0x33]] }
  0x7a   : > { %7977 = sst [smem:[#allocation65_spill]] %s6618_s10 }
  0x7b   : > { %7978 = sst [smem:[#allocation66_spill]] %s6620_s0 }
  0x7c   : > { %s6640_s10 = sld [smem:[#allocation4 + $0x34]] }
  0x7d   : > { %7984 = sst [smem:[#allocation72_spill]] %s6636_s30 }
  0x7e   : > { %7985 = sst [smem:[#allocation73_spill]] %s6638_s9 }
  0x7f   : > { %s6652_s30 = sld [smem:[#allocation4 + $0x3a]] }
  0x80   : > { %s6654_s9 = sld [smem:[#allocation4 + $0x3b]] }
  0x82   : > { %7986 = sst [smem:[#allocation74_spill]] %s6640_s10 }
  0x83   : > { %s6656_s10 = sld [smem:[#allocation4 + $0x3c]] }
  0x85   : > { %7992 = sst [smem:[#allocation80_spill]] %s6652_s30 }
  0x86   : > { %7993 = sst [smem:[#allocation81_spill]] %s6654_s9 }
  0x87   : > { %s6668_s30 = sld [smem:[#allocation4 + $0x42]] }
  0x88   : > { %s6670_s9 = sld [smem:[#allocation4 + $0x43]] }
  0x8e   : > { %7998 = sst [smem:[#allocation86_spill]] %s6670_s9 }
  0xa1   : > { %v462_v21 = vpop.permute.xlu1 %461  ;;  %v458_v22 = vpop.permute.xlu0 %457 }
  0xa2   : > { %481 = vst.msk [vmem:[#allocation2 + $0x61] sm:$0xff] %vm475_vm5, %v462_v21  ;;  %479 = vst.msk [vmem:[#allocation2 + $0x41] sm:$0xff] %vm475_vm5, %v458_v22 }
  0xa5   : > { %v464_v23 = vpop.permute.xlu1 %463  ;;  %v460_v24 = vpop.permute.xlu0 %459 }
  0xa6   : > { %482 = vst.msk [vmem:[#allocation2 + $0x71] sm:$0xff] %vm475_vm5, %v464_v23  ;;  %480 = vst.msk [vmem:[#allocation2 + $0x51] sm:$0xff] %vm475_vm5, %v460_v24 }
  0xa9   : > { %v5663_v27 = vld [vmem:[#allocation2 + $0x40] sm:$0xff]  ;;  %v5665_v28 = vld [vmem:[#allocation2 + $0x48] sm:$0x3] }
  0xaa   : > { %v454_v25 = vpop.permute.xlu1 %453  ;;  %v452_v26 = vpop.permute.xlu0 %451  ;;  %v5667_v29 = vld [vmem:[#allocation2 + $0x60] sm:$0xff]  ;;  %v5671_v30 = vld [vmem:[#allocation2 + $0x68] sm:$0x3]  ;;  %v538_v35 = vrot.slane %v5663_v27, 1  ;;  %v539_v36 = vrot.slane %v5665_v28, 1 }
  0xab   : > { %477 = vst.msk [vmem:[#allocation2 + $0x21] sm:$0xff] %vm475_vm5, %v454_v25  ;;  %476 = vst.msk [vmem:[#allocation2 + $0x11] sm:$0xff] %vm475_vm5, %v452_v26  ;;  %v544_v33 = vrot.slane %v5667_v29, 1  ;;  %v545_v34 = vrot.slane %v5671_v30, 1  ;;  %v871_v26 = vsel %vm576_vm4, %v4682_v4, 0  ;;  %v745_v43 = vrot.slane %v5671_v30, 2 }
  0xac   : > { %v5695_v50 = vsel %vm525_vm6, %v538_v35, %v539_v36  ;;  %v4692_v35 = vld [vmem:[%s7884_s2 + $0x14] sm:$0xf]  ;;  %v739_v36 = vrot.slane %v5665_v28, 2  ;;  %v744_v28 = vrot.slane %v5667_v29, 2 }
  0xad   : > { %v5677_v39 = vld [vmem:[#allocation2 + $0x50] sm:$0xff]  ;;  %v5679_v40 = vld [vmem:[#allocation2 + $0x58] sm:$0x3]  ;;  %v5691_v48 = vsel %vm525_vm6, %v544_v33, %v545_v34 }
  0xae   : > { %v466_v37 = vpop.permute.xlu1 %465  ;;  %v456_v38 = vpop.permute.xlu0 %455  ;;  %v5681_v41 = vld [vmem:[#allocation2 + $0x70] sm:$0xff]  ;;  %v5685_v44 = vld [vmem:[#allocation2 + $0x78] sm:$0x3]  ;;  %v541_v45 = vrot.slane %v5677_v39, 1  ;;  %v542_v46 = vrot.slane %v5679_v40, 1  ;;  %v5761_v25 = vpack.c.bf16 %v5677_v39, %v5663_v27  ;;  %v741_v34 = vrot.slane %v5677_v39, 2 }
  0xaf   : > { %483 = vst.msk [vmem:[#allocation2 + $0x81] sm:$0xff] %vm475_vm5, %v466_v37  ;;  %478 = vst.msk [vmem:[#allocation2 + $0x31] sm:$0xff] %vm475_vm5, %v456_v38  ;;  %v547_v47 = vrot.slane %v5681_v41, 1  ;;  %v548_v49 = vrot.slane %v5685_v44, 1  ;;  %v738_v38 = vrot.slane %v5663_v27, 2  ;;  %v854_v1 = vpack.c.bf16 %v5667_v29, %v5677_v39 }
  0xb0   : > { %v5698_v51 = vsel %vm525_vm6, %v541_v45, %v542_v46  ;;  %v971_v46 = vsel %vm576_vm4, %v4687_v20, 0 }
  0xb1   : > { %v5701_v52 = vsel %vm525_vm6, %v547_v47, %v548_v49  ;;  %v5705_v53 = vpack.c.bf16 %v5698_v51, %v5695_v50  ;;  %v507_v47 = vpack.c.bf16 %v5681_v41, %v5667_v29  ;;  %v740_v49 = vsel %vm725_vm7, %v738_v38, %v739_v36 }
  0xb2   : > { %v5707_v54 = vld [vmem:[#allocation2 + $0x10] sm:$0xff]  ;;  %v487_v55 = vld [vmem:[#allocation2 + $0x18] sm:$0x3]  ;;  %v5709_v56 = vld [vmem:[#allocation2 + $0x20] sm:$0xff]  ;;  %v5715_v59 = vpack.c.bf16 %v5701_v52, %v5691_v48 }
  0xb3   : > { %v504_v60 = vpack.c.bf16 %v5707_v54, %v484_v31  ;;  %v489_v61 = vld [vmem:[#allocation2 + $0x28] sm:$0x3]  ;;  %v529_v62 = vrot.slane %v5707_v54, 1  ;;  %v530_v63 = vrot.slane %v487_v55, 1  ;;  %5062 = vmatprep.mubr.msk.bf16.mxu1 %vm368_vm1, %v5705_v53  ;;  %v532_v2 = vrot.slane %v5709_v56, 1 }
  0xb4   : > { %5063 = vmatmul.mubr.msk.bf16.vlgmr.msra.gmra.mxu1 %vm368_vm1, %v5715_v59  ;;  %v533_v6 = vrot.slane %v489_v61, 1  ;;  %v730_v7 = vrot.slane %v487_v55, 2  ;;  %v729_v8 = vrot.slane %v5707_v54, 2  ;;  %v742_v31 = vrot.slane %v5679_v40, 2 }
  0xb5   : > { %v5728_v5 = vsel %vm525_vm6, %v529_v62, %v530_v63  ;;  %5068 = vmatprep.mubr.msk.bf16.mxu1 %vm368_vm1, %v504_v60  ;;  %5067 = vmatpush3.bf16.msra.mxu1 %v658_v58  ;;  %v732_v32 = vrot.slane %v5709_v56, 2  ;;  %v733_v33 = vrot.slane %v489_v61, 2  ;;  %v747_v55 = vrot.slane %v5681_v41, 2  ;;  %v4697_v60 = vld [vmem:[%s7884_s2 + $0x18] sm:$0xf] }
  0xb6   : > { %v5731_v9 = vld [vmem:[#allocation2 + $0x30] sm:$0xff]  ;;  %v491_v10 = vld [vmem:[#allocation2 + $0x38] sm:$0x3]  ;;  %v558_v11 = vpack.c.bf16 %v5728_v5, %v528_v57  ;;  %5332 = vmatprep.subr.msk.bf16.mxu1 %vm576_vm4, %v4682_v4  ;;  %v534_v15 = vsel %vm525_vm6, %v532_v2, %v533_v6  ;;  %v5744_v17 = vsel %vm725_vm7, %v729_v8, %v730_v7  ;;  %v743_v42 = vsel %vm725_vm7, %v741_v34, %v742_v31  ;;  %v4702_v2 = vld [vmem:[%s7884_s2 + $0x1c] sm:$0xf] }
  0xb7   : > { %v535_v12 = vrot.slane %v5731_v9, 1  ;;  %v536_v13 = vrot.slane %v491_v10, 1  ;;  %v735_v21 = vrot.slane %v5731_v9, 2  ;;  %v736_v22 = vrot.slane %v491_v10, 2  ;;  %v501_v3 = vld [vmem:[#allocation2 + $0x88] sm:$0x3] }
  0xb8   : > { %5058 = vmatprep.mubr.msk.bf16.mxu0 %vm368_vm1, %v558_v11  ;;  %v5754_v23 = vpack.c.bf16 %v5731_v9, %v5709_v56  ;;  %v758_v24 = vpack.c.bf16 %v5744_v17, %v728_v16  ;;  %v734_v40 = vsel %vm725_vm7, %v732_v32, %v733_v33  ;;  %v748_v57 = vrot.slane %v5685_v44, 2  ;;  %v503_v16 = vld [vmem:[#allocation2 + $0x98] sm:$0x3] }
  0xb9   : > { %v5739_v14 = vsel %vm525_vm6, %v535_v12, %v536_v13  ;;  %v737_v37 = vsel %vm725_vm7, %v735_v21, %v736_v22  ;;  %v5797_v58 = vpack.c.bf16 %v743_v42, %v740_v49  ;;  %v852_v30 = vpack.c.bf16 %v5709_v56, %v5707_v54  ;;  %v5927_v31 = vld [vmem:[%s7885_s4 + $0x18] sm:$0xff]  }
  0xba   : > { %v5747_v18 = vpack.c.bf16 %v5739_v14, %v534_v15  ;;  %v5786_v45 = vpack.c.bf16 %v737_v37, %v734_v40  ;;  %v746_v44 = vsel %vm725_vm7, %v744_v28, %v745_v43  ;;  %v749_v61 = vsel %vm725_vm7, %v747_v55, %v748_v57  ;;  %7887 = vst [vmem:[#allocation10_spill] sm:$0xff] %v5927_v31 }
  0xbb   : > { %v5811_v62 = vpack.c.bf16 %v749_v61, %v746_v44  ;;  %v853_v54 = vpack.c.bf16 %v5663_v27, %v5731_v9  ;;  %v952_v56 = vpack.c.bf16 %v534_v15, %v5728_v5  ;;  %v1069_v63 = vsel %vm576_vm4, %v4692_v35, 0  ;;  %v500_v27 = vld [vmem:[#allocation2 + $0x80] sm:$0xff]  ;;  %v502_v15 = vld [vmem:[#allocation2 + $0x90] sm:$0xff] }
  0xbc   : > { %5059 = vmatmul.mubr.msk.bf16.vlgmr.msra.gmra.mxu0 %vm368_vm1, %v5747_v18  ;;  %5069 = vmatmul.mubr.msk.bf16.vlgmr.msra.gmra.mxu1 %vm368_vm1, %v5754_v23  ;;  %v953_v4 = vpack.c.bf16 %v5695_v50, %v5739_v14  ;;  %v1151_v29 = vsel %vm576_vm4, %v4697_v60, 0  ;;  %v855_v39 = vpack.c.bf16 %v500_v27, %v5681_v41  ;;  %v948_v5 = vrot.slane %v500_v27, 1  ;;  %v4707_v9 = vld [vmem:[%s7884_s2 + $0x20] sm:$0xf]  ;;  %s6578_s2 = sld [smem:[#allocation4 + $0x15]] }
  0xbd   : > { %5077 = vmatpush3.bf16.msra.mxu0 %v777_v19  ;;  %5078 = vmatprep.mubr.msk.bf16.mxu0 %vm368_vm1, %v758_v24  ;;  %v949_v6 = vrot.slane %v501_v3, 1  ;;  %v954_v7 = vpack.c.bf16 %v5691_v48, %v5698_v51  ;;  %v1050_v8 = vpack.c.bf16 %v734_v40, %v5744_v17  ;;  %v1051_v50 = vpack.c.bf16 %v740_v49, %v737_v37 }
  0xbe   : > { %5072 = vmatprep.mubr.msk.bf16.mxu1 %vm368_vm1, %v5761_v25  ;;  %5087 = vmatpush3.bf16.msra.mxu1 %v871_v26  ;;  %v1239_v51 = vsel %vm576_vm4, %v4702_v2, 0  ;;  %v1052_v10 = vpack.c.bf16 %v746_v44, %v743_v42  ;;  %v1046_v11 = vrot.slane %v500_v27, 2  ;;  %v1047_v12 = vrot.slane %v501_v3, 2  ;;  %v5360_v26 = vld [vmem:[%s7885_s4] sm:$0xff]  }
  0xbf   : > { %5333 = vmatprep.subr.msk.bf16.mxu0 %vm576_vm4, %v4687_v20  ;;  %5334 = vmatprep.subr.msk.bf16.mxu1 %vm576_vm4, %v4692_v35  ;;  %v950_v41 = vsel %vm525_vm6, %v948_v5, %v949_v6  ;;  %v1144_v17 = vpack.c.bf16 %v502_v15, %v500_v27  ;;  %v1228_v19 = vrot.slane %v502_v15, 1  ;;  %v1229_v21 = vrot.slane %v503_v16, 1  ;;  %v5921_v20 = vld [vmem:[%s7885_s4 + $0x10] sm:$0xff]  }
  0xc0   : > { %v955_v48 = vpack.c.bf16 %v950_v41, %v5701_v52  ;;  %v1048_v13 = vsel %vm725_vm7, %v1046_v11, %v1047_v12  ;;  %v1325_v52 = vsel %vm576_vm4, %v4707_v9, 0  ;;  %v1315_v24 = vrot.slane %v503_v16, 2  ;;  %7886 = vst [vmem:[#allocation9_spill] sm:$0xff] %v5921_v20 }
  0xc1   : > { %v1053_v14 = vpack.c.bf16 %v1048_v13, %v749_v61  ;;  %v1230_v22 = vsel %vm525_vm6, %v1228_v19, %v1229_v21 }
  0xc2   : > { %7957 = sst [smem:[#allocation45_spill]] %s6578_s2 }
  0xc3   : > { %s6600_s2 = sld [smem:[#allocation4 + $0x20]] }
  0xc4   : > { %5079 = vmatmul.mubr.msk.bf16.vlgmr.msra.gmra.mxu0 %vm368_vm1, %v5786_v45  ;;  %5073 = vmatmul.mubr.msk.bf16.gmra.mxu1 %vm368_vm1, %v507_v47  ;;  %s8001_s9 = sld [smem:[#allocation45_spill]] }
  0xc5   : > { %5097 = vmatpush3.bf16.msra.mxu0 %v971_v46  ;;  %5082 = vmatprep.mubr.msk.bf16.mxu0 %vm368_vm1, %v5797_v58 }
  0xc6   : > { %5088 = vmatprep.mubr.msk.bf16.mxu1 %vm368_vm1, %v852_v30  ;;  %5335 = vmatprep.subr.msk.bf16.mxu0 %vm576_vm4, %v4697_v60 }
  0xc9   : > { %7968 = sst [smem:[#allocation56_spill]] %s6600_s2 }
  0xca   : > { %s6622_s2 = sld [smem:[#allocation4 + $0x2b]] }
  0xcc   : > { %5083 = vmatmul.mubr.msk.bf16.gmra.mxu0 %vm368_vm1, %v5811_v62  ;;  %5089 = vmatmul.mubr.msk.bf16.vlgmr.msra.gmra.mxu1 %vm368_vm1, %v853_v54 }
  0xcd   : > { %5098 = vmatprep.mubr.msk.bf16.mxu0 %vm368_vm1, %v952_v56  ;;  %5092 = vmatprep.mubr.msk.bf16.mxu1 %vm368_vm1, %v854_v1 }
  0xce   : > { %5107 = vmatpush3.bf16.msra.mxu1 %v1069_v63 }
  0xcf   : > { %5336 = vmatprep.subr.msk.bf16.mxu1 %vm576_vm4, %v4702_v2 }
  0xd0   : > { %7979 = sst [smem:[#allocation67_spill]] %s6622_s2 }
  0xd1   : > { %s6642_s2 = sld [smem:[#allocation4 + $0x35]] }
  0xd4   : > { %5099 = vmatmul.mubr.msk.bf16.vlgmr.msra.gmra.mxu0 %vm368_vm1, %v953_v4  ;;  %5093 = vmatmul.mubr.msk.bf16.gmra.mxu1 %vm368_vm1, %v855_v39 }
  0xd5   : > { %5117 = vmatpush3.bf16.msra.mxu0 %v1151_v29  ;;  %5102 = vmatprep.mubr.msk.bf16.mxu0 %vm368_vm1, %v954_v7 }
  0xd6   : > { %5108 = vmatprep.mubr.msk.bf16.mxu1 %vm368_vm1, %v1050_v8  ;;  %5337 = vmatprep.subr.msk.bf16.mxu0 %vm576_vm4, %v4707_v9 }
  0xd7   : > { %7987 = sst [smem:[#allocation75_spill]] %s6642_s2 }
  0xd8   : > { %s6658_s2 = sld [smem:[#allocation4 + $0x3d]] }
  0xdc   : > { %5103 = vmatmul.mubr.msk.bf16.gmra.mxu0 %vm368_vm1, %v955_v48  ;;  %5109 = vmatmul.mubr.msk.bf16.vlgmr.msra.gmra.mxu1 %vm368_vm1, %v1051_v50 }
  0xdd   : > { %5118 = vmatprep.mubr.msk.bf16.mxu0 %vm368_vm1, %v5754_v23  ;;  %5112 = vmatprep.mubr.msk.bf16.mxu1 %vm368_vm1, %v1052_v10  ;;  %v1314_v23 = vrot.slane %v502_v15, 2 }
  0xde   : > { %5127 = vmatpush3.bf16.msra.mxu1 %v1239_v51 }
  0xe4   : > { %5119 = vmatmul.mubr.msk.bf16.vlgmr.msra.gmra.mxu0 %vm368_vm1, %v5761_v25  ;;  %5113 = vmatmul.mubr.msk.bf16.gmra.mxu1 %vm368_vm1, %v1053_v14 }
  0xe5   : > { %5137 = vmatpush3.bf16.msra.mxu0 %v1325_v52  ;;  %5122 = vmatprep.mubr.msk.bf16.mxu0 %vm368_vm1, %v507_v47 }
  0xe6   : > { %5128 = vmatprep.mubr.msk.bf16.mxu1 %vm368_vm1, %v5747_v18  ;;  %v1232_v18 = vpack.c.bf16 %v1230_v22, %v950_v41  ;;  %5156 = vmatprep.subr.bf16.mxu0 %v5360_v26 }
  0xec   : > { %5123 = vmatmul.mubr.msk.bf16.gmra.mxu0 %vm368_vm1, %v1144_v17  ;;  %5129 = vmatmul.mubr.msk.bf16.vlgmr.msra.gmra.mxu1 %vm368_vm1, %v5705_v53  ;;  %v1316_v53 = vsel %vm725_vm7, %v1314_v23, %v1315_v24 }
  0xed   : > { %5138 = vmatprep.mubr.msk.bf16.mxu0 %vm368_vm1, %v5786_v45  ;;  %5132 = vmatprep.mubr.msk.bf16.mxu1 %vm368_vm1, %v5715_v59  ;;  %v1318_v25 = vpack.c.bf16 %v1316_v53, %v1048_v13  ;;  %v5359_v59 = vld [vmem:[%s7885_s4 + $0x8] sm:$0xff]  }
  0xee   : > { %5146 = vmatprep.subr.bf16.mxu1 %v5359_v59 }
  0xef   : > { %5147 = vmatpush3.bf16.msra.mxu1 %v5359_v59 }
  0xf0   : > { %5166 = vmatprep.subr.bf16.mxu1 %v5921_v20 }
  0xf4   : > { %5139 = vmatmul.mubr.msk.bf16.vlgmr.msra.gmra.mxu0 %vm368_vm1, %v5797_v58  ;;  %5133 = vmatmul.mubr.msk.bf16.gmra.mxu1 %vm368_vm1, %v1232_v18 }
  0xf5   : > { %5142 = vmatprep.mubr.msk.bf16.mxu0 %vm368_vm1, %v5811_v62  ;;  %5157 = vmatpush3.bf16.msra.mxu0 %v5360_v26 }
  0xf6   : > { %5176 = vmatprep.subr.bf16.mxu0 %v5927_v31 }
  0xfc   : > { %5143 = vmatmul.mubr.msk.bf16.gmra.mxu0 %vm368_vm1, %v1318_v25 }
 0x174   : > { %v5930_v0 = vpop.f32.mrf.mxu1 }
 0x176   : > { %v5932_v32 = vpop.f32.mrf.mxu1 }
 0x178   : > { %v5934_v33 = vpop.f32.mrf.mxu1 }
 0x17a   : > { %v5936_v34 = vpop.f32.mrf.mxu1 }
 0x17c   : > { %v5060_v35 = vpop.f32.mrf.mxu0  ;;  %v5070_v36 = vpop.f32.mrf.mxu1 }
 0x17d   : > { %v703_v52 = vadd.f32 %v5070_v36, %v5060_v35 }
 0x17e   : > { %v614_v37 = vpop.f32.mrf.mxu0  ;;  %v694_v38 = vpop.f32.mrf.mxu1 }
 0x17f   : > { %v695_v16 = vadd.f32 %v694_v38, %v614_v37 }
 0x180   : > { %v5061_v40 = vpop.f32.mrf.mxu0  ;;  %v5071_v42 = vpop.f32.mrf.mxu1 }
 0x181   : > { %v706_v22 = vadd.f32 %v5071_v42, %v5061_v40 }
 0x182   : > { %v617_v43 = vpop.f32.mrf.mxu0  ;;  %v697_v45 = vpop.f32.mrf.mxu1 }
 0x183   : > { %v698_v25 = vadd.f32 %v697_v45, %v617_v43 }
 0x184   : > { %v5080_v46 = vpop.f32.mrf.mxu0  ;;  %v5074_v28 = vpop.f32.mrf.mxu1 }
 0x185   : > { %v846_v17 = vadd.f32 %v5080_v46, %v703_v52  ;;  %v719_v35 = vadd.f32 %v5074_v28, %v5930_v0 }
 0x186   : > { %v813_v47 = vpop.f32.mrf.mxu0  ;;  %v710_v49 = vpop.f32.mrf.mxu1 }
 0x187   : > { %v844_v23 = vadd.f32 %v813_v47, %v695_v16  ;;  %v711_v40 = vadd.f32 %v710_v49, %v5932_v32 }
 0x188   : > { %v5081_v55 = vpop.f32.mrf.mxu0  ;;  %v5075_v57 = vpop.f32.mrf.mxu1 }
 0x189   : > { %v847_v59 = vadd.f32 %v5081_v55, %v706_v22  ;;  %v722_v55 = vadd.f32 %v5075_v57, %v5934_v33  ;;  %v5969_v33 = vld [vmem:[%s7889_s3] ss:$0 sm:$0xff]  ;;  %s6580_s3 = sld [smem:[#allocation4 + $0x16]] }
 0x18a   : > { %v816_v58 = vpop.f32.mrf.mxu0  ;;  %v5938_v30 = vpop.f32.mrf.mxu1 }
 0x18b   : > { %v714_v32 = vadd.f32 %v5938_v30, %v5936_v34 }
 0x18c   : > { %v5084_v60 = vpop.f32.mrf.mxu0  ;;  %v5090_v44 = vpop.f32.mrf.mxu1 }
 0x18d   : > { %v940_v18 = vadd.f32 %v5090_v44, %v846_v17  ;;  %v850_v42 = vadd.f32 %v5084_v60, %v719_v35 }
 0x18e   : > { %v829_v61 = vpop.f32.mrf.mxu0  ;;  %v907_v62 = vpop.f32.mrf.mxu1 }
 0x18f   : > { %v938_v26 = vadd.f32 %v907_v62, %v844_v23  ;;  %v848_v62 = vadd.f32 %v829_v61, %v711_v40  ;;  %7958 = sst [smem:[#allocation46_spill]] %s6580_s3 }
 0x190   : > { %v5940_v54 = vpop.f32.mrf.mxu0  ;;  %v5091_v56 = vpop.f32.mrf.mxu1  ;;  %s6602_s3 = sld [smem:[#allocation4 + $0x21]] }
 0x191   : > { %v941_v37 = vadd.f32 %v5091_v56, %v847_v59  ;;  %v851_v49 = vadd.f32 %v5940_v54, %v722_v55 }
 0x192   : > { %v5942_v63 = vpop.f32.mrf.mxu0  ;;  %v910_v1 = vpop.f32.mrf.mxu1 }
 0x194   : > { %v5100_v2 = vpop.f32.mrf.mxu0  ;;  %v5094_v27 = vpop.f32.mrf.mxu1 }
 0x195   : > { %v1040_v20 = vadd.f32 %v5100_v2, %v940_v18  ;;  %v944_v2 = vadd.f32 %v5094_v27, %v850_v42 }
 0x196   : > { %v1007_v3 = vpop.f32.mrf.mxu0  ;;  %v923_v4 = vpop.f32.mrf.mxu1  ;;  %7969 = sst [smem:[#allocation57_spill]] %s6602_s3 }
 0x197   : > { %v1038_v38 = vadd.f32 %v1007_v3, %v938_v26  ;;  %v942_v60 = vadd.f32 %v923_v4, %v848_v62  ;;  %s6624_s3 = sld [smem:[#allocation4 + $0x2c]] }
 0x198   : > { %v5101_v29 = vpop.f32.mrf.mxu0  ;;  %v5944_v39 = vpop.f32.mrf.mxu1 }
 0x199   : > { %v1041_v16 = vadd.f32 %v5101_v29, %v941_v37 }
 0x19a   : > { %v1010_v5 = vpop.f32.mrf.mxu0  ;;  %v5946_v6 = vpop.f32.mrf.mxu1 }
 0x19c   : > { %v5104_v7 = vpop.f32.mrf.mxu0  ;;  %v5110_v8 = vpop.f32.mrf.mxu1 }
 0x19d   : > { %v1138_v46 = vadd.f32 %v5110_v8, %v1040_v20  ;;  %7980 = sst [smem:[#allocation68_spill]] %s6624_s3 }
 0x19e   : > { %v5948_v9 = vpop.f32.mrf.mxu0  ;;  %v1105_v41 = vpop.f32.mrf.mxu1  ;;  %s6644_s3 = sld [smem:[#allocation4 + $0x36]] }
 0x19f   : > { %v1136_v17 = vadd.f32 %v1105_v41, %v1038_v38  ;;  %v945_v41 = vadd.f32 %v5944_v39, %v851_v49  ;;  %v1042_v34 = vadd.f32 %v5948_v9, %v942_v60 }
 0x1a0   : > { %v5950_v48 = vpop.f32.mrf.mxu0  ;;  %v5111_v50 = vpop.f32.mrf.mxu1 }
 0x1a2   : > { %v5952_v51 = vpop.f32.mrf.mxu0  ;;  %v1108_v10 = vpop.f32.mrf.mxu1 }
 0x1a3   : > { %7888 = vst [vmem:[#allocation11_spill] sm:$0xff] %v5952_v51  ;;  %v845_v51 = vadd.f32 %v816_v58, %v698_v25  ;;  %v1139_v58 = vadd.f32 %v5111_v50, %v1041_v16 }
 0x1a4   : > { %v5120_v11 = vpop.f32.mrf.mxu0  ;;  %v5114_v12 = vpop.f32.mrf.mxu1  ;;  %7988 = sst [smem:[#allocation76_spill]] %s6644_s3 }
 0x1a5   : > { %v939_v44 = vadd.f32 %v910_v1, %v845_v51  ;;  %v1220_v43 = vadd.f32 %v5120_v11, %v1138_v46  ;;  %v1044_v1 = vadd.f32 %v5104_v7, %v944_v2  ;;  %v5998_v46 = vld [vmem:[#allocation3] sm:$0xff]  ;;  %s6660_s3 = sld [smem:[#allocation4 + $0x3e]] }
 0x1a6   : > { %v1187_v13 = vpop.f32.mrf.mxu0  ;;  %v5954_v14 = vpop.f32.mrf.mxu1  ;;  %7895 = vst [vmem:[#allocation15_spill] sm:$0xff] %v5998_v46 }
 0x1a7   : > { %v1039_v28 = vadd.f32 %v1010_v5, %v939_v44  ;;  %v1218_v56 = vadd.f32 %v1187_v13, %v1136_v17  ;;  %v1142_v30 = vadd.f32 %v5114_v12, %v1044_v1  ;;  %v1045_v13 = vadd.f32 %v5950_v48, %v945_v41 }
 0x1a8   : > { %v5121_v15 = vpop.f32.mrf.mxu0  ;;  %v5956_v19 = vpop.f32.mrf.mxu1 }
 0x1a9   : > { %v1137_v57 = vadd.f32 %v1108_v10, %v1039_v28  ;;  %v1221_v61 = vadd.f32 %v5121_v15, %v1139_v58  ;;  %v1140_v15 = vadd.f32 %v5954_v14, %v1042_v34  ;;  %v1143_v18 = vadd.f32 %v5956_v19, %v1045_v13 }
 0x1aa   : > { %v1190_v21 = vpop.f32.mrf.mxu0  ;;  %v5958_v24 = vpop.f32.mrf.mxu1 }
 0x1ab   : > { %v1219_v4 = vadd.f32 %v1190_v21, %v1137_v57  ;;  %v7892_v21 = vld [vmem:[#allocation11_spill] sm:$0xff]  ;;  %7994 = sst [smem:[#allocation82_spill]] %s6660_s3 }
 0x1ac   : > { %v5124_v53 = vpop.f32.mrf.mxu0  ;;  %v5130_v31 = vpop.f32.mrf.mxu1  ;;  %s6675_s3 = sld [smem:[#allocation4 + $0x44]] }
 0x1ad   : > { %v1308_v3 = vadd.f32 %v5130_v31, %v1220_v43  ;;  %v849_v31 = vadd.f32 %v5942_v63, %v714_v32  ;;  %v1224_v22 = vadd.f32 %v5124_v53, %v1142_v30  ;;  %v7710_v43 = vrot.slane %v5998_v46, 1 }
 0x1ae   : > { %v1203_v36 = vpop.f32.mrf.mxu0  ;;  %v1275_v52 = vpop.f32.mrf.mxu1 }
 0x1af   : > { %v1306_v27 = vadd.f32 %v1275_v52, %v1218_v56  ;;  %v943_v10 = vadd.f32 %v5946_v6, %v849_v31  ;;  %v1222_v59 = vadd.f32 %v1203_v36, %v1140_v15  ;;  %v6000_v52 = vld [vmem:[#allocation3 + $0x8] sm:$0x3] }
 0x1b0   : > { %v5125_v47 = vpop.f32.mrf.mxu0  ;;  %v5131_v45 = vpop.f32.mrf.mxu1 }
 0x1b1   : > { %v1309_v7 = vadd.f32 %v5131_v45, %v1221_v61  ;;  %v1043_v23 = vadd.f32 %v7892_v21, %v943_v10  ;;  %v1225_v37 = vadd.f32 %v5125_v47, %v1143_v18  ;;  %v1466_v45 = vrot.slane %v6000_v52, 1 }
 0x1b2   : > { %v1206_v0 = vpop.f32.mrf.mxu0  ;;  %v1278_v20 = vpop.f32.mrf.mxu1  ;;  %7999 = sst [smem:[#allocation87_spill]] %s6675_s3 }
 0x1b3   : > { %v1307_v39 = vadd.f32 %v1278_v20, %v1219_v4  ;;  %v1141_v26 = vadd.f32 %v5958_v24, %v1043_v23  ;;  %v1467_v1 = vsel %vm525_vm6, %v7710_v43, %v1466_v45  ;;  %v7900_v23 = vld [vmem:[#allocation10_spill] sm:$0xff] }
 0x1b4   : > { %v5140_v29 = vpop.f32.mrf.mxu0  ;;  %v5134_v8 = vpop.f32.mrf.mxu1 }
 0x1b5   : > { %v1394_v5 = vadd.f32 %v5140_v29, %v1308_v3  ;;  %v1312_v48 = vadd.f32 %v5134_v8, %v1224_v22  ;;  %v1223_v44 = vadd.f32 %v1206_v0, %v1141_v26 }
 0x1b6   : > { %v1361_v54 = vpop.f32.mrf.mxu0  ;;  %v1291_v11 = vpop.f32.mrf.mxu1 }
 0x1b7   : > { %v5975_v50 = vadd.f32 %v5969_v33, %v1394_v5  ;;  %v1392_v51 = vadd.f32 %v1361_v54, %v1306_v27  ;;  %v1310_v38 = vadd.f32 %v1291_v11, %v1222_v59  ;;  %v7709_v59 = vrot.slane %v5998_v46, 2 }
 0x1b8   : > { %v5141_v63 = vpop.f32.mrf.mxu0  ;;  %v5135_v25 = vpop.f32.mrf.mxu1 }
 0x1b9   : > { %7890 = vst [vmem:[#allocation12_spill] sm:$0xff] %v5975_v50  ;;  %1417 = vst.msk [vmem:[#allocation3 + $0x31] sm:$0xff] %vm393_vm8, %v5975_v50  ;;  %v5983_v9 = vadd.f32 %v5969_v33, %v1392_v51  ;;  %v1395_v12 = vadd.f32 %v5141_v63, %v1309_v7  ;;  %v1313_v16 = vadd.f32 %v5135_v25, %v1225_v37  ;;  %v6065_v7 = vld [vmem:[%s7885_s4 + $0x28] sm:$0xff]   ;;  %v6083_v63 = vld [vmem:[%s7885_s4 + $0x20] sm:$0xff]  }
 0x1ba   : > { %v1364_v6 = vpop.f32.mrf.mxu0  ;;  %v1294_v40 = vpop.f32.mrf.mxu1 }
 0x1bb   : > { %7891 = vst [vmem:[#allocation13_spill] sm:$0xff] %v5983_v9  ;;  %1415 = vst.msk [vmem:[#allocation3 + $0x11] sm:$0xff] %vm393_vm8, %v5983_v9  ;;  %v5990_v14 = vadd.f32 %v5969_v33, %v1395_v12  ;;  %v1393_v53 = vadd.f32 %v1364_v6, %v1307_v39  ;;  %v1311_v55 = vadd.f32 %v1294_v40, %v1223_v44 }
 0x1bc   : > { %v5144_v35 = vpop.f32.mrf.mxu0 }
 0x1bd   : > { %7893 = vst [vmem:[#allocation11_spill] sm:$0xff] %v5990_v14  ;;  %1418 = vst.msk [vmem:[#allocation3 + $0x41] sm:$0xff] %vm393_vm8, %v5990_v14  ;;  %v5996_v19 = vadd.f32 %v5969_v33, %v1393_v53  ;;  %v1398_v36 = vadd.f32 %v5144_v35, %v1312_v48  ;;  %v1671_v48 = vrot.slane %v6000_v52, 2  ;;  %v7901_v35 = vld [vmem:[#allocation9_spill] sm:$0xff] }
 0x1be   : > { %v1377_v42 = vpop.f32.mrf.mxu0 }
 0x1bf   : > { %7894 = vst [vmem:[#allocation14_spill] sm:$0xff] %v5996_v19  ;;  %1416 = vst.msk [vmem:[#allocation3 + $0x21] sm:$0xff] %vm393_vm8, %v5996_v19  ;;  %v6005_v24 = vadd.f32 %v5969_v33, %v1398_v36  ;;  %v1396_v47 = vadd.f32 %v1377_v42, %v1310_v38 }
 0x1c0   : > { %v5145_v17 = vpop.f32.mrf.mxu0  ;;  %v6014_v0 = vld [vmem:[#allocation3 + $0x30] sm:$0xff]  ;;  %v6020_v3 = vld [vmem:[#allocation3 + $0x38] sm:$0x3] }
 0x1c1   : > { %7896 = vst [vmem:[#allocation16_spill] sm:$0xff] %v6005_v24  ;;  %1421 = vst.msk [vmem:[#allocation3 + $0x71] sm:$0xff] %vm393_vm8, %v6005_v24  ;;  %v6012_v62 = vadd.f32 %v5969_v33, %v1396_v47  ;;  %v1399_v2 = vadd.f32 %v5145_v17, %v1313_v16  ;;  %v1474_v61 = vrot.slane %v6014_v0, 1  ;;  %v1475_v27 = vrot.slane %v6020_v3, 1 }
 0x1c2   : > { %v1380_v28 = vpop.f32.mrf.mxu0  ;;  %v6016_v58 = vld [vmem:[#allocation3 + $0x10] sm:$0xff]  ;;  %v6018_v56 = vld [vmem:[#allocation3 + $0x18] sm:$0x3] }
 0x1c3   : > { %7897 = vst [vmem:[#allocation17_spill] sm:$0xff] %v6012_v62  ;;  %1419 = vst.msk [vmem:[#allocation3 + $0x51] sm:$0xff] %vm393_vm8, %v6012_v62  ;;  %v6025_v20 = vadd.f32 %v5969_v33, %v1399_v2  ;;  %v1397_v32 = vadd.f32 %v1380_v28, %v1311_v55  ;;  %v1443_v49 = vpack.c.bf16 %v6016_v58, %v5998_v46  ;;  %v1468_v60 = vrot.slane %v6016_v58, 1 }
 0x1c4   : > { %v1469_v29 = vrot.slane %v6018_v56, 1  ;;  %v6042_v5 = vld [vmem:[#allocation3 + $0x40] sm:$0xff]  ;;  %v6051_v34 = vld [vmem:[#allocation3 + $0x48] sm:$0x3]  ;;  %v6074_v11 = vsel %vm525_vm6, %v1474_v61, %v1475_v27  ;;  %v1673_v53 = vrot.slane %v6016_v58, 2  ;;  %v1674_v26 = vrot.slane %v6018_v56, 2 }
 0x1c5   : > { %7898 = vst [vmem:[#allocation18_spill] sm:$0xff] %v6025_v20  ;;  %1422 = vst.msk [vmem:[#allocation3 + $0x81] sm:$0xff] %vm393_vm8, %v6025_v20  ;;  %v6037_v57 = vadd.f32 %v5969_v33, %v1397_v32  ;;  %5158 = vmatprep.mubr.msk.bf16.mxu0 %vm393_vm8, %v1443_v49  ;;  %v1477_v10 = vrot.slane %v6042_v5, 1  ;;  %v1478_v13 = vrot.slane %v6051_v34, 1  ;;  %v1672_v55 = vsel %vm725_vm7, %v7709_v59, %v1671_v48 }
 0x1c6   : > { %v6045_v8 = vsel %vm525_vm6, %v1468_v60, %v1469_v29  ;;  %v6047_v31 = vld [vmem:[#allocation3 + $0x20] sm:$0xff]  ;;  %v6049_v41 = vld [vmem:[#allocation3 + $0x28] sm:$0x3]  ;;  %v1675_v2 = vsel %vm725_vm7, %v1673_v53, %v1674_v26  ;;  %v1679_v61 = vrot.slane %v6014_v0, 2  ;;  %v1680_v27 = vrot.slane %v6020_v3, 2 }
 0x1c7   : > { %7899 = vst [vmem:[#allocation19_spill] sm:$0xff] %v6037_v57  ;;  %1420 = vst.msk [vmem:[#allocation3 + $0x61] sm:$0xff] %vm393_vm8, %v6037_v57  ;;  %v1497_v33 = vpack.c.bf16 %v6045_v8, %v1467_v1  ;;  %v6058_v30 = vpack.c.bf16 %v6014_v0, %v6047_v31  ;;  %v1471_v54 = vrot.slane %v6047_v31, 1  ;;  %v1472_v4 = vrot.slane %v6049_v41, 1 }
 0x1c8   : > { %v6078_v15 = vld [vmem:[#allocation3 + $0x70] sm:$0xff]  ;;  %v6089_v21 = vld [vmem:[#allocation3 + $0x78] sm:$0x3]  ;;  %v6106_v37 = vsel %vm525_vm6, %v1477_v10, %v1478_v13  ;;  %v1800_v45 = vpack.c.bf16 %v6047_v31, %v6016_v58  ;;  %v1702_v32 = vpack.c.bf16 %v1675_v2, %v1672_v55  ;;  %v1676_v49 = vrot.slane %v6047_v31, 2 }
 0x1c9   : > { %5148 = vmatprep.mubr.msk.bf16.mxu1 %vm393_vm8, %v1497_v33  ;;  %5159 = vmatmul.mubr.msk.bf16.vlgmr.msra.gmra.mxu0 %vm393_vm8, %v6058_v30  ;;  %v6071_v51 = vsel %vm525_vm6, %v1471_v54, %v1472_v4  ;;  %v1486_v36 = vrot.slane %v6078_v15, 1  ;;  %v1487_v40 = vrot.slane %v6089_v21, 1  ;;  %v1677_v60 = vrot.slane %v6049_v41, 2  ;;  %v5366_v4 = vld [vmem:[%s7885_s4 + $0x38] sm:$0xff]  }
 0x1ca   : > { %v6087_v22 = vpack.c.bf16 %v6074_v11, %v6071_v51  ;;  %v1433_v39 = vld [vmem:[#allocation3 + $0x50] sm:$0xff]  ;;  %v1434_v12 = vld [vmem:[#allocation3 + $0x58] sm:$0x3]  ;;  %5177 = vmatpush3.bf16.msra.mxu0 %v7900_v23  ;;  %v1682_v33 = vrot.slane %v6042_v5, 2  ;;  %v1683_v54 = vrot.slane %v6051_v34, 2  ;;  %v1801_v31 = vpack.c.bf16 %v6042_v5, %v6014_v0 }
 0x1cb   : > { %v6093_v18 = vpack.c.bf16 %v1433_v39, %v6042_v5  ;;  %v1480_v25 = vrot.slane %v1433_v39, 1  ;;  %v1481_v6 = vrot.slane %v1434_v12, 1  ;;  %5196 = vmatprep.subr.bf16.mxu0 %v6065_v7  ;;  %v6135_v56 = vsel %vm525_vm6, %v1486_v36, %v1487_v40  ;;  %v5365_v0 = vld [vmem:[%s7885_s4 + $0x30] sm:$0xff]  }
 0x1cc   : > { %5149 = vmatmul.mubr.msk.bf16.vlgmr.msra.gmra.mxu1 %vm393_vm8, %v6087_v22  ;;  %v1685_v1 = vrot.slane %v1433_v39, 2  ;;  %v1686_v29 = vrot.slane %v1434_v12, 2  ;;  %v1678_v41 = vsel %vm725_vm7, %v1676_v49, %v1677_v60  ;;  %v1681_v3 = vsel %vm725_vm7, %v1679_v61, %v1680_v27  ;;  %v5368_v60 = vld [vmem:[%s7903_s6 + $0x8] sm:$0xff]   ;;  %v6248_v61 = vld [vmem:[%s7903_s6 + $0x18] sm:$0xff]  }
 0x1cd   : > { %5167 = vmatpush3.bf16.msra.mxu1 %v7901_v35  ;;  %5162 = vmatprep.mubr.msk.bf16.mxu0 %vm393_vm8, %v6093_v18  ;;  %v6109_v38 = vsel %vm525_vm6, %v1480_v25, %v1481_v6  ;;  %v6161_v12 = vpack.c.bf16 %v1681_v3, %v1678_v41  ;;  %v1684_v34 = vsel %vm725_vm7, %v1682_v33, %v1683_v54  ;;  %v1439_v25 = vld [vmem:[#allocation3 + $0x80] sm:$0xff]  ;;  %v1692_v6 = vrot.slane %v6089_v21, 2  ;;  %v1440_v21 = vld [vmem:[#allocation3 + $0x88] sm:$0x3] }
 0x1ce   : > { %v6115_v52 = vpack.c.bf16 %v6109_v38, %v6106_v37  ;;  %v1435_v42 = vld [vmem:[#allocation3 + $0x60] sm:$0xff]  ;;  %v1436_v44 = vld [vmem:[#allocation3 + $0x68] sm:$0x3]  ;;  %5186 = vmatprep.subr.bf16.mxu1 %v6083_v63  ;;  %v1687_v13 = vsel %vm725_vm7, %v1685_v1, %v1686_v29  ;;  %v1803_v48 = vpack.c.bf16 %v1439_v25, %v6078_v15  ;;  %v2006_v26 = vpack.c.bf16 %v1678_v41, %v1675_v2  ;;  %v6206_v2 = vld [vmem:[#allocation3 + $0x90] sm:$0xff] }
 0x1cf   : > { %v6119_v16 = vpack.c.bf16 %v6078_v15, %v1435_v42  ;;  %v1483_v47 = vrot.slane %v1435_v42, 1  ;;  %v1484_v17 = vrot.slane %v1436_v44, 1  ;;  %v1802_v10 = vpack.c.bf16 %v1435_v42, %v1433_v39  ;;  %7902 = vst [vmem:[#allocation10_spill] sm:$0xff] %v6206_v2  ;;  %v5369_v1 = vld [vmem:[%s7903_s6] sm:$0xff]   ;;  %v6242_v29 = vld [vmem:[%s7903_s6 + $0x10] sm:$0xff]   ;;  %7905 = vst [vmem:[#allocation20_spill] sm:$0xff] %v6248_v61 }
 0x1d0   : > { %5152 = vmatprep.mubr.msk.bf16.mxu1 %vm393_vm8, %v6115_v52  ;;  %v6168_v5 = vpack.c.bf16 %v1687_v13, %v1684_v34  ;;  %v1688_v39 = vrot.slane %v1435_v42, 2  ;;  %v1689_v23 = vrot.slane %v1436_v44, 2  ;;  %v1904_v36 = vpack.c.bf16 %v6071_v51, %v6045_v8  ;;  %v5367_v8 = vld [vmem:[%s7885_s4 + $0x40] sm:$0xff]   ;;  %7904 = vst [vmem:[#allocation9_spill] sm:$0xff] %v6242_v29  ;;  %s6582_s4 = sld [smem:[#allocation4 + $0x17]] }
 0x1d1   : > { %5163 = vmatmul.mubr.msk.bf16.gmra.mxu0 %vm393_vm8, %v6119_v16  ;;  %v6132_v28 = vsel %vm525_vm6, %v1483_v47, %v1484_v17  ;;  %v2007_v40 = vpack.c.bf16 %v1684_v34, %v1681_v3  ;;  %v2002_v42 = vrot.slane %v1439_v25, 2  ;;  %v2003_v44 = vrot.slane %v1440_v21, 2 }
 0x1d2   : > { %5178 = vmatprep.mubr.msk.bf16.mxu0 %vm393_vm8, %v1800_v45  ;;  %v6140_v58 = vpack.c.bf16 %v6135_v56, %v6132_v28  ;;  %v1690_v53 = vsel %vm725_vm7, %v1688_v39, %v1689_v23  ;;  %v1905_v47 = vpack.c.bf16 %v6106_v37, %v6074_v11  ;;  %v1906_v51 = vpack.c.bf16 %v6132_v28, %v6109_v38  ;;  %v1442_v28 = vld [vmem:[#allocation3 + $0x98] sm:$0x3] }
 0x1d3   : > { %v1900_v17 = vrot.slane %v1439_v25, 1  ;;  %v1901_v45 = vrot.slane %v1440_v21, 1  ;;  %v2004_v55 = vsel %vm725_vm7, %v2002_v42, %v2003_v44  ;;  %v2193_v49 = vrot.slane %v1442_v28, 1 }
 0x1d4   : > { %5153 = vmatmul.mubr.msk.bf16.gmra.mxu1 %vm393_vm8, %v6140_v58 }
 0x1d5   : > { %5168 = vmatprep.mubr.msk.bf16.mxu1 %vm393_vm8, %v1702_v32  ;;  %v1902_v37 = vsel %vm525_vm6, %v1900_v17, %v1901_v45  ;;  %v7708_v32 = vrot.slane %v6206_v2, 1 }
 0x1d6   : > { %v1907_v38 = vpack.c.bf16 %v1902_v37, %v6135_v56  ;;  %v2104_v56 = vpack.c.bf16 %v6206_v2, %v1439_v25  ;;  %7959 = sst [smem:[#allocation47_spill]] %s6582_s4 }
 0x1d7   : > { %s6604_s4 = sld [smem:[#allocation4 + $0x22]] }
 0x1d9   : > { %5179 = vmatmul.mubr.msk.bf16.vlgmr.msra.gmra.mxu0 %vm393_vm8, %v1801_v31 }
 0x1da   : > { %5182 = vmatprep.mubr.msk.bf16.mxu0 %vm393_vm8, %v1802_v10  ;;  %5197 = vmatpush3.bf16.msra.mxu0 %v6065_v7  ;;  %v1691_v7 = vrot.slane %v6078_v15, 2  ;;  %v2008_v15 = vpack.c.bf16 %v1690_v53, %v1687_v13 }
 0x1db   : > { %5216 = vmatprep.subr.bf16.mxu0 %v5366_v4 }
 0x1dc   : > { %5169 = vmatmul.mubr.msk.bf16.vlgmr.msra.gmra.mxu1 %vm393_vm8, %v6161_v12  ;;  %v1693_v35 = vsel %vm725_vm7, %v1691_v7, %v1692_v6 }
 0x1dd   : > { %5187 = vmatpush3.bf16.msra.mxu1 %v6083_v63  ;;  %5172 = vmatprep.mubr.msk.bf16.mxu1 %vm393_vm8, %v6168_v5  ;;  %v1705_v63 = vpack.c.bf16 %v1693_v35, %v1690_v53  ;;  %v2009_v11 = vpack.c.bf16 %v2004_v55, %v1693_v35  ;;  %7970 = sst [smem:[#allocation58_spill]] %s6604_s4 }
 0x1de   : > { %5206 = vmatprep.subr.bf16.mxu1 %v5365_v0  ;;  %s6626_s4 = sld [smem:[#allocation4 + $0x2d]] }
 0x1e1   : > { %5183 = vmatmul.mubr.msk.bf16.gmra.mxu0 %vm393_vm8, %v1803_v48 }
 0x1e2   : > { %5198 = vmatprep.mubr.msk.bf16.mxu0 %vm393_vm8, %v2006_v26 }
 0x1e4   : > { %5173 = vmatmul.mubr.msk.bf16.gmra.mxu1 %vm393_vm8, %v1705_v63 }
 0x1e5   : > { %5188 = vmatprep.mubr.msk.bf16.mxu1 %vm393_vm8, %v1904_v36 }
 0x1e9   : > { %5199 = vmatmul.mubr.msk.bf16.vlgmr.msra.gmra.mxu0 %vm393_vm8, %v2007_v40 }
 0x1ea   : > { %5202 = vmatprep.mubr.msk.bf16.mxu0 %vm393_vm8, %v2008_v15  ;;  %5217 = vmatpush3.bf16.msra.mxu0 %v5366_v4 }
 0x1eb   : > { %5236 = vmatprep.subr.bf16.mxu0 %v5368_v60 }
 0x1ec   : > { %5189 = vmatmul.mubr.msk.bf16.vlgmr.msra.gmra.mxu1 %vm393_vm8, %v1905_v47 }
 0x1ed   : > { %5207 = vmatpush3.bf16.msra.mxu1 %v5365_v0  ;;  %5192 = vmatprep.mubr.msk.bf16.mxu1 %vm393_vm8, %v1906_v51 }
 0x1ee   : > { %5226 = vmatprep.subr.bf16.mxu1 %v5367_v8 }
 0x1f1   : > { %5203 = vmatmul.mubr.msk.bf16.gmra.mxu0 %vm393_vm8, %v2009_v11 }
 0x1f2   : > { %5218 = vmatprep.mubr.msk.bf16.mxu0 %vm393_vm8, %v6087_v22  ;;  %v2194_v22 = vsel %vm525_vm6, %v7708_v32, %v2193_v49 }
 0x1f4   : > { %5193 = vmatmul.mubr.msk.bf16.gmra.mxu1 %vm393_vm8, %v1907_v38 }
 0x1f5   : > { %5208 = vmatprep.mubr.msk.bf16.mxu1 %vm393_vm8, %v6058_v30  ;;  %v2196_v30 = vpack.c.bf16 %v2194_v22, %v1902_v37 }
 0x1f9   : > { %5219 = vmatmul.mubr.msk.bf16.vlgmr.msra.gmra.mxu0 %vm393_vm8, %v6115_v52  ;;  %v2283_v52 = vrot.slane %v1442_v28, 2 }
 0x1fa   : > { %5222 = vmatprep.mubr.msk.bf16.mxu0 %vm393_vm8, %v6140_v58  ;;  %5237 = vmatpush3.bf16.msra.mxu0 %v5368_v60 }
 0x1fb   : > { %5256 = vmatprep.subr.bf16.mxu0 %v6242_v29 }
 0x1fc   : > { %5209 = vmatmul.mubr.msk.bf16.vlgmr.msra.gmra.mxu1 %vm393_vm8, %v6093_v18  ;;  %v7707_v18 = vrot.slane %v6206_v2, 2 }
 0x1fd   : > { %5227 = vmatpush3.bf16.msra.mxu1 %v5367_v8  ;;  %5212 = vmatprep.mubr.msk.bf16.mxu1 %vm393_vm8, %v6119_v16 }
 0x1fe   : > { %v2284_v16 = vsel %vm725_vm7, %v7707_v18, %v2283_v52  ;;  %5246 = vmatprep.subr.bf16.mxu1 %v5369_v1 }
 0x1ff   : > { %v2286_v58 = vpack.c.bf16 %v2284_v16, %v2004_v55 }
 0x201   : > { %5223 = vmatmul.mubr.msk.bf16.gmra.mxu0 %vm393_vm8, %v2196_v30 }
 0x204   : > { %5213 = vmatmul.mubr.msk.bf16.gmra.mxu1 %vm393_vm8, %v2104_v56 }
 0x205   : > { %5228 = vmatprep.mubr.msk.bf16.mxu1 %vm393_vm8, %v6161_v12 }
 0x20c   : > { %5229 = vmatmul.mubr.msk.bf16.vlgmr.msra.gmra.mxu1 %vm393_vm8, %v6168_v5 }
 0x20d   : > { %5232 = vmatprep.mubr.msk.bf16.mxu1 %vm393_vm8, %v1705_v63  ;;  %5247 = vmatpush3.bf16.msra.mxu1 %v5369_v1 }
 0x20e   : > { %5266 = vmatprep.subr.bf16.mxu1 %v6248_v61 }
 0x214   : > { %5233 = vmatmul.mubr.msk.bf16.gmra.mxu1 %vm393_vm8, %v2286_v58 }
 0x289   : > { %v5160_v27 = vpop.f32.mrf.mxu0 }
 0x28b   : > { %v1639_v33 = vpop.f32.mrf.mxu0 }
 0x28c   : > { %v5150_v54 = vpop.f32.mrf.mxu1 }
 0x28d   : > { %v5161_v31 = vpop.f32.mrf.mxu0  ;;  %v1648_v1 = vadd.f32 %v5160_v27, %v5150_v54 }
 0x28e   : > { %v1556_v41 = vpop.f32.mrf.mxu1 }
 0x28f   : > { %v1642_v4 = vpop.f32.mrf.mxu0  ;;  %v1640_v32 = vadd.f32 %v1639_v33, %v1556_v41 }
 0x290   : > { %v5151_v10 = vpop.f32.mrf.mxu1 }
 0x291   : > { %v5164_v13 = vpop.f32.mrf.mxu0  ;;  %v1651_v24 = vadd.f32 %v5161_v31, %v5151_v10 }
 0x292   : > { %v1559_v3 = vpop.f32.mrf.mxu1 }
 0x293   : > { %v1655_v12 = vpop.f32.mrf.mxu0  ;;  %v1643_v14 = vadd.f32 %v1642_v4, %v1559_v3 }
 0x294   : > { %v5154_v34 = vpop.f32.mrf.mxu1 }
 0x295   : > { %v5165_v0 = vpop.f32.mrf.mxu0  ;;  %v1664_v9 = vadd.f32 %v5164_v13, %v5154_v34 }
 0x296   : > { %v1572_v5 = vpop.f32.mrf.mxu1 }
 0x297   : > { %v6251_v39 = vpop.f32.mrf.mxu0 }
 0x298   : > { %v5155_v23 = vpop.f32.mrf.mxu1 }
 0x299   : > { %v5180_v25 = vpop.f32.mrf.mxu0  ;;  %v1667_v41 = vadd.f32 %v5165_v0, %v5155_v23 }
 0x29a   : > { %v1575_v7 = vpop.f32.mrf.mxu1 }
 0x29b   : > { %v1859_v6 = vpop.f32.mrf.mxu0 }
 0x29c   : > { %v5170_v48 = vpop.f32.mrf.mxu1 }
 0x29d   : > { %v5181_v53 = vpop.f32.mrf.mxu0  ;;  %v1794_v59 = vadd.f32 %v5170_v48, %v1648_v1 }
 0x29e   : > { %v1761_v26 = vpop.f32.mrf.mxu1 }
 0x29f   : > { %v1862_v35 = vpop.f32.mrf.mxu0  ;;  %v1792_v57 = vadd.f32 %v1761_v26, %v1640_v32  ;;  %v1892_v19 = vadd.f32 %v5180_v25, %v1794_v59 }
 0x2a0   : > { %v5171_v63 = vpop.f32.mrf.mxu1 }
 0x2a1   : > { %v5184_v36 = vpop.f32.mrf.mxu0  ;;  %v1795_v50 = vadd.f32 %v5171_v63, %v1651_v24  ;;  %v1659_v24 = vadd.f32 %v6251_v39, %v1575_v7 }
 0x2a2   : > { %v1764_v21 = vpop.f32.mrf.mxu1 }
 0x2a3   : > { %v1875_v40 = vpop.f32.mrf.mxu0  ;;  %v1793_v61 = vadd.f32 %v1764_v21, %v1643_v14  ;;  %v1893_v33 = vadd.f32 %v5181_v53, %v1795_v50 }
 0x2a4   : > { %v5174_v15 = vpop.f32.mrf.mxu1 }
 0x2a5   : > { %v6253_v42 = vpop.f32.mrf.mxu0  ;;  %v1891_v10 = vadd.f32 %v1862_v35, %v1793_v61 }
 0x2a6   : > { %v1777_v44 = vpop.f32.mrf.mxu1 }
 0x2a7   : > { %v6255_v47 = vpop.f32.mrf.mxu0 }
 0x2a8   : > { %v5175_v8 = vpop.f32.mrf.mxu1 }
 0x2a9   : > { %v5200_v51 = vpop.f32.mrf.mxu0  ;;  %v1799_v59 = vadd.f32 %v5175_v8, %v1667_v41 }
 0x2aa   : > { %v1780_v17 = vpop.f32.mrf.mxu1 }
 0x2ab   : > { %v2065_v45 = vpop.f32.mrf.mxu0 }
 0x2ac   : > { %v5190_v55 = vpop.f32.mrf.mxu1 }
 0x2ad   : > { %v5201_v11 = vpop.f32.mrf.mxu0  ;;  %v1996_v46 = vadd.f32 %v5190_v55, %v1892_v19 }
 0x2ae   : > { %v1963_v37 = vpop.f32.mrf.mxu1 }
 0x2af   : > { %v2068_v38 = vpop.f32.mrf.mxu0  ;;  %v2098_v4 = vadd.f32 %v5200_v51, %v1996_v46 }
 0x2b0   : > { %v5191_v28 = vpop.f32.mrf.mxu1 }
 0x2b1   : > { %v5204_v49 = vpop.f32.mrf.mxu0  ;;  %v1997_v32 = vadd.f32 %v5191_v28, %v1893_v33 }
 0x2b2   : > { %v1966_v22 = vpop.f32.mrf.mxu1 }
 0x2b3   : > { %v6257_v30 = vpop.f32.mrf.mxu0  ;;  %v1995_v14 = vadd.f32 %v1966_v22, %v1891_v10  ;;  %v2099_v23 = vadd.f32 %v5201_v11, %v1997_v32 }
 0x2b4   : > { %7906 = vst [vmem:[#allocation21_spill] sm:$0xff] %v6257_v30  ;;  %v5194_v56 = vpop.f32.mrf.mxu1  ;;  %v1798_v30 = vadd.f32 %v5174_v15, %v1664_v9 }
 0x2b5   : > { %v6259_v52 = vpop.f32.mrf.mxu0  ;;  %v2097_v53 = vadd.f32 %v2068_v38, %v1995_v14 }
 0x2b6   : > { %7907 = vst [vmem:[#allocation22_spill] sm:$0xff] %v6259_v52  ;;  %v1979_v16 = vpop.f32.mrf.mxu1  ;;  %v1890_v52 = vadd.f32 %v1859_v6, %v1792_v57  ;;  %v1896_v13 = vadd.f32 %v5184_v36, %v1798_v30  ;;  %v1897_v6 = vadd.f32 %v6253_v42, %v1799_v59  ;;  %v4774_v36 = vld [vmem:[%s7909_s5] ss:$0 sm:$0xff]  ;;  %s6584_s5 = sld [smem:[#allocation4 + $0x18]] }
 0x2b7   : > { %v6261_v58 = vpop.f32.mrf.mxu0 }
 0x2b8   : > { %7908 = vst [vmem:[#allocation23_spill] sm:$0xff] %v6261_v58  ;;  %v5195_v60 = vpop.f32.mrf.mxu1  ;;  %v1656_v58 = vadd.f32 %v1655_v12, %v1572_v5  ;;  %v1994_v54 = vadd.f32 %v1963_v37, %v1890_v52  ;;  %v1797_v12 = vadd.f32 %v1780_v17, %v1659_v24  ;;  %v2000_v9 = vadd.f32 %v5194_v56, %v1896_v13  ;;  %v6275_v13 = vld [vmem:[#allocation3 + $0x8] sm:$0x3] }
 0x2b9   : > { %v5220_v43 = vpop.f32.mrf.mxu0  ;;  %v2001_v7 = vadd.f32 %v5195_v60, %v1897_v6 }
 0x2ba   : > { %v1982_v18 = vpop.f32.mrf.mxu1  ;;  %v1796_v48 = vadd.f32 %v1777_v44, %v1656_v58  ;;  %v2096_v57 = vadd.f32 %v2065_v45, %v1994_v54  ;;  %v1895_v26 = vadd.f32 %v6255_v47, %v1797_v12 }
 0x2bb   : > { %v2243_v2 = vpop.f32.mrf.mxu0  ;;  %v7910_v42 = vld [vmem:[#allocation21_spill] sm:$0xff] }
 0x2bc   : > { %v5210_v20 = vpop.f32.mrf.mxu1  ;;  %v1894_v34 = vadd.f32 %v1875_v40, %v1796_v48  ;;  %v1999_v15 = vadd.f32 %v1982_v18, %v1895_v26  ;;  %7960 = sst [smem:[#allocation48_spill]] %s6584_s5 }
 0x2bd   : > { %v5221_v1 = vpop.f32.mrf.mxu0  ;;  %v2184_v19 = vadd.f32 %v5210_v20, %v2098_v4  ;;  %v2102_v20 = vadd.f32 %v5204_v49, %v2000_v9  ;;  %v7911_v55 = vld [vmem:[#allocation22_spill] sm:$0xff]  ;;  %s6606_s5 = sld [smem:[#allocation4 + $0x23]] }
 0x2be   : > { %v2151_v62 = vpop.f32.mrf.mxu1  ;;  %v1998_v25 = vadd.f32 %v1979_v16, %v1894_v34  ;;  %v2103_v11 = vadd.f32 %v7911_v55, %v2001_v7  ;;  %v7913_v7 = vld [vmem:[#allocation15_spill] sm:$0xff]  ;;  %s8005_s3 = sld [smem:[#allocation48_spill]] }
 0x2bf   : > { %v2246_v5 = vpop.f32.mrf.mxu0  ;;  %v2182_v0 = vadd.f32 %v2151_v62, %v2096_v57  ;;  %v2276_v39 = vadd.f32 %v5220_v43, %v2184_v19  ;;  %v7912_v30 = vld [vmem:[#allocation23_spill] sm:$0xff] }
 0x2c0   : > { %v5211_v29 = vpop.f32.mrf.mxu1  ;;  %v2100_v8 = vadd.f32 %v7910_v42, %v1998_v25  ;;  %v2101_v56 = vadd.f32 %v7912_v30, %v1999_v15 }
 0x2c1   : > { %v2185_v46 = vadd.f32 %v5211_v29, %v2099_v23  ;;  %v5224_v35 = vpop.f32.mrf.mxu0  ;;  %v2274_v40 = vadd.f32 %v2243_v2, %v2182_v0 }
 0x2c2   : > { %v2154_v27 = vpop.f32.mrf.mxu1 }
 0x2c3   : > { %v2183_v21 = vadd.f32 %v2154_v27, %v2097_v53  ;;  %v2277_v17 = vadd.f32 %v5221_v1, %v2185_v46  ;;  %v2259_v45 = vpop.f32.mrf.mxu0  ;;  %7971 = sst [smem:[#allocation59_spill]] %s6606_s5 }
 0x2c4   : > { %v5214_v31 = vpop.f32.mrf.mxu1  ;;  %s6628_s5 = sld [smem:[#allocation4 + $0x2e]] }
 0x2c5   : > { %v2188_v44 = vadd.f32 %v5214_v31, %v2102_v20  ;;  %v2275_v22 = vadd.f32 %v2246_v5, %v2183_v21  ;;  %v5225_v27 = vpop.f32.mrf.mxu0  ;;  %v2446_v5 = vrot.slane %v6275_v13, 1  ;;  %v7914_v20 = vrot.slane %v7913_v7, 1 }
 0x2c6   : > { %v2167_v3 = vpop.f32.mrf.mxu1 }
 0x2c7   : > { %v2186_v47 = vadd.f32 %v2167_v3, %v2100_v8  ;;  %v2280_v18 = vadd.f32 %v5224_v35, %v2188_v44  ;;  %v2262_v3 = vpop.f32.mrf.mxu0 }
 0x2c8   : > { %v5215_v50 = vpop.f32.mrf.mxu1 }
 0x2c9   : > { %v2189_v52 = vadd.f32 %v5215_v50, %v2103_v11  ;;  %v2278_v33 = vadd.f32 %v2259_v45, %v2186_v47  ;;  %v6322_v47 = vld [vmem:[%s7903_s6 + $0x28] sm:$0xff]  }
 0x2ca   : > { %v2170_v61 = vpop.f32.mrf.mxu1  ;;  %7981 = sst [smem:[#allocation69_spill]] %s6628_s5 }
 0x2cb   : > { %v2187_v41 = vadd.f32 %v2170_v61, %v2101_v56  ;;  %v2281_v59 = vadd.f32 %v5225_v27, %v2189_v52  ;;  %s6646_s5 = sld [smem:[#allocation4 + $0x37]] }
 0x2cc   : > { %v5230_v63 = vpop.f32.mrf.mxu1 }
 0x2cd   : > { %v2366_v62 = vadd.f32 %v5230_v63, %v2276_v39  ;;  %v2279_v9 = vadd.f32 %v2262_v3, %v2187_v41  ;;  %v2447_v63 = vsel %vm525_vm6, %v7914_v20, %v2446_v5  ;;  %v5375_v20 = vld [vmem:[%s7903_s6 + $0x38] sm:$0xff]  }
 0x2ce   : > { %v2333_v29 = vpop.f32.mrf.mxu1 }
 0x2cf   : > { %v2381_v51 = vadd.f32 %v4774_v36, %v2366_v62  ;;  %v2364_v43 = vadd.f32 %v2333_v29, %v2274_v40 }
 0x2d0   : > { %v5231_v37 = vpop.f32.mrf.mxu1 }
 0x2d1   : > { %v2389_v38 = vmax.f32 %v2381_v51, 0.0  ;;  %v2379_v28 = vadd.f32 %v4774_v36, %v2364_v43  ;;  %v2367_v49 = vadd.f32 %v5231_v37, %v2277_v17  ;;  %7989 = sst [smem:[#allocation77_spill]] %s6646_s5 }
 0x2d2   : > { %v2336_v2 = vpop.f32.mrf.mxu1  ;;  %s6662_s5 = sld [smem:[#allocation4 + $0x3f]] }
 0x2d3   : > { %2397 = vst.msk [vmem:[#allocation3 + $0x31] sm:$0xff] %vm393_vm8, %v2389_v38  ;;  %v2387_v16 = vmax.f32 %v2379_v28, 0.0  ;;  %v2382_v58 = vadd.f32 %v4774_v36, %v2367_v49  ;;  %v2365_v60 = vadd.f32 %v2336_v2, %v2275_v22  ;;  %v6340_v49 = vld [vmem:[%s7903_s6 + $0x20] sm:$0xff]  }
 0x2d4   : > { %v5234_v54 = vpop.f32.mrf.mxu1 }
 0x2d5   : > { %2395 = vst.msk [vmem:[#allocation3 + $0x11] sm:$0xff] %vm393_vm8, %v2387_v16  ;;  %v2390_v48 = vmax.f32 %v2382_v58, 0.0  ;;  %v2380_v1 = vadd.f32 %v4774_v36, %v2365_v60  ;;  %v2370_v31 = vadd.f32 %v5234_v54, %v2280_v18  ;;  %v7915_v18 = vld [vmem:[#allocation20_spill] sm:$0xff]  ;;  %v2651_v60 = vrot.slane %v6275_v13, 2 }
 0x2d6   : > { %v2349_v32 = vpop.f32.mrf.mxu1 }
 0x2d7   : > { %2398 = vst.msk [vmem:[#allocation3 + $0x41] sm:$0xff] %vm393_vm8, %v2390_v48  ;;  %v2388_v10 = vmax.f32 %v2380_v1, 0.0  ;;  %v2385_v4 = vadd.f32 %v4774_v36, %v2370_v31  ;;  %v2368_v24 = vadd.f32 %v2349_v32, %v2278_v33  ;;  %v7916_v33 = vld [vmem:[#allocation9_spill] sm:$0xff] }
 0x2d8   : > { %v5235_v14 = vpop.f32.mrf.mxu1  ;;  %7995 = sst [smem:[#allocation83_spill]] %s6662_s5 }
 0x2d9   : > { %2396 = vst.msk [vmem:[#allocation3 + $0x21] sm:$0xff] %vm393_vm8, %v2388_v10  ;;  %v2393_v19 = vmax.f32 %v2385_v4, 0.0  ;;  %v2383_v57 = vadd.f32 %v4774_v36, %v2368_v24  ;;  %v2371_v12 = vadd.f32 %v5235_v14, %v2281_v59  ;;  %v7917_v14 = vrot.slane %v7913_v7, 2  ;;  %s6681_s5 = sld [smem:[#allocation4 + $0x45]] }
 0x2da   : > { %v2352_v34 = vpop.f32.mrf.mxu1  ;;  %v6280_v25 = vld [vmem:[#allocation3 + $0x30] sm:$0xff]  ;;  %v6286_v46 = vld [vmem:[#allocation3 + $0x38] sm:$0x3] }
 0x2db   : > { %2401 = vst.msk [vmem:[#allocation3 + $0x71] sm:$0xff] %vm393_vm8, %v2393_v19  ;;  %v2391_v50 = vmax.f32 %v2383_v57, 0.0  ;;  %v2386_v0 = vadd.f32 %v4774_v36, %v2371_v12  ;;  %v2369_v23 = vadd.f32 %v2352_v34, %v2279_v9  ;;  %v2454_v40 = vrot.slane %v6280_v25, 1 }
 0x2dc   : > { %v6282_v6 = vld [vmem:[#allocation3 + $0x10] sm:$0xff]  ;;  %v6284_v61 = vld [vmem:[#allocation3 + $0x18] sm:$0x3]  ;;  %v2652_v19 = vsel %vm725_vm7, %v7917_v14, %v2651_v60 }
 0x2dd   : > { %2399 = vst.msk [vmem:[#allocation3 + $0x51] sm:$0xff] %vm393_vm8, %v2391_v50  ;;  %v2394_v53 = vmax.f32 %v2386_v0, 0.0  ;;  %v2384_v39 = vadd.f32 %v4774_v36, %v2369_v23  ;;  %v2423_v26 = vpack.c.bf16 %v6282_v6, %v7913_v7  ;;  %v2448_v35 = vrot.slane %v6282_v6, 1 }
 0x2de   : > { %v2449_v21 = vrot.slane %v6284_v61, 1  ;;  %v2455_v36 = vrot.slane %v6286_v46, 1  ;;  %v6300_v15 = vld [vmem:[#allocation3 + $0x40] sm:$0xff]  ;;  %v6309_v29 = vld [vmem:[#allocation3 + $0x48] sm:$0x3]  ;;  %v2653_v27 = vrot.slane %v6282_v6, 2 }
 0x2df   : > { %2402 = vst.msk [vmem:[#allocation3 + $0x81] sm:$0xff] %vm393_vm8, %v2394_v53  ;;  %v2392_v62 = vmax.f32 %v2384_v39, 0.0  ;;  %5248 = vmatprep.mubr.msk.bf16.mxu1 %vm393_vm8, %v2423_v26  ;;  %v2457_v37 = vrot.slane %v6300_v15, 1  ;;  %v2458_v38 = vrot.slane %v6309_v29, 1  ;;  %v2654_v54 = vrot.slane %v6284_v61, 2  ;;  %8000 = sst [smem:[#allocation88_spill]] %s6681_s5 }
 0x2e0   : > { %v6303_v44 = vsel %vm525_vm6, %v2448_v35, %v2449_v21  ;;  %v6305_v42 = vld [vmem:[#allocation3 + $0x20] sm:$0xff]  ;;  %v6307_v8 = vld [vmem:[#allocation3 + $0x28] sm:$0x3]  ;;  %v6331_v11 = vsel %vm525_vm6, %v2454_v40, %v2455_v36  ;;  %v2659_v61 = vrot.slane %v6280_v25, 2  ;;  %v2660_v53 = vrot.slane %v6286_v46, 2  ;;  %s8010_s5 = sld [smem:[#allocation52_spill]] }
 0x2e1   : > { %2400 = vst.msk [vmem:[#allocation3 + $0x61] sm:$0xff] %vm393_vm8, %v2392_v62  ;;  %v2477_v51 = vpack.c.bf16 %v6303_v44, %v2447_v63  ;;  %v6315_v43 = vpack.c.bf16 %v6280_v25, %v6305_v42  ;;  %v2451_v17 = vrot.slane %v6305_v42, 1  ;;  %v2452_v45 = vrot.slane %v6307_v8, 1  ;;  %s8051_s0 = sld [smem:[#allocation88_spill]] }
 0x2e2   : > { %v6335_v28 = vld [vmem:[#allocation3 + $0x70] sm:$0xff]  ;;  %v6346_v2 = vld [vmem:[#allocation3 + $0x78] sm:$0x3]  ;;  %v6362_v41 = vsel %vm525_vm6, %v2457_v37, %v2458_v38  ;;  %v2780_v3 = vpack.c.bf16 %v6305_v42, %v6282_v6  ;;  %v2655_v57 = vsel %vm725_vm7, %v2653_v27, %v2654_v54  ;;  %v2656_v50 = vrot.slane %v6305_v42, 2 }
 0x2e3   : > { %5238 = vmatprep.mubr.msk.bf16.mxu0 %vm393_vm8, %v2477_v51  ;;  %5249 = vmatmul.mubr.msk.bf16.vlgmr.msra.gmra.mxu1 %vm393_vm8, %v6315_v43  ;;  %v6328_v55 = vsel %vm525_vm6, %v2451_v17, %v2452_v45  ;;  %v2466_v1 = vrot.slane %v6335_v28, 1  ;;  %v2467_v31 = vrot.slane %v6346_v2, 1  ;;  %v2682_v5 = vpack.c.bf16 %v2655_v57, %v2652_v19 }
 0x2e4   : > { %v6344_v22 = vpack.c.bf16 %v6331_v11, %v6328_v55  ;;  %v2413_v30 = vld [vmem:[#allocation3 + $0x50] sm:$0xff]  ;;  %v2414_v56 = vld [vmem:[#allocation3 + $0x58] sm:$0x3]  ;;  %5267 = vmatpush3.bf16.msra.mxu1 %v7915_v18  ;;  %v2657_v0 = vrot.slane %v6307_v8, 2  ;;  %v2662_v39 = vrot.slane %v6300_v15, 2  ;;  %v2663_v7 = vrot.slane %v6309_v29, 2 }
 0x2e5   : > { %v6350_v52 = vpack.c.bf16 %v2413_v30, %v6300_v15  ;;  %v2460_v16 = vrot.slane %v2413_v30, 1  ;;  %v2461_v58 = vrot.slane %v2414_v56, 1  ;;  %5286 = vmatprep.subr.bf16.mxu1 %v6322_v47  ;;  %v6391_v9 = vsel %vm525_vm6, %v2466_v1, %v2467_v31  ;;  %v7918_v1 = vld [vmem:[#allocation10_spill] sm:$0xff] }
 0x2e6   : > { %5239 = vmatmul.mubr.msk.bf16.vlgmr.msra.gmra.mxu0 %vm393_vm8, %v6344_v22  ;;  %v2665_v23 = vrot.slane %v2413_v30, 2  ;;  %v2666_v6 = vrot.slane %v2414_v56, 2  ;;  %v2781_v26 = vpack.c.bf16 %v6300_v15, %v6280_v25  ;;  %v2658_v35 = vsel %vm725_vm7, %v2656_v50, %v2657_v0  ;;  %v5374_v25 = vld [vmem:[%s7903_s6 + $0x30] sm:$0xff]   ;;  %v2419_v8 = vld [vmem:[#allocation3 + $0x80] sm:$0xff] }
 0x2e7   : > { %5257 = vmatpush3.bf16.msra.mxu0 %v7916_v33  ;;  %5252 = vmatprep.mubr.msk.bf16.mxu1 %vm393_vm8, %v6350_v52  ;;  %v6365_v48 = vsel %vm525_vm6, %v2460_v16, %v2461_v58  ;;  %v2661_v46 = vsel %vm725_vm7, %v2659_v61, %v2660_v53  ;;  %v2664_v40 = vsel %vm725_vm7, %v2662_v39, %v2663_v7  ;;  %v2671_v29 = vrot.slane %v6335_v28, 2 }
 0x2e8   : > { %v6371_v32 = vpack.c.bf16 %v6365_v48, %v6362_v41  ;;  %v2415_v10 = vld [vmem:[#allocation3 + $0x60] sm:$0xff]  ;;  %v2416_v4 = vld [vmem:[#allocation3 + $0x68] sm:$0x3]  ;;  %5276 = vmatprep.subr.bf16.mxu0 %v6340_v49  ;;  %v2667_v21 = vsel %vm725_vm7, %v2665_v23, %v2666_v6  ;;  %v2683_v62 = vpack.c.bf16 %v2661_v46, %v2658_v35  ;;  %v2672_v51 = vrot.slane %v6346_v2, 2 }
 0x2e9   : > { %v6375_v24 = vpack.c.bf16 %v6335_v28, %v2415_v10  ;;  %v2463_v59 = vrot.slane %v2415_v10, 1  ;;  %v2464_v13 = vrot.slane %v2416_v4, 1  ;;  %v2782_v63 = vpack.c.bf16 %v2415_v10, %v2413_v30  ;;  %v2420_v30 = vld [vmem:[#allocation3 + $0x88] sm:$0x3] }
 0x2ea   : > { %5242 = vmatprep.mubr.msk.bf16.mxu0 %vm393_vm8, %v6371_v32  ;;  %v2684_v36 = vpack.c.bf16 %v2667_v21, %v2664_v40  ;;  %v2668_v15 = vrot.slane %v2415_v10, 2  ;;  %v2669_v42 = vrot.slane %v2416_v4, 2  ;;  %v2783_v17 = vpack.c.bf16 %v2419_v8, %v6335_v28 }
 0x2eb   : > { %5253 = vmatmul.mubr.msk.bf16.gmra.mxu1 %vm393_vm8, %v6375_v24  ;;  %v6388_v12 = vsel %vm525_vm6, %v2463_v59, %v2464_v13  ;;  %v2673_v37 = vsel %vm725_vm7, %v2671_v29, %v2672_v51  ;;  %v2987_v56 = vpack.c.bf16 %v2664_v40, %v2661_v46  ;;  %v2982_v2 = vrot.slane %v2419_v8, 2 }
 0x2ec   : > { %5268 = vmatprep.mubr.msk.bf16.mxu1 %vm393_vm8, %v2780_v3  ;;  %v6396_v34 = vpack.c.bf16 %v6391_v9, %v6388_v12  ;;  %v2670_v45 = vsel %vm725_vm7, %v2668_v15, %v2669_v42  ;;  %v2983_v18 = vrot.slane %v2420_v30, 2  ;;  %v2885_v16 = vpack.c.bf16 %v6362_v41, %v6331_v11  ;;  %v2422_v41 = vld [vmem:[#allocation3 + $0x98] sm:$0x3] }
 0x2ed   : > { %v2685_v38 = vpack.c.bf16 %v2673_v37, %v2670_v45  ;;  %v2988_v28 = vpack.c.bf16 %v2670_v45, %v2667_v21  ;;  %v2880_v58 = vrot.slane %v2419_v8, 1  ;;  %v2881_v60 = vrot.slane %v2420_v30, 1 }
 0x2ee   : > { %5243 = vmatmul.mubr.msk.bf16.gmra.mxu0 %vm393_vm8, %v6396_v34  ;;  %v2984_v27 = vsel %vm725_vm7, %v2982_v2, %v2983_v18  ;;  %v3084_v10 = vpack.c.bf16 %v7918_v1, %v2419_v8 }
 0x2ef   : > { %5258 = vmatprep.mubr.msk.bf16.mxu0 %vm393_vm8, %v2682_v5  ;;  %v2989_v11 = vpack.c.bf16 %v2984_v27, %v2673_v37  ;;  %v2882_v54 = vsel %vm525_vm6, %v2880_v58, %v2881_v60 }
 0x2f0   : > { %v2887_v33 = vpack.c.bf16 %v2882_v54, %v6391_v9 }
 0x2f3   : > { %5269 = vmatmul.mubr.msk.bf16.vlgmr.msra.gmra.mxu1 %vm393_vm8, %v2781_v26 }
 0x2f4   : > { %5272 = vmatprep.mubr.msk.bf16.mxu1 %vm393_vm8, %v2782_v63  ;;  %5287 = vmatpush3.bf16.msra.mxu1 %v6322_v47  ;;  %v2986_v47 = vpack.c.bf16 %v2658_v35, %v2655_v57 }
 0x2f5   : > { %5306 = vmatprep.subr.bf16.mxu1 %v5375_v20 }
 0x2f6   : > { %5259 = vmatmul.mubr.msk.bf16.vlgmr.msra.gmra.mxu0 %vm393_vm8, %v2683_v62 }
 0x2f7   : > { %5277 = vmatpush3.bf16.msra.mxu0 %v6340_v49  ;;  %5262 = vmatprep.mubr.msk.bf16.mxu0 %vm393_vm8, %v2684_v36  ;;  %v2884_v49 = vpack.c.bf16 %v6328_v55, %v6303_v44  ;;  %v5376_v44 = vld [vmem:[%s7903_s6 + $0x40] sm:$0xff]   ;;  %v2886_v55 = vpack.c.bf16 %v6388_v12, %v6365_v48  ;;  %v3173_v48 = vrot.slane %v2422_v41, 1  ;;  %s6586_s6 = sld [smem:[#allocation4 + $0x19]] }
 0x2f8   : > { %5296 = vmatprep.subr.bf16.mxu0 %v5374_v25 }
 0x2fb   : > { %5273 = vmatmul.mubr.msk.bf16.gmra.mxu1 %vm393_vm8, %v2783_v17 }
 0x2fc   : > { %5288 = vmatprep.mubr.msk.bf16.mxu1 %vm393_vm8, %v2986_v47 }
 0x2fd   : > { %7961 = sst [smem:[#allocation49_spill]] %s6586_s6 }
 0x2fe   : > { %5263 = vmatmul.mubr.msk.bf16.gmra.mxu0 %vm393_vm8, %v2685_v38  ;;  %s6608_s6 = sld [smem:[#allocation4 + $0x24]] }
 0x2ff   : > { %5278 = vmatprep.mubr.msk.bf16.mxu0 %vm393_vm8, %v2884_v49 }
 0x303   : > { %5289 = vmatmul.mubr.msk.bf16.vlgmr.msra.gmra.mxu1 %vm393_vm8, %v2987_v56 }
 0x304   : > { %5292 = vmatprep.mubr.msk.bf16.mxu1 %vm393_vm8, %v2988_v28  ;;  %5307 = vmatpush3.bf16.msra.mxu1 %v5375_v20  ;;  %7972 = sst [smem:[#allocation60_spill]] %s6608_s6 }
 0x305   : > { %s6630_s6 = sld [smem:[#allocation4 + $0x2f]] }
 0x306   : > { %5279 = vmatmul.mubr.msk.bf16.vlgmr.msra.gmra.mxu0 %vm393_vm8, %v2885_v16 }
 0x307   : > { %5297 = vmatpush3.bf16.msra.mxu0 %v5374_v25  ;;  %5282 = vmatprep.mubr.msk.bf16.mxu0 %vm393_vm8, %v2886_v55 }
 0x308   : > { %5316 = vmatprep.subr.bf16.mxu0 %v5376_v44 }
 0x30b   : > { %5293 = vmatmul.mubr.msk.bf16.gmra.mxu1 %vm393_vm8, %v2989_v11  ;;  %7982 = sst [smem:[#allocation70_spill]] %s6630_s6 }
 0x30c   : > { %5308 = vmatprep.mubr.msk.bf16.mxu1 %vm393_vm8, %v6344_v22  ;;  %v7919_v22 = vrot.slane %v7918_v1, 1  ;;  %s6648_s6 = sld [smem:[#allocation4 + $0x38]] }
 0x30e   : > { %5283 = vmatmul.mubr.msk.bf16.gmra.mxu0 %vm393_vm8, %v2887_v33  ;;  %v3174_v31 = vsel %vm525_vm6, %v7919_v22, %v3173_v48 }
 0x30f   : > { %5298 = vmatprep.mubr.msk.bf16.mxu0 %vm393_vm8, %v6315_v43  ;;  %v3176_v43 = vpack.c.bf16 %v3174_v31, %v2882_v54 }
 0x312   : > { %7990 = sst [smem:[#allocation78_spill]] %s6648_s6 }
 0x313   : > { %5309 = vmatmul.mubr.msk.bf16.vlgmr.msra.gmra.mxu1 %vm393_vm8, %v6371_v32  ;;  %v3263_v32 = vrot.slane %v2422_v41, 2  ;;  %s6664_s6 = sld [smem:[#allocation4 + $0x40]] }
 0x314   : > { %5312 = vmatprep.mubr.msk.bf16.mxu1 %vm393_vm8, %v6396_v34 }
 0x316   : > { %5299 = vmatmul.mubr.msk.bf16.vlgmr.msra.gmra.mxu0 %vm393_vm8, %v6350_v52  ;;  %v7920_v52 = vrot.slane %v7918_v1, 2 }
 0x317   : > { %5317 = vmatpush3.bf16.msra.mxu0 %v5376_v44  ;;  %5302 = vmatprep.mubr.msk.bf16.mxu0 %vm393_vm8, %v6375_v24 }
 0x318   : > { %v3264_v4 = vsel %vm725_vm7, %v7920_v52, %v3263_v32 }
 0x319   : > { %v3266_v59 = vpack.c.bf16 %v3264_v4, %v2984_v27  ;;  %7996 = sst [smem:[#allocation84_spill]] %s6664_s6 }
 0x31b   : > { %5313 = vmatmul.mubr.msk.bf16.gmra.mxu1 %vm393_vm8, %v3176_v43 }
 0x31e   : > { %5303 = vmatmul.mubr.msk.bf16.gmra.mxu0 %vm393_vm8, %v3084_v10 }
 0x31f   : > { %5318 = vmatprep.mubr.msk.bf16.mxu0 %vm393_vm8, %v2683_v62 }
 0x326   : > { %5319 = vmatmul.mubr.msk.bf16.vlgmr.msra.gmra.mxu0 %vm393_vm8, %v2684_v36 }
 0x327   : > { %5322 = vmatprep.mubr.msk.bf16.mxu0 %vm393_vm8, %v2685_v38 }
 0x32e   : > { %5323 = vmatmul.mubr.msk.bf16.gmra.mxu0 %vm393_vm8, %v3266_v59 }
 0x3a3   : > { %v5250_v24 = vpop.f32.mrf.mxu1 }
 0x3a5   : > { %v2619_v13 = vpop.f32.mrf.mxu1 }
 0x3a6   : > { %v5240_v3 = vpop.f32.mrf.mxu0 }
 0x3a7   : > { %v5251_v14 = vpop.f32.mrf.mxu1  ;;  %v2628_v11 = vadd.f32 %v5250_v24, %v5240_v3 }
 0x3a8   : > { %v2536_v19 = vpop.f32.mrf.mxu0 }
 0x3a9   : > { %v2622_v57 = vpop.f32.mrf.mxu1  ;;  %v2620_v60 = vadd.f32 %v2619_v13, %v2536_v19 }
 0x3aa   : > { %v5241_v12 = vpop.f32.mrf.mxu0 }
 0x3ab   : > { %v6477_v9 = vpop.f32.mrf.mxu1  ;;  %v2631_v31 = vadd.f32 %v5251_v14, %v5241_v12 }
 0x3ac   : > { %v2539_v34 = vpop.f32.mrf.mxu0 }
 0x3ad   : > { %v2635_v5 = vpop.f32.mrf.mxu1  ;;  %v2623_v48 = vadd.f32 %v2622_v57, %v2539_v34 }
 0x3ae   : > { %v6479_v50 = vpop.f32.mrf.mxu0 }
 0x3af   : > { %v6481_v0 = vpop.f32.mrf.mxu1 }
 0x3b0   : > { %v2552_v23 = vpop.f32.mrf.mxu0 }
 0x3b1   : > { %v2638_v6 = vpop.f32.mrf.mxu1 }
 0x3b2   : > { %v6483_v61 = vpop.f32.mrf.mxu0 }
 0x3b3   : > { %v5270_v53 = vpop.f32.mrf.mxu1 }
 0x3b4   : > { %v2555_v39 = vpop.f32.mrf.mxu0 }
 0x3b5   : > { %v2839_v7 = vpop.f32.mrf.mxu1 }
 0x3b6   : > { %v5260_v26 = vpop.f32.mrf.mxu0 }
 0x3b7   : > { %v5271_v35 = vpop.f32.mrf.mxu1  ;;  %v2774_v1 = vadd.f32 %v5260_v26, %v2628_v11  ;;  %v2639_v26 = vadd.f32 %v2638_v6, %v2555_v39 }
 0x3b8   : > { %v2741_v20 = vpop.f32.mrf.mxu0 }
 0x3b9   : > { %v2842_v63 = vpop.f32.mrf.mxu1  ;;  %v2772_v54 = vadd.f32 %v2741_v20, %v2620_v60  ;;  %v2872_v59 = vadd.f32 %v5270_v53, %v2774_v1 }
 0x3ba   : > { %v5261_v21 = vpop.f32.mrf.mxu0 }
 0x3bb   : > { %v6485_v46 = vpop.f32.mrf.mxu1  ;;  %v2870_v10 = vadd.f32 %v2839_v7, %v2772_v54  ;;  %v2775_v4 = vadd.f32 %v5261_v21, %v2631_v31 }
 0x3bc   : > { %v2744_v62 = vpop.f32.mrf.mxu0 }
 0x3bd   : > { %v2855_v40 = vpop.f32.mrf.mxu1  ;;  %v2773_v43 = vadd.f32 %v2744_v62, %v2623_v48  ;;  %v2873_v60 = vadd.f32 %v5271_v35, %v2775_v4 }
 0x3be   : > { %v6487_v25 = vpop.f32.mrf.mxu0 }
 0x3bf   : > { %v6489_v36 = vpop.f32.mrf.mxu1  ;;  %v2871_v19 = vadd.f32 %v2842_v63, %v2773_v43 }
 0x3c0   : > { %v2757_v15 = vpop.f32.mrf.mxu0 }
 0x3c1   : > { %v6491_v42 = vpop.f32.mrf.mxu1 }
 0x3c2   : > { %v6493_v8 = vpop.f32.mrf.mxu0 }
 0x3c3   : > { %v5290_v29 = vpop.f32.mrf.mxu1 }
 0x3c4   : > { %v2760_v51 = vpop.f32.mrf.mxu0 }
 0x3c5   : > { %v3045_v17 = vpop.f32.mrf.mxu1  ;;  %v2777_v21 = vadd.f32 %v2760_v51, %v2639_v26 }
 0x3c6   : > { %v5280_v45 = vpop.f32.mrf.mxu0 }
 0x3c7   : > { %v5291_v47 = vpop.f32.mrf.mxu1  ;;  %v2976_v13 = vadd.f32 %v5280_v45, %v2872_v59  ;;  %v2875_v39 = vadd.f32 %v6491_v42, %v2777_v21 }
 0x3c8   : > { %v2943_v37 = vpop.f32.mrf.mxu0 }
 0x3c9   : > { %v3048_v38 = vpop.f32.mrf.mxu1  ;;  %v3078_v7 = vadd.f32 %v5290_v29, %v2976_v13 }
 0x3ca   : > { %v5281_v49 = vpop.f32.mrf.mxu0 }
 0x3cb   : > { %v6495_v30 = vpop.f32.mrf.mxu1  ;;  %v2977_v12 = vadd.f32 %v5281_v49, %v2873_v60 }
 0x3cc   : > { %7921 = vst [vmem:[#allocation21_spill] sm:$0xff] %v6495_v30  ;;  %v2946_v56 = vpop.f32.mrf.mxu0 }
 0x3cd   : > { %v3061_v28 = vpop.f32.mrf.mxu1  ;;  %v2975_v57 = vadd.f32 %v2946_v56, %v2871_v19  ;;  %v3079_v35 = vadd.f32 %v5291_v47, %v2977_v12  ;;  %v7926_v19 = vld [vmem:[#allocation14_spill] sm:$0xff]  ;;  %v7929_v12 = vld [vmem:[#allocation12_spill] sm:$0xff] }
 0x3ce   : > { %v6497_v2 = vpop.f32.mrf.mxu0 }
 0x3cf   : > { %v6499_v18 = vpop.f32.mrf.mxu1 }
 0x3d0   : > { %7922 = vst [vmem:[#allocation22_spill] sm:$0xff] %v6499_v18  ;;  %v2959_v16 = vpop.f32.mrf.mxu0  ;;  %v2974_v18 = vadd.f32 %v2943_v37, %v2870_v10 }
 0x3d1   : > { %v6503_v55 = vpop.f32.mrf.mxu1 }
 0x3d2   : > { %v6501_v44 = vpop.f32.mrf.mxu0  ;;  %v3076_v34 = vadd.f32 %v3045_v17, %v2974_v18 }
 0x3d3   : > { %7923 = vst [vmem:[#allocation23_spill] sm:$0xff] %v6501_v44  ;;  %v5310_v33 = vpop.f32.mrf.mxu1  ;;  %v2636_v44 = vadd.f32 %v2635_v5, %v2552_v23  ;;  %v3077_v5 = vadd.f32 %v3048_v38, %v2975_v57  ;;  %v2644_v23 = vadd.f32 %v6477_v9, %v6479_v50  ;;  %v4836_v9 = vld [vmem:[%s7924_s7] ss:$0 sm:$0xff]  ;;  %s6588_s7 = sld [smem:[#allocation4 + $0x1a]] }
 0x3d4   : > { %v2962_v58 = vpop.f32.mrf.mxu0  ;;  %v7928_v60 = vld [vmem:[#allocation21_spill] sm:$0xff] }
 0x3d5   : > { %v3223_v32 = vpop.f32.mrf.mxu1  ;;  %v2776_v20 = vadd.f32 %v2757_v15, %v2636_v44  ;;  %v2778_v6 = vadd.f32 %v6487_v25, %v2644_v23  ;;  %v2979_v38 = vadd.f32 %v2962_v58, %v2875_v39 }
 0x3d6   : > { %v5300_v27 = vpop.f32.mrf.mxu0 }
 0x3d7   : > { %v5311_v24 = vpop.f32.mrf.mxu1  ;;  %v2874_v11 = vadd.f32 %v2855_v40, %v2776_v20  ;;  %v3164_v54 = vadd.f32 %v5300_v27, %v3078_v7  ;;  %v2647_v40 = vadd.f32 %v6481_v0, %v6483_v61  ;;  %v2876_v27 = vadd.f32 %v6485_v46, %v2778_v6  ;;  %v7925_v0 = vld [vmem:[#allocation13_spill] sm:$0xff] }
 0x3d8   : > { %v3131_v41 = vpop.f32.mrf.mxu0  ;;  %v3081_v31 = vadd.f32 %v6503_v55, %v2979_v38  ;;  %v7933_v38 = vld [vmem:[#allocation19_spill] sm:$0xff] }
 0x3d9   : > { %v3162_v62 = vadd.f32 %v3131_v41, %v3076_v34  ;;  %v3226_v53 = vpop.f32.mrf.mxu1  ;;  %v2978_v15 = vadd.f32 %v2959_v16, %v2874_v11  ;;  %v3256_v56 = vadd.f32 %v5310_v33, %v3164_v54  ;;  %v2779_v42 = vadd.f32 %v6493_v8, %v2647_v40  ;;  %7962 = sst [smem:[#allocation50_spill]] %s6588_s7 }
 0x3da   : > { %v5301_v22 = vpop.f32.mrf.mxu0  ;;  %v2980_v58 = vadd.f32 %v6497_v2, %v2876_v27  ;;  %s6610_s7 = sld [smem:[#allocation4 + $0x25]] }
 0x3db   : > { %v3254_v17 = vadd.f32 %v3223_v32, %v3162_v62  ;;  %v5314_v29 = vpop.f32.mrf.mxu1  ;;  %v3165_v51 = vadd.f32 %v5301_v22, %v3079_v35  ;;  %v3080_v47 = vadd.f32 %v3061_v28, %v2978_v15  ;;  %v2877_v8 = vadd.f32 %v6489_v36, %v2779_v42 }
 0x3dc   : > { %v3134_v52 = vpop.f32.mrf.mxu0  ;;  %v3082_v2 = vadd.f32 %v7928_v60, %v2980_v58  ;;  %v7807_v58 = vstv %s6554_s18  ;;  %s8012_s18 = sld [smem:[#allocation54_spill]] }
 0x3dd   : > { %v3163_v45 = vadd.f32 %v3134_v52, %v3077_v5  ;;  %v3239_v41 = vpop.f32.mrf.mxu1  ;;  %v3257_v1 = vadd.f32 %v5311_v24, %v3165_v51 }
 0x3de   : > { %v6505_v30 = vpop.f32.mrf.mxu0 }
 0x3df   : > { %v3255_v25 = vadd.f32 %v3226_v53, %v3163_v45  ;;  %v5315_v4 = vpop.f32.mrf.mxu1  ;;  %v3168_v36 = vadd.f32 %v6505_v30, %v3082_v2 }
 0x3e0   : > { %v3147_v3 = vpop.f32.mrf.mxu0  ;;  %7973 = sst [smem:[#allocation61_spill]] %s6610_s7 }
 0x3e1   : > { %v3166_v48 = vadd.f32 %v3147_v3, %v3080_v47  ;;  %v7927_v3 = vld [vmem:[#allocation23_spill] sm:$0xff]  ;;  %v3242_v62 = vpop.f32.mrf.mxu1  ;;  %v3260_v45 = vadd.f32 %v5314_v29, %v3168_v36  ;;  %v7935_v29 = vld [vmem:[#allocation18_spill] sm:$0xff]  ;;  %s6632_s7 = sld [smem:[#allocation4 + $0x30]] }
 0x3e2   : > { %v6507_v14 = vpop.f32.mrf.mxu0  ;;  %v2981_v20 = vadd.f32 %v7927_v3, %v2877_v8  ;;  %v7844_v8 = vstv %s6566_s24  ;;  %s8043_s24 = sld [smem:[#allocation77_spill]] }
 0x3e3   : > { %v3258_v13 = vadd.f32 %v3239_v41, %v3166_v48  ;;  %v7803_v41 = vstv %s6544_s13  ;;  %v7806_v48 = vstv %s6546_s14  ;;  %s8006_s14 = sld [smem:[#allocation49_spill]] }
 0x3e4   : > { %v3150_v37 = vpop.f32.mrf.mxu0  ;;  %s6717_s13 = sld [smem:[#allocation4 + $0x4b]] }
 0x3e5   : > { %v3167_v59 = vadd.f32 %v3150_v37, %v3081_v31  ;;  %v7930_v37 = vld [vmem:[#allocation22_spill] sm:$0xff]  ;;  %v7813_v31 = vstv %s6556_s19  ;;  %s8036_s19 = sld [smem:[#allocation74_spill]] }
 0x3e6   : > { %v5320_v63 = vpop.f32.mrf.mxu0  ;;  %v3083_v11 = vadd.f32 %v7930_v37, %v2981_v20  ;;  %v7841_v20 = vstv %s8005_s3  ;;  %s8033_s3 = sld [smem:[#allocation70_spill]] }
 0x3e7   : > { %v3346_v16 = vadd.f32 %v5320_v63, %v3256_v56  ;;  %v3259_v53 = vadd.f32 %v3242_v62, %v3167_v59  ;;  %v7931_v63 = vld [vmem:[#allocation11_spill] sm:$0xff]  ;;  %7983 = sst [smem:[#allocation71_spill]] %s6632_s7  ;;  %v7824_v59 = vstv %s6572_s27 }
 0x3e8   : > { %v3313_v49 = vpop.f32.mrf.mxu0  ;;  %v3169_v35 = vadd.f32 %v6507_v14, %v3083_v11  ;;  %s6650_s7 = sld [smem:[#allocation4 + $0x39]] }
 0x3e9   : > { %v3344_v18 = vadd.f32 %v3313_v49, %v3254_v17  ;;  %v3361_v28 = vadd.f32 %v4836_v9, %v3346_v16  ;;  %v7932_v49 = vld [vmem:[#allocation17_spill] sm:$0xff]  ;;  %v7827_v60 = vstv %s8006_s14  ;;  %s6711_s27 = sld [smem:[#allocation4 + $0x4a]] }
 0x3ea   : > { %v5321_v50 = vpop.f32.mrf.mxu0  ;;  %v3261_v56 = vadd.f32 %v5315_v4, %v3169_v35  ;;  %v7843_v4 = vstv %s6568_s25  ;;  %8028 = sst [smem:[#allocation94_spill]] %s6717_s13 }
 0x3eb   : > { %v3359_v44 = vadd.f32 %v4836_v9, %v3344_v18  ;;  %v3347_v10 = vadd.f32 %v5321_v50, %v3257_v1  ;;  %v3369_v7 = vadd.f32 %v3361_v28, %v7929_v12  ;;  %v7809_v1 = vstv %s6540_s11  ;;  %s8007_s11 = sld [smem:[#allocation50_spill]] }
 0x3ec   : > { %v3316_v33 = vpop.f32.mrf.mxu0  ;;  %v7804_v28 = vstv %s6560_s21  ;;  %s8038_s21 = sld [smem:[#allocation76_spill]] }
 0x3ed   : > { %v3345_v22 = vadd.f32 %v3316_v33, %v3255_v25  ;;  %v3367_v61 = vadd.f32 %v3359_v44, %v7925_v0  ;;  %v3362_v55 = vadd.f32 %v4836_v9, %v3347_v10  ;;  %v3377_v23 = vmax.f32 %v3369_v7, 0.0  ;;  %v7934_v44 = vld [vmem:[#allocation16_spill] sm:$0xff]  ;;  %s6735_s13 = sld [smem:[#allocation4 + $0x4e]] }
 0x3ee   : > { %v5324_v43 = vpop.f32.mrf.mxu0  ;;  %7991 = sst [smem:[#allocation79_spill]] %s6650_s7  ;;  %v3517_v33 = vstv %s6538_s29  ;;  %v7814_v0 = vstv %s6542_s12  ;;  %v7808_v10 = vstv %s6562_s22 }
 0x3ef   : > { %v3360_v32 = vadd.f32 %v4836_v9, %v3345_v22  ;;  %v3375_v52 = vmax.f32 %v3367_v61, 0.0  ;;  %v3370_v15 = vadd.f32 %v3362_v55, %v7931_v63  ;;  %v3350_v17 = vadd.f32 %v5324_v43, %v3260_v45  ;;  %s6666_s7 = sld [smem:[#allocation4 + $0x41]] }
 0x3f0   : > { %v3329_v46 = vpop.f32.mrf.mxu0  ;;  %v3541_v22 = vstv %s6548_s15  ;;  %v7802_v61 = vstv %s6552_s17  ;;  %v7810_v43 = vstv %s6550_s16  ;;  %s6687_s29 = sld [smem:[#allocation4 + $0x46]]  ;;  %v7840_v55 = vstv %s8010_s5 }
 0x3f1   : > { %3383 = vxpose.xlu0.b32.start [1/8] (short) (narrow) %v3375_v52, 16  ;;  %v3368_v24 = vadd.f32 %v3360_v32, %v7926_v19  ;;  %v3348_v34 = vadd.f32 %v3329_v46, %v3258_v13  ;;  %v3378_v39 = vmax.f32 %v3370_v15, 0.0  ;;  %v3365_v30 = vadd.f32 %v4836_v9, %v3350_v17  ;;  %s6693_s12 = sld [smem:[#allocation4 + $0x47]] }
 0x3f2   : > { %v5325_v57 = vpop.f32.mrf.mxu0  ;;  %v7811_v32 = vstv %s6564_s23  ;;  %v7812_v52 = vstv %s6558_s20  ;;  %s8011_s17 = sld [smem:[#allocation53_spill]]  ;;  %v7836_v46 = vstv %s6570_s26  ;;  %v7842_v13 = vstv %s6576_s1 }
 0x3f3   : > { %v3376_v26 = vmax.f32 %v3368_v24, 0.0  ;;  %v3363_v54 = vadd.f32 %v4836_v9, %v3348_v34  ;;  %v3351_v18 = vadd.f32 %v5325_v57, %v3261_v56  ;;  %v3373_v25 = vadd.f32 %v3365_v30, %v7934_v44  ;;  %s6699_s16 = sld [smem:[#allocation4 + $0x48]] }
 0x3f4   : > { %v3332_v21 = vpop.f32.mrf.mxu0  ;;  %v7835_v19 = vstv %s8001_s9  ;;  %s6705_s20 = sld [smem:[#allocation4 + $0x49]]  ;;  %v7818_v2 = vstv %s8007_s11  ;;  %v6754_v30 = vstv %s8036_s19  ;;  %v6775_v44 = vstv %s8043_s24 }
 0x3f5   : > { %3384 = vxpose.xlu0.b32.cont [2/8] (short) (narrow) %v3376_v26, 16  ;;  %v3349_v5 = vadd.f32 %v3332_v21, %v3259_v53  ;;  %v3371_v51 = vadd.f32 %v3363_v54, %v7932_v49  ;;  %v3366_v47 = vadd.f32 %v4836_v9, %v3351_v18  ;;  %v3381_v14 = vmax.f32 %v3373_v25, 0.0  ;;  %7997 = sst [smem:[#allocation85_spill]] %s6666_s7  ;;  %8058 = vst [vmem:[#allocation14_spill] sm:$0xff] %v6775_v44 }
 0x3f6   : > { %8004 = sst [smem:[#allocation89_spill]] %s6687_s29  ;;  %v7819_v26 = vstv %s8012_s18  ;;  %v6778_v25 = vstv %s6656_s10  ;;  %v6813_v53 = vstv %s6735_s13 }
 0x3f7   : > { %v3364_v6 = vadd.f32 %v4836_v9, %v3349_v5  ;;  %v3379_v40 = vmax.f32 %v3371_v51, 0.0  ;;  %v3374_v42 = vadd.f32 %v3366_v47, %v7935_v29  ;;  %v7805_v9 = vstv %s6536_s28  ;;  %s8002_s28 = sld [smem:[#allocation46_spill]]  ;;  %8059 = vst [vmem:[#allocation23_spill] sm:$0xff] %v6778_v25  ;;  %8078 = vst [vmem:[#allocation18_spill] sm:$0xff] %v6813_v53 }
 0x3f8   : > { %8009 = sst [smem:[#allocation90_spill]] %s6693_s12  ;;  %v7826_v34 = vstv %s8011_s17  ;;  %v6748_v51 = vstv %s6634_s8  ;;  %v8186_v53 = vstv %s6668_s30 }
 0x3f9   : > { %3385 = vxpose.xlu0.b32.cont [3/8] (short) (narrow) %v3377_v23, 16  ;;  %v3372_v50 = vadd.f32 %v3364_v6, %v7933_v38  ;;  %v3382_v27 = vmax.f32 %v3374_v42, 0.0  ;;  %8014 = sst [smem:[#allocation91_spill]] %s6699_s16  ;;  %8046 = vst [vmem:[#allocation15_spill] sm:$0xff] %v6748_v51  ;;  %v7833_v6 = vstv %s6668_s30 }
 0x3fa   : > { %8019 = sst [smem:[#allocation92_spill]] %s6705_s20 }
 0x3fb   : > { %v3380_v16 = vmax.f32 %v3372_v50, 0.0  ;;  %8024 = sst [smem:[#allocation93_spill]] %s6711_s27 }
 0x3fc   : > { %s8026_s1 = sld [smem:[#allocation65_spill]] }
 0x3fd   : > { %3386 = vxpose.xlu0.b32.cont [4/8] (short) (narrow) %v3378_v39, 16  ;;  %v7821_v24 = vstv %s8002_s28  ;;  %s8029_s9 = sld [smem:[#allocation68_spill]]  ;;  %v7837_v39 = vstv %s6666_s7 }
 0x3fe   : > { %s6723_s15 = sld [smem:[#allocation4 + $0x4c]] }
 0x3ff   : > { %s8034_s5 = sld [smem:[#allocation71_spill]] }
 0x400   : > { %s8035_s18 = sld [smem:[#allocation72_spill]] }
 0x401   : > { %3387 = vxpose.xlu0.b32.cont [5/8] (short) (narrow) %v3379_v40, 16  ;;  %s6729_s17 = sld [smem:[#allocation4 + $0x4d]]  ;;  %v6760_v40 = vstv %s8038_s21 }
 0x402   : > { %s8037_s29 = sld [smem:[#allocation75_spill]] }
 0x403   : > { %s8039_s22 = sld [smem:[#allocation73_spill]] }
 0x404   : > { %8032 = sst [smem:[#allocation68_spill]] %s6723_s15 }
 0x405   : > { %3388 = vxpose.xlu0.b32.cont [6/8] (short) (narrow) %v3380_v16, 16  ;;  %s8040_s23 = sld [smem:[#allocation78_spill]]  ;;  %v6745_v49 = vstv %s8034_s5 }
 0x406   : > { %s8041_s15 = sld [smem:[#allocation79_spill]]  ;;  %v6751_v56 = vstv %s8035_s18 }
 0x407   : > { %s8042_s12 = sld [smem:[#allocation80_spill]]  ;;  %v6810_v62 = vstv %s6729_s17 }
 0x408   : > { %s8044_s26 = sld [smem:[#allocation82_spill]]  ;;  %v6757_v18 = vstv %s8037_s29  ;;  %8076 = vst [vmem:[#allocation16_spill] sm:$0xff] %v6810_v62 }
 0x409   : > { %3389 = vxpose.xlu0.b32.cont [7/8] (short) (narrow) %v3381_v14, 16  ;;  %s6741_s25 = sld [smem:[#allocation4 + $0x4f]]  ;;  %8049 = vst [vmem:[#allocation20_spill] sm:$0xff] %v6757_v18  ;;  %v6763_v38 = vstv %s8039_s22  ;;  %v6781_v14 = vstv %s6658_s2 }
 0x40a   : > { %s8045_s16 = sld [smem:[#allocation81_spill]]  ;;  %8060 = vst [vmem:[#allocation21_spill] sm:$0xff] %v6781_v14 }
 0x40b   : > { %s8047_s28 = sld [smem:[#allocation83_spill]]  ;;  %v6766_v50 = vstv %s8040_s23 }
 0x40c   : > { %s8048_s14 = sld [smem:[#allocation86_spill]]  ;;  %8053 = vst [vmem:[#allocation9_spill] sm:$0xff] %v6766_v50  ;;  %v6769_v47 = vstv %s8041_s15 }
 0x40d   : > { %3390 = vxpose.xlu0.b32.end [8/8] (short) (narrow) %v3382_v27, 16  ;;  %s8050_s11 = sld [smem:[#allocation87_spill]]  ;;  %8055 = vst [vmem:[#allocation10_spill] sm:$0xff] %v6769_v47  ;;  %v6772_v16 = vstv %s8042_s12  ;;  %v7845_v27 = vstv %s6664_s6 }
 0x40e   : > { %s8052_s5 = sld [smem:[#allocation89_spill]]  ;;  %8057 = vst [vmem:[#allocation13_spill] sm:$0xff] %v6772_v16  ;;  %v6784_v29 = vstv %s8044_s26 }
 0x40f   : > { %s8054_s8 = sld [smem:[#allocation90_spill]]  ;;  %8062 = vst [vmem:[#allocation12_spill] sm:$0xff] %v6784_v29  ;;  %v6825_v23 = vstv %s6741_s25 }
 0x410   : > { %s8056_s18 = sld [smem:[#allocation91_spill]]  ;;  %v6787_v42 = vstv %s8045_s16  ;;  %8081 = vst [vmem:[#allocation95_spill] sm:$0xff] %v6825_v23 }
 0x411   : > { %s8061_s29 = sld [smem:[#allocation94_spill]]  ;;  %8064 = vst [vmem:[#allocation22_spill] sm:$0xff] %v6787_v42  ;;  %v6793_v15 = vstv %s8047_s28 }
 0x412   : > { %s8063_s19 = sld [smem:[#allocation68_spill]]  ;;  %8067 = vst [vmem:[#allocation11_spill] sm:$0xff] %v6793_v15  ;;  %v7817_v54 = vstv %s8048_s14 }
 0x413   : > { %s8065_s12 = sld [smem:[#allocation28_spill]] }
 0x414   : > { %s8066_s15 = sld [smem:[#allocation32_spill]] }
 0x415   : > { %s8069_s2 = sld [smem:[#allocation24_spill]] }
 0x416   : > { %s8070_s10 = sld [smem:[#allocation29_spill]] }
 0x417   : > { %s8071_s22 = sld [smem:[#allocation33_spill]] }
 0x418   : > { %v6807_v5 = vstv %s8063_s19  ;;  %s8089_s26 = sld [smem:[#allocation40_spill]] }
 0x419   : > { %8075 = vst [vmem:[#allocation19_spill] sm:$0xff] %v6807_v5  ;;  %s8092_s19 = sld [smem:[#allocation45_spill]] }
 0x41a   : > { %s8097_s28 = sld [smem:[#allocation50_spill]] }
 0x41b   : > { %s8099_s7 = sld [smem:[#allocation43_spill]] }
 0x41c   : > { %s8100_s13 = sld [smem:[#allocation47_spill]] }
 0x41d   : > { %s8101_s17 = sld [smem:[#allocation51_spill]] }
 0x41e   : > { %s8102_s25 = sld [smem:[#allocation55_spill]] }
 0x41f   : > { %s8103_s21 = sld [smem:[#allocation60_spill]] }
 0x420   : > { %s8104_s16 = sld [smem:[#allocation56_spill]] }
 0x421   : > { %s8105_s24 = sld [smem:[#allocation64_spill]] }
 0x422   : > { %s8110_s14 = sld [smem:[#allocation57_spill]] }
 0x423   : > { %s8112_s6 = sld [smem:[#allocation61_spill]] }
 0x424   : > { %s8157_s23 = sld [smem:[#allocation31_spill]] }
 0x425   : > { %s8196_s30 = sld [smem:[#allocation60_spill]] }
 0x46d   : > { %v6803_v21 = vpop.trf.xlu0 }
 0x46e   : > { %8073 = vst [vmem:[#allocation17_spill] sm:$0xff] %v6803_v21  ;;  %v3498_v11 = vmul.f32 %v7803_v41, %v6803_v21  ;;  %v3504_v45 = vmul.f32 %v7802_v61, %v6803_v21  ;;  %v3510_v37 = vmul.f32 %v7804_v28, %v6803_v21  ;;  %v3496_v35 = vmul.f32 %v7805_v9, %v6803_v21 }
 0x46f   : > { %v3520_v36 = vmul.f32 %v7806_v48, %v6803_v21  ;;  %v3526_v63 = vmul.f32 %v7807_v58, %v6803_v21  ;;  %v3532_v61 = vmul.f32 %v7808_v10, %v6803_v21  ;;  %v3518_v7 = vmul.f32 %v3517_v33, %v6803_v21 }
 0x470   : > { %v3500_v41 = vrot.slane %v3498_v11, 1  ;;  %v3506_v28 = vrot.slane %v3504_v45, 2  ;;  %v3512_v17 = vrot.slane %v3510_v37, 3  ;;  %v3540_v48 = vmul.f32 %v7809_v1, %v6803_v21 }
 0x471   : > { %v3522_v9 = vrot.slane %v3520_v36, 1  ;;  %v3528_v12 = vrot.slane %v3526_v63, 2  ;;  %v3542_v58 = vmul.f32 %v3541_v22, %v6803_v21  ;;  %v3534_v3 = vrot.slane %v3532_v61, 3 }
 0x472   : > { %v3502_v57 = vadd.f32 %v3500_v41, %v3496_v35  ;;  %v3548_v11 = vmul.f32 %v7813_v31, %v6803_v21  ;;  %v3554_v37 = vmul.f32 %v7811_v32, %v6803_v21  ;;  %v3564_v36 = vmul.f32 %v7810_v43, %v6803_v21 }
 0x473   : > { %v3524_v45 = vadd.f32 %v3522_v9, %v3518_v7  ;;  %v3544_v10 = vrot.slane %v3542_v58, 1  ;;  %v3570_v63 = vmul.f32 %v7812_v52, %v6803_v21  ;;  %v3562_v61 = vmul.f32 %v7814_v0, %v6803_v21 }
 0x474   : > { %v3508_v1 = vadd.f32 %v3506_v28, %v3502_v57  ;;  %v3550_v41 = vrot.slane %v3548_v11, 2  ;;  %v3576_v35 = vmul.f32 %v7844_v8, %v6803_v21  ;;  %v3556_v7 = vrot.slane %v3554_v37, 3 }
 0x475   : > { %v3530_v9 = vadd.f32 %v3528_v12, %v3524_v45  ;;  %v3546_v58 = vadd.f32 %v3544_v10, %v3540_v48  ;;  %v3566_v43 = vrot.slane %v3564_v36, 1  ;;  %v3572_v52 = vrot.slane %v3570_v63, 2 }
 0x476   : > { %v3514_v32 = vadd.f32 %v3512_v17, %v3508_v1  ;;  %v3578_v31 = vrot.slane %v3576_v35, 3  ;;  %v3654_v28 = vmul.f32 %v7842_v13, %v6803_v21  ;;  %v3660_v12 = vmul.f32 %v7841_v20, %v6803_v21 }
 0x477   : > { %v3536_v57 = vadd.f32 %v3534_v3, %v3530_v9  ;;  %v3552_v11 = vadd.f32 %v3550_v41, %v3546_v58  ;;  %v3568_v0 = vadd.f32 %v3566_v43, %v3562_v61  ;;  %v3652_v1 = vmul.f32 %v7843_v4, %v6803_v21 }
 0x478   : > { %v6874_v48 = vadd.f32 %v7845_v27, %v3514_v32  ;;  %v3656_v10 = vrot.slane %v3654_v28, 1  ;;  %v3666_v17 = vmul.f32 %v7840_v55, %v6803_v21  ;;  %v3674_v32 = vmul.f32 %v7836_v46, %v6803_v21 }
 0x479   : > { %v6884_v3 = vadd.f32 %v7837_v39, %v3536_v57  ;;  %v3558_v43 = vadd.f32 %v3556_v7, %v3552_v11  ;;  %v3574_v37 = vadd.f32 %v3572_v52, %v3568_v0  ;;  %v3662_v36 = vrot.slane %v3660_v12, 2 }
 0x47a   : > { %v3658_v45 = vadd.f32 %v3656_v10, %v3652_v1  ;;  %v3676_v63 = vmul.f32 %v7835_v19, %v6803_v21  ;;  %v3682_v41 = vmul.f32 %v7827_v60, %v6803_v21  ;;  %v3668_v9 = vrot.slane %v3666_v17, 3 }
 0x47b   : > { %v6897_v61 = vadd.f32 %v7833_v6, %v3558_v43  ;;  %v3580_v35 = vadd.f32 %v3578_v31, %v3574_v37  ;;  %v3688_v0 = vmul.f32 %v7826_v34, %v6803_v21  ;;  %v3696_v7 = vmul.f32 %v7824_v59, %v6803_v21 }
 0x47c   : > { %v3664_v52 = vadd.f32 %v3662_v36, %v3658_v45  ;;  %v3678_v58 = vrot.slane %v3676_v63, 1  ;;  %v3698_v28 = vmul.f32 %v7821_v24, %v6803_v21  ;;  %v3684_v31 = vrot.slane %v3682_v41, 2 }
 0x47d   : > { %v6910_v57 = vadd.f32 %v7817_v54, %v3580_v35  ;;  %v3704_v11 = vmul.f32 %v7818_v2, %v6803_v21  ;;  %v3710_v12 = vmul.f32 %v7819_v26, %v6803_v21  ;;  %v3690_v17 = vrot.slane %v3688_v0, 3 }
 0x47e   : > { %v3670_v1 = vadd.f32 %v3668_v9, %v3664_v52  ;;  %v3680_v10 = vadd.f32 %v3678_v58, %v3674_v32  ;;  %v3700_v43 = vrot.slane %v3698_v28, 1  ;;  %v8106_v45 = vstv %s8099_s7 }
 0x47f   : > { %v3706_v37 = vrot.slane %v3704_v11, 2  ;;  %v3718_v36 = vmul.f32 %v8106_v45, %v6803_v21  ;;  %v8107_v63 = vstv %s8100_s13  ;;  %v8108_v35 = vstv %s8101_s17 }
 0x480   : > { %v3720_v41 = vmul.f32 %v8107_v63, %v6803_v21  ;;  %v3726_v54 = vmul.f32 %v8108_v35, %v6803_v21  ;;  %v3686_v2 = vadd.f32 %v3684_v31, %v3680_v10  ;;  %v3702_v26 = vadd.f32 %v3700_v43, %v3696_v7 }
 0x481   : > { %v3712_v9 = vrot.slane %v3710_v12, 3  ;;  %v8109_v32 = vstv %s8102_s25  ;;  %v8111_v52 = vstv %s8050_s11  ;;  %v8113_v45 = vstv %s8103_s21  ;;  %s8117_s11 = sld [smem:[#allocation58_spill]] }
 0x482   : > { %v3732_v0 = vmul.f32 %v8109_v32, %v6803_v21  ;;  %v6932_v58 = vadd.f32 %v8111_v52, %v3670_v1  ;;  %v3722_v28 = vrot.slane %v3720_v41, 1  ;;  %v3728_v11 = vrot.slane %v3726_v54, 2  ;;  %s8119_s21 = sld [smem:[#allocation62_spill]] }
 0x483   : > { %v3810_v63 = vmul.f32 %v8113_v45, %v6803_v21  ;;  %v3692_v35 = vadd.f32 %v3690_v17, %v3686_v2  ;;  %v3708_v31 = vadd.f32 %v3706_v37, %v3702_v26  ;;  %v8114_v7 = vstv %s8104_s16 }
 0x484   : > { %v3808_v12 = vmul.f32 %v8114_v7, %v6803_v21  ;;  %v8115_v10 = vstv %s8105_s24  ;;  %v3724_v32 = vadd.f32 %v3722_v28, %v3718_v36  ;;  %v3734_v24 = vrot.slane %v3732_v0, 3  ;;  %s8122_s24 = sld [smem:[#allocation66_spill]] }
 0x485   : > { %v3816_v43 = vmul.f32 %v8115_v10, %v6803_v21  ;;  %v3812_v1 = vrot.slane %v3810_v63, 1  ;;  %v8116_v41 = vstv %s8029_s9  ;;  %v8118_v52 = vstv %s8051_s0  ;;  %s8125_s0 = sld [smem:[#allocation69_spill]] }
 0x486   : > { %v3822_v54 = vmul.f32 %v8116_v41, %v6803_v21  ;;  %v6948_v45 = vadd.f32 %v8118_v52, %v3692_v35  ;;  %v3714_v2 = vadd.f32 %v3712_v9, %v3708_v31  ;;  %v8120_v26 = vstv %s8110_s14  ;;  %s8127_s14 = sld [smem:[#allocation59_spill]] }
 0x487   : > { %v3830_v17 = vmul.f32 %v8120_v26, %v6803_v21  ;;  %v8121_v37 = vstv %s8112_s6  ;;  %v3730_v10 = vadd.f32 %v3728_v11, %v3724_v32  ;;  %v3814_v36 = vadd.f32 %v3812_v1, %v3808_v12  ;;  %s8128_s6 = sld [smem:[#allocation63_spill]] }
 0x488   : > { %v3832_v7 = vmul.f32 %v8121_v37, %v6803_v21  ;;  %v3818_v0 = vrot.slane %v3816_v43, 2  ;;  %v8123_v28 = vstv %s8026_s1  ;;  %v8124_v41 = vstv %s8052_s5  ;;  %s8131_s1 = sld [smem:[#allocation67_spill]] }
 0x489   : > { %v3838_v63 = vmul.f32 %v8123_v28, %v6803_v21  ;;  %v6961_v59 = vadd.f32 %v8124_v41, %v3714_v2  ;;  %v3824_v35 = vrot.slane %v3822_v54, 3  ;;  %v8126_v31 = vstv %s6626_s4 }
 0x48a   : > { %v3834_v9 = vrot.slane %v3832_v7, 1  ;;  %v3844_v52 = vmul.f32 %v8126_v31, %v6803_v21  ;;  %v3736_v26 = vadd.f32 %v3734_v24, %v3730_v10  ;;  %v3820_v11 = vadd.f32 %v3818_v0, %v3814_v36 }
 0x48b   : > { %v8129_v12 = vstv %s8117_s11  ;;  %v8130_v32 = vstv %s8119_s21  ;;  %v3840_v37 = vrot.slane %v3838_v63, 2  ;;  %v8132_v7 = vstv %s8122_s24 }
 0x48c   : > { %v3852_v43 = vmul.f32 %v8129_v12, %v6803_v21  ;;  %v3854_v1 = vmul.f32 %v8130_v32, %v6803_v21  ;;  %v3836_v2 = vadd.f32 %v3834_v9, %v3830_v17  ;;  %v3846_v54 = vrot.slane %v3844_v52, 3 }
 0x48d   : > { %v3860_v28 = vmul.f32 %v8132_v7, %v6803_v21  ;;  %v8133_v41 = vstv %s8054_s8  ;;  %v3826_v24 = vadd.f32 %v3824_v35, %v3820_v11  ;;  %v8134_v36 = vstv %s8125_s0 }
 0x48e   : > { %v6977_v31 = vadd.f32 %v8133_v41, %v3736_v26  ;;  %v3856_v10 = vrot.slane %v3854_v1, 1  ;;  %v3866_v0 = vmul.f32 %v8134_v36, %v6803_v21  ;;  %v3842_v12 = vadd.f32 %v3840_v37, %v3836_v2 }
 0x48f   : > { %v3862_v34 = vrot.slane %v3860_v28, 2  ;;  %v8135_v32 = vstv %s8127_s14  ;;  %v8136_v17 = vstv %s8128_s6  ;;  %v8137_v9 = vstv %s8056_s18 }
 0x490   : > { %v3874_v60 = vmul.f32 %v8135_v32, %v6803_v21  ;;  %v3876_v63 = vmul.f32 %v8136_v17, %v6803_v21  ;;  %v6990_v52 = vadd.f32 %v8137_v9, %v3826_v24  ;;  %v3858_v7 = vadd.f32 %v3856_v10, %v3852_v43 }
 0x491   : > { %v8138_v26 = vstv %s8131_s1  ;;  %v8139_v11 = vstv %s8033_s3  ;;  %v3848_v41 = vadd.f32 %v3846_v54, %v3842_v12  ;;  %v3963_v37 = vmul.f32 %v6932_v58, %v6874_v48  ;;  %s8159_s3 = sld [smem:[#allocation84_spill]] }
 0x492   : > { %v3882_v35 = vmul.f32 %v8138_v26, %v6803_v21  ;;  %v3888_v1 = vmul.f32 %v8139_v11, %v6803_v21  ;;  %v3878_v2 = vrot.slane %v3876_v63, 1  ;;  %v3964_v28 = vmul.f32 %v6948_v45, %v6884_v3 }
 0x493   : > { %v3864_v36 = vadd.f32 %v3862_v34, %v3858_v7  ;;  %v3868_v32 = vrot.slane %v3866_v0, 3  ;;  %v7830_v43 = vrot.slane %v6932_v58, 4  ;;  %v8140_v10 = vstv %s6705_s20  ;;  %v7013_v0 = vpop.trf.xlu0  ;;  %s8143_s20 = sld [smem:[#allocation36_spill]] }
 0x494   : > { %v3884_v24 = vrot.slane %v3882_v35, 2  ;;  %v7005_v17 = vadd.f32 %v8140_v10, %v3848_v41  ;;  %v3880_v9 = vadd.f32 %v3878_v2, %v3874_v60  ;;  %v3965_v26 = vadd.f32 %v3964_v28, %v3963_v37  ;;  %8141 = vst [vmem:[#allocation96_spill] sm:$0xff] %v7013_v0 }
 0x495   : > { %v7829_v54 = vrot.slane %v6948_v45, 4  ;;  %v3870_v12 = vadd.f32 %v3868_v32, %v3864_v36  ;;  %v3890_v63 = vrot.slane %v3888_v1, 3  ;;  %v3970_v11 = vmul.f32 %v7830_v43, %v6874_v48 }
 0x496   : > { %v4159_v34 = vmul.f32 %v6961_v59, %v6897_v61  ;;  %v3886_v7 = vadd.f32 %v3884_v24, %v3880_v9  ;;  %v7015_v35 = vmul.f32 0.70710677, %v3965_v26  ;;  %v7021_v1 = vrot.slane %v6990_v52, 4 }
 0x497   : > { %v3974_v60 = vmul.f32 %v7829_v54, %v6884_v3  ;;  %v8142_v41 = vstv %s6711_s27  ;;  %v4160_v37 = vmul.f32 %v6977_v31, %v6910_v57  ;;  %v7832_v28 = vrot.slane %v6961_v59, 4  ;;  %s8165_s27 = sld [smem:[#allocation44_spill]] }
 0x498   : > { %v7025_v2 = vadd.f32 %v8142_v41, %v3870_v12  ;;  %v7834_v36 = vrot.slane %v6977_v31, 4  ;;  %v3892_v32 = vadd.f32 %v3890_v63, %v3886_v7  ;;  %v7032_v10 = vrot.slane %v7005_v17, 4 }
 0x499   : > { %v3975_v24 = vadd.f32 %v3974_v60, %v3970_v11  ;;  %v8144_v9 = vstv %s8065_s12  ;;  %v4161_v54 = vadd.f32 %v4160_v37, %v4159_v34  ;;  %v4166_v12 = vmul.f32 %v7832_v28, %v6897_v61  ;;  %s8148_s12 = sld [smem:[#allocation37_spill]] }
 0x49a   : > { %v3584_v26 = vmul.f32 %v8144_v9, %v7013_v0  ;;  %v4170_v41 = vmul.f32 %v7834_v36, %v6910_v57  ;;  %v8145_v43 = vstv %s8069_s2  ;;  %v8146_v11 = vstv %s8061_s29  ;;  %s8151_s2 = sld [smem:[#allocation26_spill]] }
 0x49b   : > { %v3583_v63 = vmul.f32 %v8145_v43, %v7013_v0  ;;  %v7048_v7 = vadd.f32 %v8146_v11, %v3892_v32  ;;  %v7050_v60 = vmul.f32 0.70710677, %v3975_v24  ;;  %v8147_v34 = vstv %s8066_s15  ;;  %s8152_s15 = sld [smem:[#allocation34_spill]] }
 0x49c   : > { %v3586_v9 = vrot.slane %v3584_v26, 1  ;;  %v3589_v37 = vmul.f32 %v8147_v34, %v7013_v0  ;;  %v7055_v28 = vmul.f32 0.70710677, %v4161_v54  ;;  %v4171_v6 = vadd.f32 %v4170_v41, %v4166_v12  ;;  %s8158_s29 = sld [smem:[#allocation35_spill]] }
 0x49d   : > { %v7058_v36 = vrot.slane %v7025_v2, 4  ;;  %v8150_v43 = vstv %s8143_s20  ;;  %v3600_v11 = vmul.f32 %v3517_v33, %v7013_v0  ;;  %v7073_v12 = vrot.slane %v7048_v7, 4  ;;  %s8154_s20 = sld [smem:[#allocation38_spill]] }
 0x49e   : > { %v3594_v19 = vmul.f32 %v8150_v43, %v7013_v0  ;;  %v3588_v26 = vadd.f32 %v3586_v9, %v3583_v63  ;;  %v7070_v54 = vmul.f32 0.70710677, %v4171_v6  ;;  %v3591_v41 = vrot.slane %v3589_v37, 2 }
 0x49f   : > { %v8153_v34 = vstv %s8070_s10  ;;  %v8155_v32 = vstv %s8071_s22  ;;  %v8156_v63 = vstv %s8148_s12  ;;  %v3618_v33 = vmul.f32 %v3541_v22, %v7013_v0  ;;  %s8161_s10 = sld [smem:[#allocation27_spill]] }
 0x4a0   : > { %v3601_v43 = vmul.f32 %v8153_v34, %v7013_v0  ;;  %v3596_v46 = vrot.slane %v3594_v19, 3  ;;  %v3606_v39 = vmul.f32 %v8155_v32, %v7013_v0  ;;  %v3611_v9 = vmul.f32 %v8156_v63, %v7013_v0  ;;  %s8162_s22 = sld [smem:[#allocation39_spill]] }
 0x4a1   : > { %v3593_v37 = vadd.f32 %v3591_v41, %v3588_v26  ;;  %v8160_v34 = vstv %s8151_s2  ;;  %v3620_v55 = vrot.slane %v3618_v33, 1  ;;  %v8163_v20 = vstv %s8152_s15  ;;  %s8166_s12 = sld [smem:[#allocation48_spill]] }
 0x4a2   : > { %v3603_v24 = vrot.slane %v3601_v43, 1  ;;  %v3617_v19 = vmul.f32 %v8160_v34, %v7013_v0  ;;  %v3608_v63 = vrot.slane %v3606_v39, 2  ;;  %v3623_v22 = vmul.f32 %v8163_v20, %v7013_v0  ;;  %s8170_s2 = sld [smem:[#allocation52_spill]] }
 0x4a3   : > { %v3598_v13 = vadd.f32 %v3596_v46, %v3593_v37  ;;  %v3613_v6 = vrot.slane %v3611_v9, 3  ;;  %v8164_v26 = vstv %s8154_s20  ;;  %v8167_v8 = vstv %s8157_s23  ;;  %s8171_s15 = sld [smem:[#allocation85_spill]] }
 0x4a4   : > { %v3605_v4 = vadd.f32 %v3603_v24, %v3600_v11  ;;  %v3628_v41 = vmul.f32 %v8164_v26, %v7013_v0  ;;  %v3622_v43 = vadd.f32 %v3620_v55, %v3617_v19  ;;  %v3625_v34 = vrot.slane %v3623_v22, 2  ;;  %s8174_s20 = sld [smem:[#allocation41_spill]] }
 0x4a5   : > { %v3635_v27 = vmul.f32 %v8167_v8, %v7013_v0  ;;  %v8168_v39 = vstv %s8158_s29  ;;  %v8169_v32 = vstv %s8159_s3  ;;  %v8172_v24 = vstv %s8161_s10  ;;  %s8175_s29 = sld [smem:[#allocation49_spill]] }
 0x4a6   : > { %v3640_v33 = vmul.f32 %v8168_v39, %v7013_v0  ;;  %v7108_v20 = vadd.f32 %v3598_v13, %v8169_v32  ;;  %v3610_v46 = vadd.f32 %v3608_v63, %v3605_v4  ;;  %v3634_v11 = vmul.f32 %v8172_v24, %v7013_v0  ;;  %s8179_s3 = sld [smem:[#allocation53_spill]] }
 0x4a7   : > { %v8173_v9 = vstv %s8162_s22  ;;  %v3627_v37 = vadd.f32 %v3625_v34, %v3622_v43  ;;  %v3630_v8 = vrot.slane %v3628_v41, 3  ;;  %v3637_v19 = vrot.slane %v3635_v27, 1  ;;  %s8180_s23 = sld [smem:[#allocation42_spill]] }
 0x4a8   : > { %v3645_v55 = vmul.f32 %v8173_v9, %v7013_v0  ;;  %v3642_v22 = vrot.slane %v3640_v33, 2  ;;  %v3615_v26 = vadd.f32 %v3613_v6, %v3610_v46  ;;  %v8176_v13 = vstv %s8089_s26  ;;  %s8182_s10 = sld [smem:[#allocation46_spill]] }
 0x4a9   : > { %v3739_v32 = vmul.f32 %v8176_v13, %v7013_v0  ;;  %v8177_v4 = vstv %s8165_s27  ;;  %v8178_v39 = vstv %s8166_s12  ;;  %v3632_v23 = vadd.f32 %v3630_v8, %v3627_v37  ;;  %s8187_s26 = sld [smem:[#allocation54_spill]] }
 0x4aa   : > { %v3740_v63 = vmul.f32 %v8177_v4, %v7013_v0  ;;  %v3745_v24 = vmul.f32 %v8178_v39, %v7013_v0  ;;  %v3639_v9 = vadd.f32 %v3637_v19, %v3634_v11  ;;  %v3647_v43 = vrot.slane %v3645_v55, 3  ;;  %s8188_s22 = sld [smem:[#allocation86_spill]] }
 0x4ab   : > { %v8181_v41 = vstv %s8170_s2  ;;  %v8183_v34 = vstv %s8171_s15  ;;  %v8184_v46 = vstv %s8174_s20  ;;  %v8185_v4 = vstv %s8092_s19  ;;  %s8197_s19 = sld [smem:[#allocation87_spill]] }
 0x4ac   : > { %v3750_v27 = vmul.f32 %v8181_v41, %v7013_v0  ;;  %v7130_v6 = vadd.f32 %v3615_v26, %v8183_v34  ;;  %v3742_v33 = vrot.slane %v3740_v63, 1  ;;  %v3756_v13 = vmul.f32 %v8184_v46, %v7013_v0  ;;  %s8198_s27 = sld [smem:[#allocation64_spill]] }
 0x4ad   : > { %v3757_v39 = vmul.f32 %v8185_v4, %v7013_v0  ;;  %v7140_v11 = vadd.f32 %v3632_v23, %v8186_v53  ;;  %v3644_v55 = vadd.f32 %v3642_v22, %v3639_v9  ;;  %v3747_v37 = vrot.slane %v3745_v24, 2  ;;  %s8204_s12 = sld [smem:[#allocation61_spill]] }
 0x4ae   : > { %v8189_v8 = vstv %s8175_s29  ;;  %v3744_v41 = vadd.f32 %v3742_v33, %v3739_v32  ;;  %v3752_v26 = vrot.slane %v3750_v27, 3  ;;  %v8190_v63 = vstv %s8179_s3 }
 0x4af   : > { %v3762_v19 = vmul.f32 %v8189_v8, %v7013_v0  ;;  %v3759_v34 = vrot.slane %v3757_v39, 1  ;;  %v3767_v46 = vmul.f32 %v8190_v63, %v7013_v0  ;;  %v3649_v62 = vadd.f32 %v3647_v43, %v3644_v55 }
 0x4b0   : > { %v8191_v4 = vstv %s8180_s23  ;;  %v8192_v53 = vstv %s8182_s10  ;;  %v8193_v22 = vstv %s8097_s28  ;;  %v3749_v32 = vadd.f32 %v3747_v37, %v3744_v41  ;;  %s8201_s28 = sld [smem:[#allocation88_spill]] }
 0x4b1   : > { %v3773_v5 = vmul.f32 %v8191_v4, %v7013_v0  ;;  %v3774_v23 = vmul.f32 %v8192_v53, %v7013_v0  ;;  %v3779_v24 = vmul.f32 %v8193_v22, %v7013_v0  ;;  %v3761_v9 = vadd.f32 %v3759_v34, %v3756_v13 }
 0x4b2   : > { %v3764_v27 = vrot.slane %v3762_v19, 2  ;;  %v8194_v33 = vstv %s8187_s26  ;;  %v8195_v8 = vstv %s8188_s22  ;;  %v3769_v55 = vrot.slane %v3767_v46, 3 }
 0x4b3   : > { %v3784_v39 = vmul.f32 %v8194_v33, %v7013_v0  ;;  %v7162_v43 = vadd.f32 %v3649_v62, %v8195_v8  ;;  %v3776_v63 = vrot.slane %v3774_v23, 1  ;;  %v3781_v4 = vrot.slane %v3779_v24, 2 }
 0x4b4   : > { %v3754_v53 = vadd.f32 %v3752_v26, %v3749_v32  ;;  %v3766_v15 = vadd.f32 %v3764_v27, %v3761_v9  ;;  %v8199_v22 = vstv %s8099_s7  ;;  %v8200_v13 = vstv %s8100_s13  ;;  %s8207_s7 = sld [smem:[#allocation57_spill]] }
 0x4b5   : > { %v3790_v37 = vmul.f32 %v8199_v22, %v7013_v0  ;;  %v3791_v19 = vmul.f32 %v8200_v13, %v7013_v0  ;;  %v3778_v41 = vadd.f32 %v3776_v63, %v3773_v5  ;;  %v3786_v34 = vrot.slane %v3784_v39, 3  ;;  %s8209_s13 = sld [smem:[#allocation65_spill]] }
 0x4b6   : > { %v8202_v62 = vstv %s8101_s17  ;;  %v8203_v46 = vstv %s8102_s25  ;;  %v3771_v24 = vadd.f32 %v3769_v55, %v3766_v15  ;;  %v8205_v32 = vstv %s8104_s16 }
 0x4b7   : > { %v3796_v33 = vmul.f32 %v8202_v62, %v7013_v0  ;;  %v3801_v23 = vmul.f32 %v8203_v46, %v7013_v0  ;;  %v3793_v26 = vrot.slane %v3791_v19, 1  ;;  %v3895_v9 = vmul.f32 %v8205_v32, %v7013_v0 }
 0x4b8   : > { %v8206_v27 = vstv %s8196_s30  ;;  %v8208_v22 = vstv %s8197_s19  ;;  %v3783_v39 = vadd.f32 %v3781_v4, %v3778_v41  ;;  %v8210_v13 = vstv %s8198_s27 }
 0x4b9   : > { %v3896_v8 = vmul.f32 %v8206_v27, %v7013_v0  ;;  %v7184_v5 = vadd.f32 %v3754_v53, %v8208_v22  ;;  %v3798_v63 = vrot.slane %v3796_v33, 2  ;;  %v3901_v62 = vmul.f32 %v8210_v13, %v7013_v0 }
 0x4ba   : > { %v3795_v15 = vadd.f32 %v3793_v26, %v3790_v37  ;;  %v3803_v55 = vrot.slane %v3801_v23, 3  ;;  %v8211_v46 = vstv %s8029_s9  ;;  %v8212_v21 = vstv %s8201_s28  ;;  %s8220_s9 = sld [smem:[#allocation70_spill]] }
 0x4bb   : > { %v3898_v19 = vrot.slane %v3896_v8, 1  ;;  %v3906_v32 = vmul.f32 %v8211_v46, %v7013_v0  ;;  %v7194_v27 = vadd.f32 %v3771_v24, %v8212_v21  ;;  %v3788_v53 = vadd.f32 %v3786_v34, %v3783_v39 }
 0x4bc   : > { %v3903_v22 = vrot.slane %v3901_v62, 2  ;;  %v8213_v4 = vstv %s8204_s12  ;;  %v3800_v33 = vadd.f32 %v3798_v63, %v3795_v15  ;;  %v8214_v37 = vstv %s8207_s7 }
 0x4bd   : > { %v3913_v41 = vmul.f32 %v8213_v4, %v7013_v0  ;;  %v3900_v13 = vadd.f32 %v3898_v19, %v3895_v9  ;;  %v3912_v23 = vmul.f32 %v8214_v37, %v7013_v0  ;;  %v8215_v26 = vstv %s8209_s13 }
 0x4be   : > { %v3918_v8 = vmul.f32 %v8215_v26, %v7013_v0  ;;  %v8216_v46 = vstv %s8052_s5  ;;  %v3908_v21 = vrot.slane %v3906_v32, 3  ;;  %v8217_v24 = vstv %s6626_s4  ;;  %s8224_s4 = sld [smem:[#allocation92_spill]] }
 0x4bf   : > { %v7207_v42 = vadd.f32 %v3788_v53, %v8216_v46  ;;  %v3915_v34 = vrot.slane %v3913_v41, 1  ;;  %v3923_v39 = vmul.f32 %v8217_v24, %v7013_v0  ;;  %v3805_v63 = vadd.f32 %v3803_v55, %v3800_v33 }
 0x4c0   : > { %v3905_v9 = vadd.f32 %v3903_v22, %v3900_v13  ;;  %v8218_v62 = vstv %s8117_s11  ;;  %v8219_v19 = vstv %s8119_s21  ;;  %v3920_v37 = vrot.slane %v3918_v8, 2 }
 0x4c1   : > { %v3929_v15 = vmul.f32 %v8218_v62, %v7013_v0  ;;  %v3930_v4 = vmul.f32 %v8219_v19, %v7013_v0  ;;  %v3917_v53 = vadd.f32 %v3915_v34, %v3912_v23  ;;  %v3925_v32 = vrot.slane %v3923_v39, 3 }
 0x4c2   : > { %v8221_v41 = vstv %s8122_s24  ;;  %v8222_v46 = vstv %s8054_s8  ;;  %v3910_v55 = vadd.f32 %v3908_v21, %v3905_v9  ;;  %v8223_v22 = vstv %s8125_s0  ;;  %s8231_s0 = sld [smem:[#allocation93_spill]] }
 0x4c3   : > { %v3935_v26 = vmul.f32 %v8221_v41, %v7013_v0  ;;  %v7223_v24 = vadd.f32 %v3805_v63, %v8222_v46  ;;  %v3932_v33 = vrot.slane %v3930_v4, 1  ;;  %v3940_v13 = vmul.f32 %v8223_v22, %v7013_v0  ;;  %s8268_s8 = sld [smem:[#allocation108_spill]] }
 0x4c4   : > { %v3922_v62 = vadd.f32 %v3920_v37, %v3917_v53  ;;  %v8225_v19 = vstv %s8127_s14  ;;  %v8226_v23 = vstv %s8128_s6  ;;  %v8227_v34 = vstv %s8056_s18  ;;  %s8267_s6 = sld [smem:[#allocation8_spill]] }
 0x4c5   : > { %v3937_v29 = vrot.slane %v3935_v26, 2  ;;  %v3946_v16 = vmul.f32 %v8225_v19, %v7013_v0  ;;  %v3947_v8 = vmul.f32 %v8226_v23, %v7013_v0  ;;  %v7236_v39 = vadd.f32 %v3910_v55, %v8227_v34 }
 0x4c6   : > { %v3934_v41 = vadd.f32 %v3932_v33, %v3929_v15  ;;  %v8228_v63 = vstv %s8131_s1  ;;  %v8229_v9 = vstv %s8220_s9  ;;  %v3927_v46 = vadd.f32 %v3925_v32, %v3922_v62  ;;  %s8237_s1 = sld [smem:[#allocation94_spill]] }
 0x4c7   : > { %v3952_v21 = vmul.f32 %v8228_v63, %v7013_v0  ;;  %v3957_v4 = vmul.f32 %v8229_v9, %v7013_v0  ;;  %v3949_v53 = vrot.slane %v3947_v8, 1  ;;  %v3977_v37 = vmul.f32 %v7184_v5, %v6874_v48 }
 0x4c8   : > { %v3978_v26 = vmul.f32 %v7194_v27, %v6884_v3  ;;  %v3939_v22 = vadd.f32 %v3937_v29, %v3934_v41  ;;  %v3942_v19 = vrot.slane %v3940_v13, 3  ;;  %v3982_v55 = vrot.slane %v7184_v5, 4 }
 0x4c9   : > { %v3954_v23 = vrot.slane %v3952_v21, 2  ;;  %v8230_v15 = vstv %s8224_s4  ;;  %v3951_v34 = vadd.f32 %v3949_v53, %v3946_v16  ;;  %v3986_v32 = vrot.slane %v7194_v27, 4 }
 0x4ca   : > { %v7251_v33 = vadd.f32 %v3927_v46, %v8230_v15  ;;  %v3979_v63 = vadd.f32 %v3978_v26, %v3977_v37  ;;  %v3944_v62 = vadd.f32 %v3942_v19, %v3939_v22  ;;  %v3959_v8 = vrot.slane %v3957_v4, 3  ;;  %s4920_s11 = sshll.u32 %s8267_s6, 4 }
 0x4cb   : > { %v3984_v9 = vmul.f32 %v3982_v55, %v6874_v48  ;;  %v4073_v0 = vmul.f32 %v6932_v58, %v7108_v20  ;;  %v3956_v29 = vadd.f32 %v3954_v23, %v3951_v34  ;;  %v3988_v41 = vmul.f32 %v3986_v32, %v6884_v3  ;;  %s366_s18 = scalar_lea.vmem %s8268_s8, %s4920_s11 }
 0x4cc   : > { %v3980_v13 = vmul.f32 0.70710677, %v3979_v63  ;;  %v7259_v21 = vrot.slane %v7236_v39, 4  ;;  %v7262_v46 = vrot.slane %v7251_v33, 4  ;;  %v4074_v16 = vmul.f32 %v6948_v45, %v7130_v6 }
 0x4cd   : > { %v8232_v4 = vrot.slane %v6932_v58, 4  ;;  %v8233_v53 = vrot.slane %v6948_v45, 4  ;;  %v8234_v26 = vstv %s8231_s0  ;;  %v3989_v3 = vadd.f32 %v3988_v41, %v3984_v9 }
 0x4ce   : > { %v7274_v22 = vadd.f32 %v3944_v62, %v8234_v26  ;;  %v8235_v19 = vmax.f32 %v7015_v35, %v7050_v60  ;;  %v4081_v15 = vmul.f32 %v7184_v5, %v7108_v20  ;;  %v4075_v34 = vadd.f32 %v4074_v16, %v4073_v0 }
 0x4cf   : > { %v4077_v48 = vmul.f32 %v8232_v4, %v7108_v20  ;;  %v4078_v37 = vmul.f32 %v8233_v53, %v7130_v6  ;;  %v4082_v58 = vmul.f32 %v7194_v27, %v7130_v6  ;;  %v4085_v4 = vmul.f32 %v3982_v55, %v7108_v20 }
 0x4d0   : > { %v3992_v23 = vmax.f32 %v8235_v19, %v3980_v13  ;;  %v3961_v45 = vadd.f32 %v3959_v8, %v3956_v29  ;;  %v3990_v53 = vmul.f32 0.70710677, %v3989_v3  ;;  %v4086_v62 = vmul.f32 %v3986_v32, %v7130_v6 }
 0x4d1   : > { %v4079_v63 = vadd.f32 %v4078_v37, %v4077_v48  ;;  %v4173_v9 = vmul.f32 %v7207_v42, %v6897_v61  ;;  %v4076_v41 = vmul.f32 0.70710677, %v4075_v34  ;;  %v4083_v19 = vadd.f32 %v4082_v58, %v4081_v15 }
 0x4d2   : > { %v4174_v5 = vmul.f32 %v7223_v24, %v6910_v57  ;;  %v3993_v0 = vmax.f32 %v3992_v23, %v3990_v53  ;;  %v8236_v16 = vmax.f32 %v7050_v60, %v7015_v35  ;;  %v4087_v20 = vadd.f32 %v4086_v62, %v4085_v4 }
 0x4d3   : > { %v4080_v26 = vmul.f32 0.70710677, %v4079_v63  ;;  %v4084_v8 = vmul.f32 0.70710677, %v4083_v19  ;;  %v8238_v14 = vstv %s8237_s1 }
 0x4d4   : > { %v4039_v27 = vmax.f32 %v8236_v16, %v3990_v53  ;;  %v4175_v29 = vadd.f32 %v4174_v5, %v4173_v9  ;;  %v3994_v48 = vsub.f32 %v7015_v35, %v3993_v0  ;;  %v3997_v37 = vsub.f32 %v7050_v60, %v3993_v0 }
 0x4d5   : > { %v4089_v6 = vmax.f32 %v4076_v41, %v4080_v26  ;;  %v4124_v32 = vmax.f32 %v4080_v26, %v4076_v41  ;;  %v4000_v3 = vsub.f32 %v3980_v13, %v3993_v0  ;;  %v4003_v15 = vsub.f32 %v3990_v53, %v3993_v0 }
 0x4d6   : > { %v4040_v34 = vmax.f32 %v4039_v27, %v3980_v13  ;;  %v4088_v23 = vmul.f32 0.70710677, %v4087_v20  ;;  %v7295_v58 = vmul.f32 0.70710677, %v4175_v29  ;;  %v7299_v16 = vadd.f32 %v3961_v45, %v8238_v14 }
 0x4d7   : > { %v4090_v63 = vmax.f32 %v4089_v6, %v4084_v8  ;;  %v3995_v4 = vmul.f32 1.442695, %v3994_v48  ;;  %v3998_v62 = vmul.f32 1.442695, %v3997_v37  ;;  %v4001_v19 = vmul.f32 1.442695, %v4000_v3 }
 0x4d8   : > { %v4004_v55 = vmul.f32 1.442695, %v4003_v15  ;;  %v4041_v9 = vsub.f32 %v7050_v60, %v4040_v34  ;;  %v4044_v5 = vsub.f32 %v7015_v35, %v4040_v34  ;;  %v4047_v47 = vsub.f32 %v3990_v53, %v4040_v34 }
 0x4d9   : > { %5377 = vpow2.f32 %v3995_v4  ;;  %v4050_v25 = vsub.f32 %v3980_v13, %v4040_v34  ;;  %v4091_v0 = vmax.f32 %v4090_v63, %v4088_v23  ;;  %v4125_v27 = vmax.f32 %v4124_v32, %v4088_v23 }
 0x4da   : > { %5379 = vpow2.f32 %v3998_v62  ;;  %v4042_v20 = vmul.f32 1.442695, %v4041_v9  ;;  %v4045_v6 = vmul.f32 1.442695, %v4044_v5  ;;  %v4048_v29 = vmul.f32 1.442695, %v4047_v47 }
 0x4db   : > { %5381 = vpow2.f32 %v4001_v19  ;;  %v4051_v14 = vmul.f32 1.442695, %v4050_v25  ;;  %v4092_v45 = vsub.f32 %v4076_v41, %v4091_v0  ;;  %v4095_v48 = vsub.f32 %v4080_v26, %v4091_v0 }
 0x4dc   : > { %5383 = vpow2.f32 %v4004_v55  ;;  %v4098_v37 = vsub.f32 %v4084_v8, %v4091_v0  ;;  %v4101_v3 = vsub.f32 %v4088_v23, %v4091_v0  ;;  %v4126_v15 = vmax.f32 %v4125_v27, %v4084_v8 }
 0x4dd   : > { %5385 = vpow2.f32 %v4042_v20  ;;  %v4093_v60 = vmul.f32 1.442695, %v4092_v45  ;;  %v8239_v35 = vrot.slane %v7207_v42, 4  ;;  %v7861_v53 = vrot.slane %v7223_v24, 4 }
 0x4de   : > { %5387 = vpow2.f32 %v4045_v6  ;;  %v4096_v32 = vmul.f32 1.442695, %v4095_v48  ;;  %v4099_v34 = vmul.f32 1.442695, %v4098_v37  ;;  %v4127_v47 = vsub.f32 %v4080_v26, %v4126_v15 }
 0x4df   : > { %v4180_v13 = vmul.f32 %v8239_v35, %v6897_v61  ;;  %5389 = vpow2.f32 %v4048_v29  ;;  %v4130_v25 = vsub.f32 %v4076_v41, %v4126_v15  ;;  %v4133_v63 = vsub.f32 %v4088_v23, %v4126_v15 }
 0x4e0   : > { %v4136_v4 = vsub.f32 %v4084_v8, %v4126_v15  ;;  %5391 = vpow2.f32 %v4051_v14  ;;  %v4102_v55 = vmul.f32 1.442695, %v4101_v3  ;;  %v4128_v62 = vmul.f32 1.442695, %v4127_v47 }
 0x4e1   : > { %v4184_v19 = vmul.f32 %v7861_v53, %v6910_v57  ;;  %5393 = vpow2.f32 %v4093_v60  ;;  %v4131_v9 = vmul.f32 1.442695, %v4130_v25  ;;  %v4134_v61 = vmul.f32 1.442695, %v4133_v63 }
 0x4e2   : > { %v8240_v5 = vmax.f32 %v7055_v28, %v7070_v54  ;;  %5395 = vpow2.f32 %v4096_v32  ;;  %v4137_v26 = vmul.f32 1.442695, %v4136_v4  ;;  %v7315_v8 = vrot.slane %v7274_v22, 4 }
 0x4e3   : > { %v4185_v41 = vadd.f32 %v4184_v19, %v4180_v13  ;;  %5397 = vpow2.f32 %v4099_v34  ;;  %v4269_v23 = vmul.f32 %v6961_v59, %v7140_v11  ;;  %v4270_v57 = vmul.f32 %v6977_v31, %v7162_v43 }
 0x4e4   : > { %v4188_v0 = vmax.f32 %v8240_v5, %v7295_v58  ;;  %8241 = vst [vmem:[#allocation97_spill] sm:$0xff] %v7315_v8  ;;  %v8242_v27 = vrot.slane %v6961_v59, 4  ;;  %5399 = vpow2.f32 %v4102_v55  ;;  %v7327_v29 = vrot.slane %v7299_v16, 4 }
 0x4e5   : > { %v7324_v6 = vmul.f32 0.70710677, %v4185_v41  ;;  %v8244_v14 = vrot.slane %v6977_v31, 4  ;;  %5401 = vpow2.f32 %v4128_v62  ;;  %v4271_v48 = vadd.f32 %v4270_v57, %v4269_v23 }
 0x4e6   : > { %v4273_v20 = vmul.f32 %v8242_v27, %v7140_v11  ;;  %8243 = vst [vmem:[#allocation98_spill] sm:$0xff] %v7327_v29  ;;  %v7334_v37 = vmul.f32 %v7207_v42, %v7140_v11  ;;  %v7338_v59 = vmul.f32 %v7223_v24, %v7162_v43  ;;  %v5378_v3 = vpop.eup %5377  ;;  %5403 = vpow2.f32 %v4131_v9 }
 0x4e7   : > { %v4274_v45 = vmul.f32 %v8244_v14, %v7162_v43  ;;  %v7341_v15 = vmax.f32 %v4188_v0, %v7324_v6  ;;  %v8245_v31 = vmax.f32 %v7070_v54, %v7055_v28  ;;  %v7352_v13 = vmul.f32 %v8239_v35, %v7140_v11  ;;  %v5380_v32 = vpop.eup %5379 }
 0x4e8   : > { %v4010_v34 = vmul.f32 %v5378_v3, %v6990_v52  ;;  %v4024_v47 = vmul.f32 %v5378_v3, %v7005_v17  ;;  %5405 = vpow2.f32 %v4134_v61  ;;  %v5382_v63 = vpop.eup %5381  ;;  %v4006_v4 = vadd.f32 %v5380_v32, %v5378_v3 }
 0x4e9   : > { %v7347_v60 = vmax.f32 %v8245_v31, %v7324_v6  ;;  %v7356_v25 = vadd.f32 %v4274_v45, %v4273_v20  ;;  %v4014_v55 = vmul.f32 %v5380_v32, %v7021_v1  ;;  %v4028_v62 = vmul.f32 %v5380_v32, %v7032_v10  ;;  %v5384_v19 = vpop.eup %5383 }
 0x4ea   : > { %5407 = vpow2.f32 %v4137_v26  ;;  %v4016_v42 = vmul.f32 %v5382_v63, %v7236_v39  ;;  %v4030_v11 = vmul.f32 %v5382_v63, %v7251_v33  ;;  %v4190_v9 = vsub.f32 %v7055_v28, %v7341_v15  ;;  %v5386_v61 = vpop.eup %5385 }
 0x4eb   : > { %v7364_v5 = vmul.f32 0.70710677, %v4271_v48  ;;  %v4007_v0 = vadd.f32 %v5382_v63, %v4006_v4  ;;  %v4015_v41 = vadd.f32 %v4014_v55, %v4010_v34  ;;  %v4029_v23 = vadd.f32 %v4028_v62, %v4024_v47  ;;  %v5388_v27 = vpop.eup %5387 }
 0x4ec   : > { %v4021_v26 = vmul.f32 %v5384_v19, %v7259_v21  ;;  %v4035_v20 = vmul.f32 %v5384_v19, %v7262_v46  ;;  %v4057_v14 = vmul.f32 %v5386_v61, %v7021_v1  ;;  %v4065_v45 = vmul.f32 %v5386_v61, %v7032_v10  ;;  %v5390_v3 = vpop.eup %5389 }
 0x4ed   : > { %v4008_v31 = vadd.f32 %v5384_v19, %v4007_v0  ;;  %v4017_v48 = vadd.f32 %v4016_v42, %v4015_v41  ;;  %v4031_v35 = vadd.f32 %v4030_v11, %v4029_v23  ;;  %v4053_v32 = vadd.f32 %v5388_v27, %v5386_v61  ;;  %v5392_v63 = vpop.eup %5391 }
 0x4ee   : > { %v4058_v34 = vmul.f32 %v5388_v27, %v6990_v52  ;;  %v4060_v47 = vmul.f32 %v5390_v3, %v7259_v21  ;;  %v4066_v4 = vmul.f32 %v5388_v27, %v7005_v17  ;;  %v4191_v55 = vmul.f32 1.442695, %v4190_v9  ;;  %v5394_v62 = vpop.eup %5393 }
 0x4ef   : > { %5409 = vrcp.f32 %v4008_v31  ;;  %v7375_v53 = vadd.f32 %v4021_v26, %v4017_v48  ;;  %v4054_v57 = vadd.f32 %v5390_v3, %v4053_v32  ;;  %v4068_v50 = vmul.f32 %v5390_v3, %v7262_v46  ;;  %v5396_v44 = vpop.eup %5395 }
 0x4f0   : > { %v7378_v19 = vadd.f32 %v4035_v20, %v4031_v35  ;;  %v4059_v42 = vadd.f32 %v4058_v34, %v4057_v14  ;;  %v4062_v11 = vmul.f32 %v5392_v63, %v7236_v39  ;;  %v4067_v61 = vadd.f32 %v4066_v4, %v4065_v45  ;;  %v5398_v0 = vpop.eup %5397 }
 0x4f1   : > { %v4055_v41 = vadd.f32 %v5392_v63, %v4054_v57  ;;  %v4104_v23 = vadd.f32 %v5396_v44, %v5394_v62  ;;  %v4108_v27 = vmul.f32 %v5394_v62, %v6990_v52  ;;  %v4109_v9 = vmul.f32 %v5396_v44, %v7021_v1  ;;  %v5400_v31 = vpop.eup %5399 }
 0x4f2   : > { %v4061_v26 = vadd.f32 %v4060_v47, %v4059_v42  ;;  %v4069_v48 = vadd.f32 %v4068_v50, %v4067_v61  ;;  %v4070_v32 = vmul.f32 %v5392_v63, %v7251_v33  ;;  %v4116_v3 = vmul.f32 %v5394_v62, %v7005_v17  ;;  %v5402_v20 = vpop.eup %5401 }
 0x4f3   : > { %5411 = vrcp.f32 %v4055_v41  ;;  %v4105_v14 = vadd.f32 %v5398_v0, %v4104_v23  ;;  %v4110_v35 = vadd.f32 %v4109_v9, %v4108_v27  ;;  %v4111_v45 = vmul.f32 %v5398_v0, %v7236_v39  ;;  %v5404_v34 = vpop.eup %5403 }
 0x4f4   : > { %v4063_v57 = vadd.f32 %v4062_v11, %v4061_v26  ;;  %v7386_v4 = vadd.f32 %v4070_v32, %v4069_v48  ;;  %v4113_v29 = vmul.f32 %v5400_v31, %v7259_v21  ;;  %v4117_v8 = vmul.f32 %v5396_v44, %v7032_v10 }
 0x4f5   : > { %v5406_v47 = vpop.eup %5405  ;;  %v4106_v50 = vadd.f32 %v5400_v31, %v4105_v14  ;;  %v4112_v42 = vadd.f32 %v4111_v45, %v4110_v35  ;;  %v4119_v63 = vmul.f32 %v5398_v0, %v7251_v33  ;;  %v4139_v62 = vadd.f32 %v5404_v34, %v5402_v20 }
 0x4f6   : > { %v4118_v41 = vadd.f32 %v4117_v8, %v4116_v3  ;;  %v4121_v23 = vmul.f32 %v5400_v31, %v7262_v46  ;;  %v4143_v27 = vmul.f32 %v5402_v20, %v7021_v1  ;;  %v4144_v11 = vmul.f32 %v5404_v34, %v6990_v52 }
 0x4f7   : > { %v5408_v61 = vpop.eup %5407  ;;  %5413 = vrcp.f32 %v4106_v50  ;;  %v4114_v9 = vadd.f32 %v4113_v29, %v4112_v42  ;;  %v4140_v26 = vadd.f32 %v5406_v47, %v4139_v62  ;;  %v4146_v48 = vmul.f32 %v5406_v47, %v7259_v21 }
 0x4f8   : > { %v4120_v44 = vadd.f32 %v4119_v63, %v4118_v41  ;;  %v4145_v32 = vadd.f32 %v4144_v11, %v4143_v27  ;;  %v4151_v14 = vmul.f32 %v5402_v20, %v7032_v10  ;;  %v4152_v0 = vmul.f32 %v5404_v34, %v7005_v17 }
 0x4f9   : > { %v4141_v35 = vadd.f32 %v5408_v61, %v4140_v26  ;;  %v4148_v8 = vmul.f32 %v5408_v61, %v7236_v39  ;;  %v4154_v31 = vmul.f32 %v5406_v47, %v7262_v46  ;;  %5415 = vpow2.f32 %v4191_v55 }
 0x4fa   : > { %v4147_v1 = vadd.f32 %v4146_v48, %v4145_v32  ;;  %v4153_v3 = vadd.f32 %v4152_v0, %v4151_v14  ;;  %v4156_v52 = vmul.f32 %v5408_v61, %v7251_v33  ;;  %v8246_v29 = vsub.f32 %v7070_v54, %v7341_v15 }
 0x4fb   : > { %5417 = vrcp.f32 %v4141_v35  ;;  %v4196_v10 = vsub.f32 %v7295_v58, %v7341_v15  ;;  %v4199_v17 = vsub.f32 %v7324_v6, %v7341_v15  ;;  %v4236_v39 = vmax.f32 %v7347_v60, %v7295_v58 }
 0x4fc   : > { %v4194_v21 = vmul.f32 1.442695, %v8246_v29  ;;  %v5410_v46 = vpop.eup %5409  ;;  %v4122_v55 = vadd.f32 %v4121_v23, %v4120_v44  ;;  %v4149_v20 = vadd.f32 %v4148_v8, %v4147_v1  ;;  %v4155_v45 = vadd.f32 %v4154_v31, %v4153_v3 }
 0x4fd   : > { %v4023_v33 = vmul.f32 %v5410_v46, %v7375_v53  ;;  %v4197_v34 = vmul.f32 1.442695, %v4196_v10  ;;  %v4200_v47 = vmul.f32 1.442695, %v4199_v17  ;;  %v7411_v50 = vmul.f32 0.70710677, %v7356_v25 }
 0x4fe   : > { %5419 = vpow2.f32 %v4194_v21  ;;  %v7414_v42 = vmul.f32 %v5410_v46, %v7378_v19  ;;  %v4237_v15 = vsub.f32 %v7070_v54, %v4236_v39  ;;  %v4240_v63 = vsub.f32 %v7055_v28, %v4236_v39 }
 0x4ff   : > { %v4243_v60 = vsub.f32 %v7324_v6, %v4236_v39  ;;  %5421 = vpow2.f32 %v4197_v34  ;;  %v4246_v62 = vsub.f32 %v7295_v58, %v4236_v39  ;;  %v4279_v53 = vadd.f32 %v7338_v59, %v7334_v37 }
 0x500   : > { %v8247_v61 = vrot.slane %v7223_v24, 4  ;;  %v5412_v41 = vpop.eup %5411  ;;  %5423 = vpow2.f32 %v4200_v47  ;;  %v4238_v19 = vmul.f32 1.442695, %v4237_v15  ;;  %v4241_v23 = vmul.f32 1.442695, %v4240_v63 }
 0x501   : > { %v4244_v27 = vmul.f32 1.442695, %v4243_v60  ;;  %v7425_v54 = vmul.f32 %v5412_v41, %v4063_v57  ;;  %v4157_v28 = vadd.f32 %v4156_v52, %v4155_v45  ;;  %v4247_v11 = vmul.f32 1.442695, %v4246_v62 }
 0x502   : > { %v4282_v25 = vmul.f32 %v8247_v61, %v7162_v43  ;;  %v7427_v6 = vmul.f32 0.70710677, %v4279_v53  ;;  %5425 = vpow2.f32 %v4238_v19  ;;  %v4285_v37 = vmax.f32 %v7364_v5, %v7411_v50 }
 0x503   : > { %v4320_v43 = vmax.f32 %v7411_v50, %v7364_v5  ;;  %5427 = vpow2.f32 %v4241_v23  ;;  %v4356_v24 = vmul.f32 %v6745_v49, %v4023_v33  ;;  %v4358_v59 = vmul.f32 %v6754_v30, %v7414_v42 }
 0x504   : > { %v4283_v58 = vadd.f32 %v4282_v25, %v7352_v13  ;;  %v4370_v57 = vmul.f32 %v6748_v51, %v4023_v33  ;;  %v5414_v26 = vpop.eup %5413  ;;  %5429 = vpow2.f32 %v4244_v27  ;;  %v4286_v13 = vmax.f32 %v4285_v37, %v7427_v6 }
 0x505   : > { %v4372_v44 = vmul.f32 %v6757_v18, %v7414_v42  ;;  %v7444_v32 = vmul.f32 %v5412_v41, %v7386_v4  ;;  %v7446_v14 = vmul.f32 %v5414_v26, %v4114_v9  ;;  %v7448_v0 = vmul.f32 %v5414_v26, %v4122_v55 }
 0x506   : > { %v7438_v48 = vmul.f32 0.70710677, %v4283_v58  ;;  %5431 = vpow2.f32 %v4247_v11  ;;  %v5416_v35 = vpop.eup %5415  ;;  %v7452_v1 = vadd.f32 %v4358_v59, %v4356_v24  ;;  %v4387_v4 = vmul.f32 %v6751_v56, %v4023_v33  ;;  %v8249_v59 = vld [vmem:[#allocation98_spill] sm:$0xff] }
 0x507   : > { %v7454_v3 = vadd.f32 %v4372_v44, %v4370_v57  ;;  %v4206_v52 = vmul.f32 %v5416_v35, %v7025_v2  ;;  %v4220_v29 = vmul.f32 %v5416_v35, %v7048_v7  ;;  %v4389_v9 = vmul.f32 %v6760_v40, %v7414_v42 }
 0x508   : > { %v4287_v8 = vmax.f32 %v4286_v13, %v7438_v48  ;;  %v4321_v31 = vmax.f32 %v4320_v43, %v7438_v48  ;;  %v5418_v21 = vpop.eup %5417  ;;  %v4404_v15 = vmul.f32 %v6763_v38, %v4023_v33  ;;  %v8248_v43 = vld [vmem:[#allocation97_spill] sm:$0xff] }
 0x509   : > { %v7465_v45 = vmul.f32 %v5418_v21, %v4149_v20  ;;  %v7467_v34 = vmul.f32 %v5418_v21, %v4157_v28 }
 0x50a   : > { %v4288_v10 = vsub.f32 %v7364_v5, %v4287_v8  ;;  %v4291_v17 = vsub.f32 %v7411_v50, %v4287_v8  ;;  %v4294_v39 = vsub.f32 %v7427_v6, %v4287_v8  ;;  %v4297_v46 = vsub.f32 %v7438_v48, %v4287_v8 }
 0x50b   : > { %v5420_v55 = vpop.eup %5419  ;;  %v4322_v47 = vmax.f32 %v4321_v31, %v7427_v6 }
 0x50c   : > { %v4202_v63 = vadd.f32 %v5420_v55, %v5416_v35  ;;  %v4210_v60 = vmul.f32 %v5420_v55, %v7058_v36  ;;  %v4224_v62 = vmul.f32 %v5420_v55, %v7073_v12  ;;  %v4289_v53 = vmul.f32 1.442695, %v4288_v10  ;;  %v5422_v23 = vpop.eup %5421 }
 0x50d   : > { %v4292_v61 = vmul.f32 1.442695, %v4291_v17  ;;  %v4295_v25 = vmul.f32 1.442695, %v4294_v39  ;;  %v4298_v41 = vmul.f32 1.442695, %v4297_v46  ;;  %v4323_v19 = vsub.f32 %v7411_v50, %v4322_v47  ;;  %v5424_v11 = vpop.eup %5423 }
 0x50e   : > { %v4211_v20 = vadd.f32 %v4210_v60, %v4206_v52  ;;  %v4225_v27 = vadd.f32 %v4224_v62, %v4220_v29  ;;  %5433 = vpow2.f32 %v4289_v53  ;;  %v4326_v28 = vsub.f32 %v7364_v5, %v4322_v47 }
 0x50f   : > { %v4203_v58 = vadd.f32 %v5422_v23, %v4202_v63  ;;  %v4212_v33 = vmul.f32 %v5422_v23, %v7274_v22  ;;  %v4226_v37 = vmul.f32 %v5422_v23, %v7299_v16  ;;  %5435 = vpow2.f32 %v4292_v61  ;;  %v5426_v50 = vpop.eup %5425  ;;  %v8250_v23 = vld [vmem:[#allocation14_spill] sm:$0xff] }
 0x510   : > { %v4217_v24 = vmul.f32 %v5424_v11, %v8248_v43  ;;  %v4231_v57 = vmul.f32 %v5424_v11, %v8249_v59  ;;  %5437 = vpow2.f32 %v4295_v25  ;;  %v4324_v26 = vmul.f32 1.442695, %v4323_v19  ;;  %v5428_v8 = vpop.eup %5427 }
 0x511   : > { %v4204_v13 = vadd.f32 %v5424_v11, %v4203_v58  ;;  %v4213_v44 = vadd.f32 %v4212_v33, %v4211_v20  ;;  %v4227_v35 = vadd.f32 %v4226_v37, %v4225_v27  ;;  %5439 = vpow2.f32 %v4298_v41  ;;  %v5430_v29 = vpop.eup %5429 }
 0x512   : > { %v4253_v5 = vmul.f32 %v5426_v50, %v7058_v36  ;;  %v4261_v31 = vmul.f32 %v5426_v50, %v7073_v12  ;;  %5441 = vpow2.f32 %v4324_v26  ;;  %v4327_v52 = vmul.f32 1.442695, %v4326_v28 }
 0x513   : > { %5443 = vrcp.f32 %v4204_v13  ;;  %v4218_v21 = vadd.f32 %v4217_v24, %v4213_v44  ;;  %v4249_v10 = vadd.f32 %v5428_v8, %v5426_v50  ;;  %v7481_v17 = vadd.f32 %v4389_v9, %v4387_v4  ;;  %v5432_v39 = vpop.eup %5431 }
 0x514   : > { %v4232_v46 = vadd.f32 %v4231_v57, %v4227_v35  ;;  %v4254_v55 = vmul.f32 %v5428_v8, %v7025_v2  ;;  %v4256_v63 = vmul.f32 %v5430_v29, %v8248_v43  ;;  %v4262_v60 = vmul.f32 %v5428_v8, %v7048_v7 }
 0x515   : > { %v4250_v62 = vadd.f32 %v5430_v29, %v4249_v10  ;;  %v4258_v53 = vmul.f32 %v5432_v39, %v7274_v22  ;;  %v4264_v61 = vmul.f32 %v5430_v29, %v8249_v59  ;;  %5445 = vpow2.f32 %v4327_v52 }
 0x516   : > { %v4255_v25 = vadd.f32 %v4254_v55, %v4253_v5  ;;  %v4263_v41 = vadd.f32 %v4262_v60, %v4261_v31  ;;  %v4329_v19 = vsub.f32 %v7438_v48, %v4322_v47  ;;  %v4332_v4 = vsub.f32 %v7427_v6, %v4322_v47 }
 0x517   : > { %v4251_v9 = vadd.f32 %v5432_v39, %v4250_v62  ;;  %v4406_v20 = vmul.f32 %v8250_v23, %v7414_v42  ;;  %v4420_v27 = vmul.f32 %v6745_v49, %v7425_v54  ;;  %v4421_v28 = vmul.f32 %v6754_v30, %v7444_v32 }
 0x518   : > { %v4257_v11 = vadd.f32 %v4256_v63, %v4255_v25  ;;  %v4265_v58 = vadd.f32 %v4264_v61, %v4263_v41  ;;  %v4330_v33 = vmul.f32 1.442695, %v4329_v19  ;;  %v4333_v37 = vmul.f32 1.442695, %v4332_v4 }
 0x519   : > { %5447 = vrcp.f32 %v4251_v9  ;;  %v4266_v24 = vmul.f32 %v5432_v39, %v7299_v16  ;;  %v7497_v48 = vadd.f32 %v4406_v20, %v4404_v15  ;;  %v4429_v6 = vmul.f32 %v6748_v51, %v7425_v54 }
 0x51a   : > { %v4259_v47 = vadd.f32 %v4258_v53, %v4257_v11  ;;  %5449 = vpow2.f32 %v4330_v33  ;;  %v7501_v42 = vadd.f32 %v4421_v28, %v4420_v27  ;;  %v4430_v57 = vmul.f32 %v6757_v18, %v7444_v32 }
 0x51b   : > { %v5434_v26 = vpop.eup %5433  ;;  %5451 = vpow2.f32 %v4333_v37  ;;  %v4441_v50 = vmul.f32 %v6751_v56, %v7425_v54  ;;  %v4442_v13 = vmul.f32 %v6760_v40, %v7444_v32  ;;  %v4453_v15 = vmul.f32 %v6763_v38, %v7425_v54 }
 0x51c   : > { %v5436_v44 = vpop.eup %5435  ;;  %v4267_v35 = vadd.f32 %v4266_v24, %v4265_v58  ;;  %v4304_v8 = vmul.f32 %v5434_v26, %v7025_v2  ;;  %v4312_v5 = vmul.f32 %v5434_v26, %v7048_v7  ;;  %v4454_v31 = vmul.f32 %v8250_v23, %v7444_v32 }
 0x51d   : > { %v5438_v52 = vpop.eup %5437  ;;  %v4300_v29 = vadd.f32 %v5436_v44, %v5434_v26  ;;  %v4305_v10 = vmul.f32 %v5436_v44, %v7058_v36  ;;  %v4313_v39 = vmul.f32 %v5436_v44, %v7073_v12  ;;  %v7517_v55 = vadd.f32 %v4430_v57, %v4429_v6  ;;  %v8251_v44 = vld [vmem:[#allocation9_spill] sm:$0xff] }
 0x51e   : > { %v5440_v63 = vpop.eup %5439  ;;  %v4307_v54 = vmul.f32 %v5438_v52, %v7274_v22  ;;  %v4315_v60 = vmul.f32 %v5438_v52, %v7299_v16  ;;  %v7521_v62 = vadd.f32 %v4442_v13, %v4441_v50  ;;  %v4465_v53 = vmul.f32 %v6745_v49, %v7446_v14 }
 0x51f   : > { %v5442_v61 = vpop.eup %5441  ;;  %v4301_v32 = vadd.f32 %v5438_v52, %v4300_v29  ;;  %v4306_v25 = vadd.f32 %v4305_v10, %v4304_v8  ;;  %v4314_v41 = vadd.f32 %v4313_v39, %v4312_v5  ;;  %v7525_v19 = vadd.f32 %v4454_v31, %v4453_v15  ;;  %v8253_v52 = vld [vmem:[#allocation10_spill] sm:$0xff]  ;;  %v8254_v10 = vld [vmem:[#allocation21_spill] sm:$0xff] }
 0x520   : > { %v5444_v4 = vpop.eup %5443  ;;  %v4309_v9 = vmul.f32 %v5440_v63, %v8248_v43  ;;  %v4317_v20 = vmul.f32 %v5440_v63, %v8249_v59  ;;  %v4339_v27 = vmul.f32 %v5442_v61, %v7058_v36  ;;  %v4466_v28 = vmul.f32 %v6754_v30, %v7448_v0 }
 0x521   : > { %v4219_v11 = vmul.f32 %v5444_v4, %v4218_v21  ;;  %v4233_v58 = vmul.f32 %v5444_v4, %v4232_v46  ;;  %v4302_v33 = vadd.f32 %v5440_v63, %v4301_v32  ;;  %v4308_v37 = vadd.f32 %v4307_v54, %v4306_v25  ;;  %v8255_v63 = vld [vmem:[#allocation13_spill] sm:$0xff]  ;;  %v8256_v32 = vld [vmem:[#allocation12_spill] sm:$0xff] }
 0x522   : > { %v5446_v24 = vpop.eup %5445  ;;  %v4316_v6 = vadd.f32 %v4315_v60, %v4314_v41  ;;  %v4347_v57 = vmul.f32 %v5442_v61, %v7073_v12  ;;  %v7533_v26 = vadd.f32 %v4466_v28, %v4465_v53  ;;  %v7537_v50 = vmul.f32 %v6748_v51, %v7446_v14  ;;  %v8252_v12 = vld [vmem:[#allocation23_spill] sm:$0xff] }
 0x523   : > { %5453 = vrcp.f32 %v4302_v33  ;;  %v4310_v13 = vadd.f32 %v4309_v9, %v4308_v37  ;;  %v4340_v36 = vmul.f32 %v5446_v24, %v7025_v2  ;;  %v7542_v21 = vmul.f32 %v6757_v18, %v7448_v0 }
 0x524   : > { %v4335_v46 = vadd.f32 %v5446_v24, %v5442_v61  ;;  %v4348_v15 = vmul.f32 %v5446_v24, %v7048_v7  ;;  %v4361_v8 = vmul.f32 %v8251_v44, %v4219_v11  ;;  %v4364_v5 = vmul.f32 %v8252_v12, %v4233_v58  ;;  %v8257_v61 = vld [vmem:[#allocation22_spill] sm:$0xff] }
 0x525   : > { %v4341_v31 = vadd.f32 %v4340_v36, %v4339_v27  ;;  %v4375_v29 = vmul.f32 %v8253_v52, %v4219_v11  ;;  %v4378_v39 = vmul.f32 %v8254_v10, %v4233_v58  ;;  %v4392_v54 = vmul.f32 %v8255_v63, %v4219_v11 }
 0x526   : > { %v5448_v60 = vpop.eup %5447  ;;  %v4349_v2 = vadd.f32 %v4348_v15, %v4347_v57  ;;  %v4362_v53 = vadd.f32 %v4361_v8, %v7452_v1  ;;  %v4395_v25 = vmul.f32 %v8256_v32, %v4233_v58  ;;  %v4409_v41 = vmul.f32 %v8257_v61, %v4219_v11 }
 0x527   : > { %v5450_v7 = vpop.eup %5449  ;;  %v4260_v4 = vmul.f32 %v5448_v60, %v4259_v47  ;;  %v4268_v9 = vmul.f32 %v5448_v60, %v4267_v35  ;;  %v4376_v28 = vadd.f32 %v4375_v29, %v7454_v3  ;;  %v4393_v27 = vadd.f32 %v4392_v54, %v7481_v17  ;;  %v8258_v60 = vld [vmem:[#allocation17_spill] sm:$0xff]  ;;  %v8259_v54 = vld [vmem:[#allocation11_spill] sm:$0xff] }
 0x528   : > { %v5452_v33 = vpop.eup %5451  ;;  %v4336_v37 = vadd.f32 %v5450_v7, %v4335_v46  ;;  %v4342_v24 = vmul.f32 %v5450_v7, %v8248_v43  ;;  %v4350_v36 = vmul.f32 %v5450_v7, %v8249_v59  ;;  %v4365_v57 = vadd.f32 %v4364_v5, %v4362_v53 }
 0x529   : > { %v4344_v1 = vmul.f32 %v5452_v33, %v7274_v22  ;;  %v4352_v15 = vmul.f32 %v5452_v33, %v7299_v16  ;;  %v4379_v8 = vadd.f32 %v4378_v39, %v4376_v28  ;;  %v4396_v11 = vadd.f32 %v4395_v25, %v4393_v27  ;;  %v8260_v22 = vld [vmem:[#allocation19_spill] sm:$0xff] }
 0x52a   : > { %v4337_v18 = vadd.f32 %v5452_v33, %v4336_v37  ;;  %v4343_v47 = vadd.f32 %v4342_v24, %v4341_v31  ;;  %v4351_v35 = vadd.f32 %v4350_v36, %v4349_v2  ;;  %v4366_v3 = vadd.f32 %v4365_v57, %v8258_v60 }
 0x52b   : > { %v4381_v29 = vrot.slane %v4379_v8, 7  ;;  %v4398_v17 = vrot.slane %v4396_v11, 6  ;;  %v4410_v46 = vadd.f32 %v4409_v41, %v7497_v48  ;;  %v4412_v43 = vmul.f32 %v8259_v54, %v4233_v58 }
 0x52c   : > { %v4318_v51 = vadd.f32 %v4317_v20, %v4316_v6  ;;  %5455 = vrcp.f32 %v4337_v18  ;;  %v4345_v59 = vadd.f32 %v4344_v1, %v4343_v47  ;;  %v4353_v5 = vadd.f32 %v4352_v15, %v4351_v35  ;;  %v8261_v20 = vld [vmem:[#allocation16_spill] sm:$0xff]  ;;  %v8262_v35 = vld [vmem:[#allocation18_spill] sm:$0xff] }
 0x52d   : > { %v7563_v53 = vadd.f32 %v8260_v22, %v4366_v3  ;;  %v4383_v16 = vadd.f32 %v4381_v29, %v8258_v60  ;;  %v4413_v39 = vadd.f32 %v4412_v43, %v4410_v46  ;;  %v4423_v31 = vmul.f32 %v8251_v44, %v4260_v4 }
 0x52e   : > { %v4400_v2 = vadd.f32 %v4398_v17, %v8258_v60  ;;  %v4425_v25 = vmul.f32 %v8252_v12, %v4268_v9  ;;  %v4432_v48 = vmul.f32 %v8253_v52, %v4260_v4  ;;  %v4444_v58 = vmul.f32 %v8255_v63, %v4260_v4 }
 0x52f   : > { %v7572_v18 = vadd.f32 %v8261_v20, %v4383_v16  ;;  %v4415_v6 = vrot.slane %v4413_v39, 5  ;;  %v4424_v41 = vadd.f32 %v4423_v31, %v7501_v42  ;;  %v4434_v7 = vmul.f32 %v8254_v10, %v4268_v9 }
 0x530   : > { %v5454_v28 = vpop.eup %5453  ;;  %v4433_v27 = vadd.f32 %v4432_v48, %v7517_v55  ;;  %v4445_v33 = vadd.f32 %v4444_v58, %v7521_v62  ;;  %v4446_v37 = vmul.f32 %v8256_v32, %v4268_v9  ;;  %v4456_v24 = vmul.f32 %v8257_v61, %v4260_v4  ;;  %v8263_v55 = vld [vmem:[#allocation95_spill] sm:$0xff] }
 0x531   : > { %v4311_v36 = vmul.f32 %v5454_v28, %v4310_v13  ;;  %v4319_v57 = vmul.f32 %v5454_v28, %v4318_v51  ;;  %v4417_v1 = vadd.f32 %v4415_v6, %v8258_v60  ;;  %v4426_v15 = vadd.f32 %v4425_v25, %v4424_v41 }
 0x532   : > { %v4435_v8 = vadd.f32 %v4434_v7, %v4433_v27  ;;  %v4447_v11 = vadd.f32 %v4446_v37, %v4445_v33  ;;  %v4457_v42 = vadd.f32 %v4456_v24, %v7525_v19  ;;  %v4458_v47 = vmul.f32 %v8259_v54, %v4268_v9  ;;  %v8264_v27 = vld [vmem:[#allocation96_spill] sm:$0xff] }
 0x533   : > { %v7584_v3 = vadd.f32 %v8262_v35, %v4400_v2  ;;  %v7587_v62 = vadd.f32 %v8263_v55, %v4417_v1  ;;  %v4427_v29 = vadd.f32 %v4426_v15, %v8258_v60  ;;  %v4468_v13 = vmul.f32 %v8251_v44, %v4311_v36 }
 0x534   : > { %v4437_v51 = vrot.slane %v4435_v8, 7  ;;  %v4449_v4 = vrot.slane %v4447_v11, 6  ;;  %v4459_v17 = vadd.f32 %v4458_v47, %v4457_v42  ;;  %v4476_v46 = vadd.f32 %v7542_v21, %v7537_v50 }
 0x535   : > { %v7594_v19 = vadd.f32 %v4427_v29, %v8260_v22  ;;  %v4469_v9 = vadd.f32 %v4468_v13, %v7533_v26  ;;  %v4470_v43 = vmul.f32 %v8252_v12, %v4319_v57  ;;  %v4477_v16 = vmul.f32 %v8253_v52, %v4311_v36 }
 0x536   : > { %v4439_v39 = vadd.f32 %v4437_v51, %v8258_v60  ;;  %v4451_v31 = vadd.f32 %v4449_v4, %v8258_v60  ;;  %v4461_v2 = vrot.slane %v4459_v17, 5  ;;  %v4486_v25 = vmul.f32 %v6751_v56, %v7446_v14 }
 0x537   : > { %v4471_v48 = vadd.f32 %v4470_v43, %v4469_v9  ;;  %v4478_v58 = vadd.f32 %v4477_v16, %v4476_v46  ;;  %v4479_v50 = vmul.f32 %v8254_v10, %v4319_v57  ;;  %v4487_v21 = vmul.f32 %v6760_v40, %v7448_v0  ;;  %v8265_v43 = vld [vmem:[#allocation15_spill] sm:$0xff] }
 0x538   : > { %v7607_v26 = vadd.f32 %v4439_v39, %v8261_v20  ;;  %v7610_v6 = vadd.f32 %v4451_v31, %v8262_v35  ;;  %v7613_v41 = vadd.f32 %v4461_v2, %v8258_v60  ;;  %v4489_v7 = vmul.f32 %v8255_v63, %v4311_v36 }
 0x539   : > { %v5456_v28 = vpop.eup %5455  ;;  %v4472_v33 = vadd.f32 %v4471_v48, %v8264_v27  ;;  %v4480_v37 = vadd.f32 %v4479_v50, %v4478_v58  ;;  %v4488_v24 = vadd.f32 %v4487_v21, %v4486_v25  ;;  %v4498_v1 = vmul.f32 %v6763_v38, %v7446_v14 }
 0x53a   : > { %v4346_v15 = vmul.f32 %v5456_v28, %v4345_v59  ;;  %v4354_v8 = vmul.f32 %v5456_v28, %v4353_v5  ;;  %v4491_v11 = vmul.f32 %v8256_v32, %v4319_v57  ;;  %v4499_v42 = vmul.f32 %v8250_v23, %v7448_v0 }
 0x53b   : > { %v4473_v60 = vadd.f32 %v4472_v33, %v8260_v22  ;;  %v4482_v47 = vrot.slane %v4480_v37, 7  ;;  %v4490_v29 = vadd.f32 %v4489_v7, %v4488_v24  ;;  %v4501_v13 = vmul.f32 %v8257_v61, %v4311_v36 }
 0x53c   : > { %v4500_v51 = vadd.f32 %v4499_v42, %v4498_v1  ;;  %v4503_v4 = vmul.f32 %v8259_v54, %v4319_v57  ;;  %v4510_v14 = vmul.f32 %v6745_v49, %v7465_v45  ;;  %v4511_v59 = vmul.f32 %v6754_v30, %v7467_v34  ;;  %v8266_v57 = vld [vmem:[#allocation20_spill] sm:$0xff] }
 0x53d   : > { %v4484_v5 = vadd.f32 %v4482_v47, %v8264_v27  ;;  %v4492_v0 = vadd.f32 %v4491_v11, %v4490_v29  ;;  %v4513_v17 = vmul.f32 %v8251_v44, %v4346_v15  ;;  %v4515_v46 = vmul.f32 %v8252_v12, %v4354_v8 }
 0x53e   : > { %v4502_v9 = vadd.f32 %v4501_v13, %v4500_v51  ;;  %v4512_v36 = vadd.f32 %v4511_v59, %v4510_v14  ;;  %v4519_v16 = vmul.f32 %v8265_v43, %v7465_v45  ;;  %v4520_v39 = vmul.f32 %v8266_v57, %v7467_v34 }
 0x53f   : > { %v4485_v49 = vadd.f32 %v4484_v5, %v8261_v20  ;;  %v4494_v31 = vrot.slane %v4492_v0, 6  ;;  %v4522_v30 = vmul.f32 %v8253_v52, %v4346_v15  ;;  %v4524_v2 = vmul.f32 %v8254_v10, %v4354_v8 }
 0x540   : > { %v4504_v25 = vadd.f32 %v4503_v4, %v4502_v9  ;;  %v4514_v44 = vadd.f32 %v4513_v17, %v4512_v36  ;;  %v4521_v48 = vadd.f32 %v4520_v39, %v4519_v16  ;;  %v4531_v12 = vmul.f32 %v6751_v56, %v7465_v45 }
 0x541   : > { %v4496_v58 = vadd.f32 %v4494_v31, %v8264_v27  ;;  %v4532_v50 = vmul.f32 %v6760_v40, %v7467_v34  ;;  %v4534_v21 = vmul.f32 %v8255_v63, %v4346_v15  ;;  %v4536_v7 = vmul.f32 %v8256_v32, %v4354_v8 }
 0x542   : > { %v4506_v28 = vrot.slane %v4504_v25, 5  ;;  %v4516_v52 = vadd.f32 %v4515_v46, %v4514_v44  ;;  %v4523_v10 = vadd.f32 %v4522_v30, %v4521_v48  ;;  %v4543_v33 = vmul.f32 %v6763_v38, %v7465_v45 }
 0x543   : > { %v4497_v37 = vadd.f32 %v4496_v58, %v8262_v35  ;;  %v4533_v56 = vadd.f32 %v4532_v50, %v4531_v12  ;;  %v4544_v24 = vmul.f32 %v8250_v23, %v7467_v34  ;;  %v4546_v1 = vmul.f32 %v8257_v61, %v4346_v15 }
 0x544   : > { %v4508_v40 = vadd.f32 %v4506_v28, %v8264_v27  ;;  %v4517_v63 = vadd.f32 %v4516_v52, %v8264_v27  ;;  %v4525_v32 = vadd.f32 %v4524_v2, %v4523_v10  ;;  %v4548_v11 = vmul.f32 %v8259_v54, %v4354_v8 }
 0x545   : > { %v4535_v42 = vadd.f32 %v4534_v21, %v4533_v56  ;;  %v4545_v47 = vadd.f32 %v4544_v24, %v4543_v33  ;;  %v4556_v38 = vsel %vm4555_vm11, %v7563_v53, %v7572_v18  ;;  %v4566_v45 = vsel %vm4555_vm11, %v4473_v60, %v4485_v49 }
 0x546   : > { %v4509_v34 = vadd.f32 %v4508_v40, %v8263_v55  ;;  %v4518_v23 = vadd.f32 %v4517_v63, %v8260_v22  ;;  %v4527_v61 = vrot.slane %v4525_v32, 7  ;;  %v4558_v15 = vsel %vm4557_vm12, %v4556_v38, %v7584_v3 }
 0x547   : > { %v4537_v29 = vadd.f32 %v4536_v7, %v4535_v42  ;;  %v4547_v13 = vadd.f32 %v4546_v1, %v4545_v47  ;;  %v4560_v54 = vsel %vm4559_vm13, %v4558_v15, %v7587_v62  ;;  %v4567_v8 = vsel %vm4557_vm12, %v4566_v45, %v4497_v37 }
 0x548   : > { %v4464_v53 = vadd.f32 %v7613_v41, %v8263_v55  ;;  %v4529_v18 = vadd.f32 %v4527_v61, %v8264_v27  ;;  %v4561_v60 = vsel %vm576_vm4, %v4560_v54, %v7594_v19  ;;  %v4568_v22 = vsel %vm4559_vm13, %v4567_v8, %v4509_v34 }
 0x549   : > { %v4539_v3 = vrot.slane %v4537_v29, 6  ;;  %v4549_v51 = vadd.f32 %v4548_v11, %v4547_v13  ;;  %v4563_v62 = vsel %vm4562_vm14, %v4561_v60, %v7607_v26  ;;  %v4569_v4 = vsel %vm576_vm4, %v4568_v22, %v4518_v23 }
 0x54a   : > { %v4530_v41 = vadd.f32 %v4529_v18, %v8261_v20  ;;  %v4564_v14 = vsel %vm725_vm7, %v4563_v62, %v7610_v6 }
 0x54b   : > { %v4541_v19 = vadd.f32 %v4539_v3, %v8264_v27  ;;  %v4551_v59 = vrot.slane %v4549_v51, 5  ;;  %v4565_v5 = vsel %vm525_vm6, %v4564_v14, %v4464_v53 }
 0x54c   : > { %v4570_v0 = vsel %vm4562_vm14, %v4569_v4, %v4530_v41  ;;  %4574 = vst.msk [vmem:[%s366_s18] sm:$0xff] %vm4573_vm15, %v4565_v5 }
 0x54d   : > { %v4542_v17 = vadd.f32 %v4541_v19, %v8262_v35  ;;  %v4553_v26 = vadd.f32 %v4551_v59, %v8264_v27 }
 0x54f   : > { %v4554_v46 = vadd.f32 %v4553_v26, %v8263_v55  ;;  %v4571_v20 = vsel %vm725_vm7, %v4570_v0, %v4542_v17 }
 0x551   : > { %v4572_v9 = vsel %vm525_vm6, %v4571_v20, %v4554_v46 }
 0x552   : > { %4575 = vst.msk [vmem:[%s366_s18 + $0x8] sm:$0xff] %vm4573_vm15, %v4572_v9 }
 0x553 PF: > { %s8269_s21 = sld [smem:[#allocation7_spill]] }
 0x559   : > { %s20_s30 = sadd.s32 1, %s8269_s21  }
 0x55a   : > { %p17_p1 = scmp.ge.s32.totalorder %s20_s30, 4  }
 0x55c   :  { %19 = sbr.rel (!%p17_p1) target bundleno = 12 (0xc), region = 122 }
 0x561   :  { %4597 = vsyncpa [#allocation5], 1 }
 0x562   :  { %4599 = vsyncpa [#allocation5 + $0x1], 1 }

</bundles_post_ra>
